<compile_context>
chip_gen: v7x
topology: tpu7x:2x2x1
jax: 0.10.0
libtpu: 0.0.40
codegen_flags: <defaults>
</compile_context>

<pallas_src>
import functools
import math

import jax
import jax.numpy as jnp
from jax.experimental import pallas as pl
from jax.experimental.pallas import tpu as pltpu

_LN_EPS = 1e-5
_GELU_C = 0.7978845608028654  # sqrt(2/pi)
_NEG_INF = -1e30


def _layer_norm(x, gamma, beta):
    mu = jnp.mean(x, axis=-1, keepdims=True)
    xc = x - mu
    var = jnp.mean(xc * xc, axis=-1, keepdims=True)
    return xc * jax.lax.rsqrt(var + _LN_EPS) * gamma + beta


def _gelu_tanh(x):
    # TODO(synk): PyTorch nn.GELU() is erf-exact; tanh approximation used here
    # (max abs deviation ~3e-4) since erf has no guaranteed Mosaic lowering.
    return 0.5 * x * (1.0 + jnp.tanh(_GELU_C * (x + 0.044715 * x * x * x)))


def _encoder_block_kernel(x_ref, ln1_g_ref, ln1_b_ref,
                          wq_ref, bq_ref, wkv_ref, bkv_ref,
                          wproj_ref, bproj_ref, ln2_g_ref, ln2_b_ref,
                          w1_ref, b1_ref, w2_ref, b2_ref,
                          out_ref, ctx_ref, *, num_heads, seq_valid):
    f32 = jnp.float32
    bf16 = jnp.bfloat16
    s_pad, e = x_ref.shape                    # full (padded) sequence block
    tq = out_ref.shape[0]                     # query-row tile
    nh = num_heads
    d = e // nh
    inv_sqrt_e = 1.0 / math.sqrt(e)

    # ---- LayerNorm 1 over the full sequence (needed for K/V) ----
    x_full = x_ref[...].astype(f32)
    x1_full = _layer_norm(x_full, ln1_g_ref[...], ln1_b_ref[...])

    # ---- fused K/V projection for the whole sequence (bf16 MXU, f32 acc) ----
    kv = jnp.dot(x1_full.astype(bf16), wkv_ref[...],
                 preferred_element_type=f32) + bkv_ref[...]
    k_bf = kv[:, :e].astype(bf16)
    v_bf = kv[:, e:].astype(bf16)

    # ---- LayerNorm 1 + Q projection for this tile of query rows only ----
    row0 = pl.multiple_of(pl.program_id(1) * tq, tq)
    xq = x_ref[pl.ds(row0, tq), :].astype(f32)
    x1_q = _layer_norm(xq, ln1_g_ref[...], ln1_b_ref[...])
    q = jnp.dot(x1_q.astype(bf16), wq_ref[...],
                preferred_element_type=f32) + bq_ref[...]
    q_bf = q.astype(bf16)

    # key-padding mask (hoisted out of the head loop; seq_valid is static)
    key_ok = None
    if seq_valid != s_pad:
        key_ok = jax.lax.broadcasted_iota(jnp.int32, (tq, s_pad), 1) < seq_valid

    def one_head(qh, kh, vh):
        # scores = q @ k^T, contracting last dims (no transpose op); bf16 MXU.
        s = jax.lax.dot_general(qh, kh, (((1,), (1,)), ((), ())),
                                preferred_element_type=f32)        # (tq, s_pad)
        if key_ok is not None:
            s = jnp.where(key_ok, s, _NEG_INF)
        # NOTE: no pre-softmax scaling, matching the reference module; the
        # softmax normalization and the post-softmax 1/sqrt(E) are folded into
        # one per-row multiply applied AFTER the P@V matmul.
        m = jnp.max(s, axis=-1, keepdims=True)
        p = jnp.exp(s - m)
        inv = inv_sqrt_e * pl.reciprocal(jnp.sum(p, axis=-1, keepdims=True),
                                         approx=True)
        return jnp.dot(p.astype(bf16), vh, preferred_element_type=f32) * inv

    # Heads processed in pairs: 2*d-wide slabs (128 lanes at ViT widths) for
    # the q/k/v reads and the ctx writes; outputs accumulate into VMEM scratch
    # instead of a full-width concatenate.
    pair = 2 if nh % 2 == 0 else 1
    for h0 in range(0, nh, pair):
        lo, hi = h0 * d, (h0 + pair) * d
        qs, ks, vs = q_bf[:, lo:hi], k_bf[:, lo:hi], v_bf[:, lo:hi]
        outs = [one_head(qs[:, j * d:(j + 1) * d],
                         ks[:, j * d:(j + 1) * d],
                         vs[:, j * d:(j + 1) * d]) for j in range(pair)]
        ctx_ref[:, lo:hi] = outs[0] if pair == 1 else jnp.concatenate(outs, -1)

    # attention residual is added to the LN1 output BEFORE the projection.
    ctx = ctx_ref[...] + x1_q
    attn = jnp.dot(ctx.astype(bf16), wproj_ref[...],
                   preferred_element_type=f32) + bproj_ref[...]

    # ---- LayerNorm 2 + FeedForward (residual to the LN2 output) ----
    x2 = _layer_norm(attn, ln2_g_ref[...], ln2_b_ref[...])
    h1 = jnp.dot(x2.astype(bf16), w1_ref[...],
                 preferred_element_type=f32) + b1_ref[...]
    g = _gelu_tanh(h1)
    mlp = jnp.dot(g.astype(bf16), w2_ref[...],
                  preferred_element_type=f32) + b2_ref[...]

    # single aligned, lane-dense (tq, E) store
    out_ref[...] = (mlp + x2).astype(out_ref.dtype)


def _cost_estimate(B, S, E, EH, n_tiles, num_heads):
    matmul_flops = (2 * S * E * E                    # Q projection
                    + n_tiles * 2 * S * (2 * E) * E  # K/V (recomputed per tile)
                    + 4 * S * S * E                  # QK^T + PV
                    + 2 * S * E * E                  # output projection
                    + 4 * S * E * EH)                # MLP
    weight_bytes = 2 * (E * E + 2 * E * E + E * E + E * EH + EH * E)  # bf16
    return pl.CostEstimate(
        flops=int(B * matmul_flops),
        transcendentals=int(B * (num_heads * S * S + S * EH)),
        bytes_accessed=int(weight_bytes + 2 * B * S * E * 4))


def _make_call(B, S_pad, E, EH, num_heads, q_tile, seq_valid, out_dtype,
               weight_buffer_count):
    kernel = functools.partial(_encoder_block_kernel,
                               num_heads=num_heads, seq_valid=seq_valid)

    w_kwargs = {}
    if weight_buffer_count is not None:
        # constant-index weight blocks need no double buffer (VMEM headroom on
        # v7x); falls back to default buffering if unsupported (see wrapper).
        w_kwargs = dict(pipeline_mode=pl.Buffered(weight_buffer_count))

    def wspec(shape):   # large weight matrices
        return pl.BlockSpec(shape, lambda b, i: (0,) * len(shape), **w_kwargs)

    def cspec(shape):   # small biases / LN params
        return pl.BlockSpec(shape, lambda b, i: (0,) * len(shape))

    grid = (B, S_pad // q_tile)
    grid_spec = pltpu.PrefetchScalarGridSpec(
        num_scalar_prefetch=0,
        grid=grid,
        in_specs=[
            pl.BlockSpec((None, S_pad, E), lambda b, i: (b, 0, 0)),  # x (full seq)
            cspec((1, E)), cspec((1, E)),                            # LN1 g, b
            wspec((E, E)), cspec((1, E)),                            # Wq, bq
            wspec((E, 2 * E)), cspec((1, 2 * E)),                    # Wkv, bkv
            wspec((E, E)), cspec((1, E)),                            # Wproj, bproj
            cspec((1, E)), cspec((1, E)),                            # LN2 g, b
            wspec((E, EH)), cspec((1, EH)),                          # W1, b1
            wspec((EH, E)), cspec((1, E)),                           # W2, b2
        ],
        out_specs=pl.BlockSpec((None, q_tile, E), lambda b, i: (b, i, 0)),
        scratch_shapes=[pltpu.VMEM((q_tile, E), jnp.float32)],       # ctx accum
    )

    return pl.pallas_call(
        kernel,
        out_shape=jax.ShapeDtypeStruct((B, S_pad, E), out_dtype),
        grid_spec=grid_spec,
        compiler_params=pltpu.CompilerParams(
            dimension_semantics=("parallel", "parallel"),
            vmem_limit_bytes=56 * 1024 * 1024),
        cost_estimate=_cost_estimate(B, S_pad, E, EH, S_pad // q_tile, num_heads),
    )


def transformer_encoder_block(x, params, *, num_heads, q_tile=None):
    """x: (B, S, E) float32. params: dict of raw f32 weights (see __main__)."""
    B, S, E = x.shape
    EH = params["w1"].shape[1]
    assert E % num_heads == 0

    if q_tile is None:
        q_tile = min(128, ((S + 7) // 8) * 8)
    q_tile = max(8, (q_tile // 8) * 8)               # sublane-aligned tile
    S_pad = ((S + q_tile - 1) // q_tile) * q_tile    # pad seq to tile multiple
    x_p = x if S_pad == S else jnp.pad(x, ((0, 0), (0, S_pad - S), (0, 0)))

    f32, bf = jnp.float32, jnp.bfloat16
    # TODO(synk): in real use pre-pack / pre-cast these once, not per call.
    args = (
        x_p,
        params["ln1_g"].reshape(1, E).astype(f32),
        params["ln1_b"].reshape(1, E).astype(f32),
        params["wq"].astype(bf), params["bq"].reshape(1, E).astype(f32),
        jnp.concatenate([params["wk"], params["wv"]], axis=1).astype(bf),
        jnp.concatenate([params["bk"], params["bv"]]).reshape(1, 2 * E).astype(f32),
        params["wproj"].astype(bf), params["bproj"].reshape(1, E).astype(f32),
        params["ln2_g"].reshape(1, E).astype(f32),
        params["ln2_b"].reshape(1, E).astype(f32),
        params["w1"].astype(bf), params["b1"].reshape(1, EH).astype(f32),
        params["w2"].astype(bf), params["b2"].reshape(1, E).astype(f32),
    )

    try:
        fn = _make_call(B, S_pad, E, EH, num_heads, q_tile, S, x.dtype,
                        weight_buffer_count=1)
        out = fn(*args)
    except Exception:
        # pl.Buffered(1) single-buffering unsupported on this jax version;
        # fall back to default double-buffered weight blocks (extra VMEM only,
        # numerics identical).
        fn = _make_call(B, S_pad, E, EH, num_heads, q_tile, S, x.dtype,
                        weight_buffer_count=None)
        out = fn(*args)

    return out[:, :S, :] if S_pad != S else out


def _reference(x, p, num_heads):
    """Pure-JAX f32 forward of the PyTorch module (same GELU approximation)."""
    B, S, E = x.shape
    D = E // num_heads

    def ln(t, g, b):
        mu = t.mean(-1, keepdims=True)
        var = ((t - mu) ** 2).mean(-1, keepdims=True)
        return (t - mu) / jnp.sqrt(var + _LN_EPS) * g + b

    x1 = ln(x, p["ln1_g"], p["ln1_b"])
    q = x1 @ p["wq"] + p["bq"]
    k = x1 @ p["wk"] + p["bk"]
    v = x1 @ p["wv"] + p["bv"]
    split = lambda t: t.reshape(B, S, num_heads, D).transpose(0, 2, 1, 3)
    q, k, v = split(q), split(k), split(v)
    a = jnp.einsum("bhqd,bhkd->bhqk", q, k)
    att = jax.nn.softmax(a, axis=-1) / math.sqrt(E)
    ctx = jnp.einsum("bhqk,bhkd->bhqd", att, v)
    ctx = ctx.transpose(0, 2, 1, 3).reshape(B, S, E) + x1
    attn_out = ctx @ p["wproj"] + p["bproj"]
    x2 = ln(attn_out, p["ln2_g"], p["ln2_b"])
    h1 = x2 @ p["w1"] + p["b1"]
    return _gelu_tanh(h1) @ p["w2"] + p["b2"] + x2


def _check(out, ref):
    rel = float(jnp.linalg.norm(out - ref) / (jnp.linalg.norm(ref) + 1e-12))
    err = float(jnp.max(jnp.abs(out - ref)))
    # bf16 matmul operands (f32 accumulation) -> looser agreement than f32.
    assert rel < 3e-2, f"relative L2 error {rel}"
    assert err < 1.5e-1, f"max abs err {err}"


if __name__ == "__main__":
    # small shapes consistent with the module: batch=2, seq=16, emb=32, 8 heads
    B, S, E, H, EXP = 2, 16, 32, 8, 4
    EH = EXP * E

    key = jax.random.PRNGKey(0)
    ks = jax.random.split(key, 18)
    sc_e = 1.0 / math.sqrt(E)
    sc_h = 1.0 / math.sqrt(EH)

    x = jax.random.normal(ks[0], (B, S, E), jnp.float32)

    params = dict(
        ln1_g=1.0 + 0.1 * jax.random.normal(ks[1], (E,), jnp.float32),
        ln1_b=0.1 * jax.random.normal(ks[2], (E,), jnp.float32),
        wq=jax.random.normal(ks[3], (E, E), jnp.float32) * sc_e,
        bq=0.02 * jax.random.normal(ks[4], (E,), jnp.float32),
        wk=jax.random.normal(ks[5], (E, E), jnp.float32) * sc_e,
        bk=0.02 * jax.random.normal(ks[6], (E,), jnp.float32),
        wv=jax.random.normal(ks[7], (E, E), jnp.float32) * sc_e,
        bv=0.02 * jax.random.normal(ks[8], (E,), jnp.float32),
        wproj=jax.random.normal(ks[9], (E, E), jnp.float32) * sc_e,
        bproj=0.02 * jax.random.normal(ks[10], (E,), jnp.float32),
        ln2_g=1.0 + 0.1 * jax.random.normal(ks[11], (E,), jnp.float32),
        ln2_b=0.1 * jax.random.normal(ks[12], (E,), jnp.float32),
        w1=jax.random.normal(ks[13], (E, EH), jnp.float32) * sc_e,
        b1=0.02 * jax.random.normal(ks[14], (EH,), jnp.float32),
        w2=jax.random.normal(ks[15], (EH, E), jnp.float32) * sc_h,
        b2=0.02 * jax.random.normal(ks[16], (E,), jnp.float32),
    )

    # main check: two query-row tiles per batch element (grid = (2, 2))
    out = transformer_encoder_block(x, params, num_heads=H, q_tile=8)
    out = jax.block_until_ready(out)
    assert out.shape == (B, S, E)
    _check(out, _reference(x, params, H))

    # padded-sequence path: S=13 -> padded to 16, padded keys masked
    x_odd = x[:, :13, :]
    out_odd = transformer_encoder_block(x_odd, params, num_heads=H, q_tile=8)
    out_odd = jax.block_until_ready(out_odd)
    assert out_odd.shape == (B, 13, E)
    _check(out_odd, _reference(x_odd, params, H))

    print("KERNEL_OK")
</pallas_src>

<mosaic_0001>
module attributes {stable_mosaic.version = 11 : i64} {
  func.func @_encoder_block_kernel(%arg0: i32, %arg1: i32, %arg2: memref<1x16x32xf32, #tpu.memory_space<vmem>>, %arg3: memref<1x32xf32, #tpu.memory_space<vmem>>, %arg4: memref<1x32xf32, #tpu.memory_space<vmem>>, %arg5: memref<32x32xbf16, #tpu.memory_space<vmem>>, %arg6: memref<1x32xf32, #tpu.memory_space<vmem>>, %arg7: memref<32x64xbf16, #tpu.memory_space<vmem>>, %arg8: memref<1x64xf32, #tpu.memory_space<vmem>>, %arg9: memref<32x32xbf16, #tpu.memory_space<vmem>>, %arg10: memref<1x32xf32, #tpu.memory_space<vmem>>, %arg11: memref<1x32xf32, #tpu.memory_space<vmem>>, %arg12: memref<1x32xf32, #tpu.memory_space<vmem>>, %arg13: memref<32x128xbf16, #tpu.memory_space<vmem>>, %arg14: memref<1x128xf32, #tpu.memory_space<vmem>>, %arg15: memref<128x32xbf16, #tpu.memory_space<vmem>>, %arg16: memref<1x32xf32, #tpu.memory_space<vmem>>, %arg17: memref<1x8x32xf32, #tpu.memory_space<vmem>>, %arg18: memref<8x32xf32, #tpu.memory_space<vmem>>) attributes {dimension_semantics = [#tpu.dimension_semantics<parallel>, #tpu.dimension_semantics<parallel>], iteration_bounds = array<i64: 2, 2>, scalar_prefetch = 0 : i64, scratch_operands = 1 : i64, tpu.core_type = #tpu.core_type<tc>, window_params = [{transform_indices = @transform_0, window_bounds = array<i64: 1, 16, 32>}, {pipeline_mode = #tpu.pipeline_mode<synchronous>, transform_indices = @transform_1, window_bounds = array<i64: 1, 32>}, {pipeline_mode = #tpu.pipeline_mode<synchronous>, transform_indices = @transform_2, window_bounds = array<i64: 1, 32>}, {pipeline_mode = #tpu.pipeline_mode<synchronous>, transform_indices = @transform_3, window_bounds = array<i64: 32, 32>}, {pipeline_mode = #tpu.pipeline_mode<synchronous>, transform_indices = @transform_4, window_bounds = array<i64: 1, 32>}, {pipeline_mode = #tpu.pipeline_mode<synchronous>, transform_indices = @transform_5, window_bounds = array<i64: 32, 64>}, {pipeline_mode = #tpu.pipeline_mode<synchronous>, transform_indices = @transform_6, window_bounds = array<i64: 1, 64>}, {pipeline_mode = #tpu.pipeline_mode<synchronous>, transform_indices = @transform_7, window_bounds = array<i64: 32, 32>}, {pipeline_mode = #tpu.pipeline_mode<synchronous>, transform_indices = @transform_8, window_bounds = array<i64: 1, 32>}, {pipeline_mode = #tpu.pipeline_mode<synchronous>, transform_indices = @transform_9, window_bounds = array<i64: 1, 32>}, {pipeline_mode = #tpu.pipeline_mode<synchronous>, transform_indices = @transform_10, window_bounds = array<i64: 1, 32>}, {pipeline_mode = #tpu.pipeline_mode<synchronous>, transform_indices = @transform_11, window_bounds = array<i64: 32, 128>}, {pipeline_mode = #tpu.pipeline_mode<synchronous>, transform_indices = @transform_12, window_bounds = array<i64: 1, 128>}, {pipeline_mode = #tpu.pipeline_mode<synchronous>, transform_indices = @transform_13, window_bounds = array<i64: 128, 32>}, {pipeline_mode = #tpu.pipeline_mode<synchronous>, transform_indices = @transform_14, window_bounds = array<i64: 1, 32>}, {transform_indices = @transform_15, window_bounds = array<i64: 1, 8, 32>}]} {
    %c0 = arith.constant 0 : index
    %c0_0 = arith.constant 0 : index
    %c0_1 = arith.constant 0 : index
    %0 = vector.load %arg2[%c0, %c0_0, %c0_1] : memref<1x16x32xf32, #tpu.memory_space<vmem>>, vector<1x16x32xf32>
    %1 = vector.shape_cast %0 : vector<1x16x32xf32> to vector<16x32xf32>
    %c0_2 = arith.constant 0 : index
    %c0_3 = arith.constant 0 : index
    %2 = vector.load %arg3[%c0_2, %c0_3] : memref<1x32xf32, #tpu.memory_space<vmem>>, vector<1x32xf32>
    %c0_4 = arith.constant 0 : index
    %c0_5 = arith.constant 0 : index
    %3 = vector.load %arg4[%c0_4, %c0_5] : memref<1x32xf32, #tpu.memory_space<vmem>>, vector<1x32xf32>
    %cst = arith.constant dense<0.000000e+00> : vector<16xf32>
    %4 = vector.multi_reduction <add>, %1, %cst [1] : vector<16x32xf32> to vector<16xf32>
    %5 = vector.shape_cast %4 : vector<16xf32> to vector<16x1xf32>
    %cst_6 = arith.constant 3.200000e+01 : f32
    %6 = vector.broadcast %cst_6 : f32 to vector<16x1xf32>
    %7 = arith.divf %5, %6 : vector<16x1xf32>
    %8 = vector.broadcast %7 : vector<16x1xf32> to vector<16x32xf32>
    %9 = arith.subf %1, %8 : vector<16x32xf32>
    %10 = arith.mulf %9, %9 : vector<16x32xf32>
    %cst_7 = arith.constant dense<0.000000e+00> : vector<16xf32>
    %11 = vector.multi_reduction <add>, %10, %cst_7 [1] : vector<16x32xf32> to vector<16xf32>
    %12 = vector.shape_cast %11 : vector<16xf32> to vector<16x1xf32>
    %cst_8 = arith.constant 3.200000e+01 : f32
    %13 = vector.broadcast %cst_8 : f32 to vector<16x1xf32>
    %14 = arith.divf %12, %13 : vector<16x1xf32>
    %cst_9 = arith.constant 9.99999974E-6 : f32
    %15 = vector.broadcast %cst_9 : f32 to vector<16x1xf32>
    %16 = arith.addf %14, %15 : vector<16x1xf32>
    %17 = math.rsqrt %16 : vector<16x1xf32>
    %18 = vector.broadcast %17 : vector<16x1xf32> to vector<16x32xf32>
    %19 = arith.mulf %9, %18 : vector<16x32xf32>
    %20 = vector.broadcast %2 : vector<1x32xf32> to vector<16x32xf32>
    %21 = arith.mulf %19, %20 : vector<16x32xf32>
    %22 = vector.broadcast %3 : vector<1x32xf32> to vector<16x32xf32>
    %23 = arith.addf %21, %22 : vector<16x32xf32>
    %24 = arith.truncf %23 : vector<16x32xf32> to vector<16x32xbf16>
    %c0_10 = arith.constant 0 : index
    %c0_11 = arith.constant 0 : index
    %25 = vector.load %arg7[%c0_10, %c0_11] : memref<32x64xbf16, #tpu.memory_space<vmem>>, vector<32x64xbf16>
    %cst_12 = arith.constant dense<0.000000e+00> : vector<16x64xf32>
    %26 = tpu.matmul %24, %25, %cst_12 {dimension_numbers = #tpu.dot_dimension_numbers<[1], [0], [0], [1], [0, 0, 1, 1], [], []>} : vector<16x32xbf16>, vector<32x64xbf16>, vector<16x64xf32> -> vector<16x64xf32>
    %c0_13 = arith.constant 0 : index
    %c0_14 = arith.constant 0 : index
    %27 = vector.load %arg8[%c0_13, %c0_14] : memref<1x64xf32, #tpu.memory_space<vmem>>, vector<1x64xf32>
    %28 = vector.broadcast %27 : vector<1x64xf32> to vector<16x64xf32>
    %29 = arith.addf %26, %28 : vector<16x64xf32>
    %30 = vector.extract_strided_slice %29 {offsets = [0, 0], sizes = [16, 32], strides = [1, 1]} : vector<16x64xf32> to vector<16x32xf32>
    %31 = arith.truncf %30 : vector<16x32xf32> to vector<16x32xbf16>
    %32 = vector.extract_strided_slice %29 {offsets = [0, 32], sizes = [16, 32], strides = [1, 1]} : vector<16x64xf32> to vector<16x32xf32>
    %33 = arith.truncf %32 : vector<16x32xf32> to vector<16x32xbf16>
    %c8_i32 = arith.constant 8 : i32
    %34 = arith.muli %arg1, %c8_i32 : i32
    %35 = tpu.assume_multiple %34, 8 : i32
    %c0_15 = arith.constant 0 : index
    %36 = arith.index_cast %35 : i32 to index
    %c0_16 = arith.constant 0 : index
    %37 = vector.load %arg2[%c0_15, %36, %c0_16] : memref<1x16x32xf32, #tpu.memory_space<vmem>>, vector<1x8x32xf32>
    %38 = vector.shape_cast %37 : vector<1x8x32xf32> to vector<8x32xf32>
    %c0_17 = arith.constant 0 : index
    %c0_18 = arith.constant 0 : index
    %39 = vector.load %arg3[%c0_17, %c0_18] : memref<1x32xf32, #tpu.memory_space<vmem>>, vector<1x32xf32>
    %c0_19 = arith.constant 0 : index
    %c0_20 = arith.constant 0 : index
    %40 = vector.load %arg4[%c0_19, %c0_20] : memref<1x32xf32, #tpu.memory_space<vmem>>, vector<1x32xf32>
    %cst_21 = arith.constant dense<0.000000e+00> : vector<8xf32>
    %41 = vector.multi_reduction <add>, %38, %cst_21 [1] : vector<8x32xf32> to vector<8xf32>
    %42 = vector.shape_cast %41 : vector<8xf32> to vector<8x1xf32>
    %cst_22 = arith.constant 3.200000e+01 : f32
    %43 = vector.broadcast %cst_22 : f32 to vector<8x1xf32>
    %44 = arith.divf %42, %43 : vector<8x1xf32>
    %45 = vector.broadcast %44 : vector<8x1xf32> to vector<8x32xf32>
    %46 = arith.subf %38, %45 : vector<8x32xf32>
    %47 = arith.mulf %46, %46 : vector<8x32xf32>
    %cst_23 = arith.constant dense<0.000000e+00> : vector<8xf32>
    %48 = vector.multi_reduction <add>, %47, %cst_23 [1] : vector<8x32xf32> to vector<8xf32>
    %49 = vector.shape_cast %48 : vector<8xf32> to vector<8x1xf32>
    %cst_24 = arith.constant 3.200000e+01 : f32
    %50 = vector.broadcast %cst_24 : f32 to vector<8x1xf32>
    %51 = arith.divf %49, %50 : vector<8x1xf32>
    %cst_25 = arith.constant 9.99999974E-6 : f32
    %52 = vector.broadcast %cst_25 : f32 to vector<8x1xf32>
    %53 = arith.addf %51, %52 : vector<8x1xf32>
    %54 = math.rsqrt %53 : vector<8x1xf32>
    %55 = vector.broadcast %54 : vector<8x1xf32> to vector<8x32xf32>
    %56 = arith.mulf %46, %55 : vector<8x32xf32>
    %57 = vector.broadcast %39 : vector<1x32xf32> to vector<8x32xf32>
    %58 = arith.mulf %56, %57 : vector<8x32xf32>
    %59 = vector.broadcast %40 : vector<1x32xf32> to vector<8x32xf32>
    %60 = arith.addf %58, %59 : vector<8x32xf32>
    %61 = arith.truncf %60 : vector<8x32xf32> to vector<8x32xbf16>
    %c0_26 = arith.constant 0 : index
    %c0_27 = arith.constant 0 : index
    %62 = vector.load %arg5[%c0_26, %c0_27] : memref<32x32xbf16, #tpu.memory_space<vmem>>, vector<32x32xbf16>
    %cst_28 = arith.constant dense<0.000000e+00> : vector<8x32xf32>
    %63 = tpu.matmul %61, %62, %cst_28 {dimension_numbers = #tpu.dot_dimension_numbers<[1], [0], [0], [1], [0, 0, 1, 1], [], []>} : vector<8x32xbf16>, vector<32x32xbf16>, vector<8x32xf32> -> vector<8x32xf32>
    %c0_29 = arith.constant 0 : index
    %c0_30 = arith.constant 0 : index
    %64 = vector.load %arg6[%c0_29, %c0_30] : memref<1x32xf32, #tpu.memory_space<vmem>>, vector<1x32xf32>
    %65 = vector.broadcast %64 : vector<1x32xf32> to vector<8x32xf32>
    %66 = arith.addf %63, %65 : vector<8x32xf32>
    %67 = arith.truncf %66 : vector<8x32xf32> to vector<8x32xbf16>
    %68 = vector.extract_strided_slice %67 {offsets = [0, 0], sizes = [8, 8], strides = [1, 1]} : vector<8x32xbf16> to vector<8x8xbf16>
    %69 = vector.extract_strided_slice %31 {offsets = [0, 0], sizes = [16, 8], strides = [1, 1]} : vector<16x32xbf16> to vector<16x8xbf16>
    %70 = vector.extract_strided_slice %33 {offsets = [0, 0], sizes = [16, 8], strides = [1, 1]} : vector<16x32xbf16> to vector<16x8xbf16>
    %71 = vector.extract_strided_slice %68 {offsets = [0, 0], sizes = [8, 4], strides = [1, 1]} : vector<8x8xbf16> to vector<8x4xbf16>
    %72 = vector.extract_strided_slice %69 {offsets = [0, 0], sizes = [16, 4], strides = [1, 1]} : vector<16x8xbf16> to vector<16x4xbf16>
    %73 = vector.extract_strided_slice %70 {offsets = [0, 0], sizes = [16, 4], strides = [1, 1]} : vector<16x8xbf16> to vector<16x4xbf16>
    %cst_31 = arith.constant dense<0.000000e+00> : vector<8x16xf32>
    %74 = tpu.matmul %71, %72, %cst_31 {dimension_numbers = #tpu.dot_dimension_numbers<[1], [1], [0], [0], [0, 0, 1, 0], [], []>} : vector<8x4xbf16>, vector<16x4xbf16>, vector<8x16xf32> -> vector<8x16xf32>
    %cst_32 = arith.constant dense<0xFF800000> : vector<8xf32>
    %75 = vector.multi_reduction <maximumf>, %74, %cst_32 [1] : vector<8x16xf32> to vector<8xf32>
    %76 = vector.shape_cast %75 : vector<8xf32> to vector<8x1xf32>
    %77 = vector.broadcast %76 : vector<8x1xf32> to vector<8x16xf32>
    %78 = arith.subf %74, %77 : vector<8x16xf32>
    %79 = math.exp %78 : vector<8x16xf32>
    %cst_33 = arith.constant dense<0.000000e+00> : vector<8xf32>
    %80 = vector.multi_reduction <add>, %79, %cst_33 [1] : vector<8x16xf32> to vector<8xf32>
    %81 = vector.shape_cast %80 : vector<8xf32> to vector<8x1xf32>
    %82 = tpu.reciprocal %81 {approx = true} : vector<8x1xf32> -> vector<8x1xf32>
    %cst_34 = arith.constant 0.176776692 : f32
    %83 = vector.broadcast %cst_34 : f32 to vector<8x1xf32>
    %84 = arith.mulf %83, %82 : vector<8x1xf32>
    %85 = arith.truncf %79 : vector<8x16xf32> to vector<8x16xbf16>
    %cst_35 = arith.constant dense<0.000000e+00> : vector<8x4xf32>
    %86 = tpu.matmul %85, %73, %cst_35 {dimension_numbers = #tpu.dot_dimension_numbers<[1], [0], [0], [1], [0, 0, 1, 1], [], []>} : vector<8x16xbf16>, vector<16x4xbf16>, vector<8x4xf32> -> vector<8x4xf32>
    %87 = vector.broadcast %84 : vector<8x1xf32> to vector<8x4xf32>
    %88 = arith.mulf %86, %87 : vector<8x4xf32>
    %89 = vector.extract_strided_slice %68 {offsets = [0, 4], sizes = [8, 4], strides = [1, 1]} : vector<8x8xbf16> to vector<8x4xbf16>
    %90 = vector.extract_strided_slice %69 {offsets = [0, 4], sizes = [16, 4], strides = [1, 1]} : vector<16x8xbf16> to vector<16x4xbf16>
    %91 = vector.extract_strided_slice %70 {offsets = [0, 4], sizes = [16, 4], strides = [1, 1]} : vector<16x8xbf16> to vector<16x4xbf16>
    %cst_36 = arith.constant dense<0.000000e+00> : vector<8x16xf32>
    %92 = tpu.matmul %89, %90, %cst_36 {dimension_numbers = #tpu.dot_dimension_numbers<[1], [1], [0], [0], [0, 0, 1, 0], [], []>} : vector<8x4xbf16>, vector<16x4xbf16>, vector<8x16xf32> -> vector<8x16xf32>
    %cst_37 = arith.constant dense<0xFF800000> : vector<8xf32>
    %93 = vector.multi_reduction <maximumf>, %92, %cst_37 [1] : vector<8x16xf32> to vector<8xf32>
    %94 = vector.shape_cast %93 : vector<8xf32> to vector<8x1xf32>
    %95 = vector.broadcast %94 : vector<8x1xf32> to vector<8x16xf32>
    %96 = arith.subf %92, %95 : vector<8x16xf32>
    %97 = math.exp %96 : vector<8x16xf32>
    %cst_38 = arith.constant dense<0.000000e+00> : vector<8xf32>
    %98 = vector.multi_reduction <add>, %97, %cst_38 [1] : vector<8x16xf32> to vector<8xf32>
    %99 = vector.shape_cast %98 : vector<8xf32> to vector<8x1xf32>
    %100 = tpu.reciprocal %99 {approx = true} : vector<8x1xf32> -> vector<8x1xf32>
    %cst_39 = arith.constant 0.176776692 : f32
    %101 = vector.broadcast %cst_39 : f32 to vector<8x1xf32>
    %102 = arith.mulf %101, %100 : vector<8x1xf32>
    %103 = arith.truncf %97 : vector<8x16xf32> to vector<8x16xbf16>
    %cst_40 = arith.constant dense<0.000000e+00> : vector<8x4xf32>
    %104 = tpu.matmul %103, %91, %cst_40 {dimension_numbers = #tpu.dot_dimension_numbers<[1], [0], [0], [1], [0, 0, 1, 1], [], []>} : vector<8x16xbf16>, vector<16x4xbf16>, vector<8x4xf32> -> vector<8x4xf32>
    %105 = vector.broadcast %102 : vector<8x1xf32> to vector<8x4xf32>
    %106 = arith.mulf %104, %105 : vector<8x4xf32>
    %107 = tpu.concatenate %88, %106 in 1 : vector<8x4xf32>, vector<8x4xf32> -> vector<8x8xf32>
    %c0_41 = arith.constant 0 : index
    %c0_42 = arith.constant 0 : index
    %108 = vector.load %arg18[%c0_41, %c0_42] : memref<8x32xf32, #tpu.memory_space<vmem>>, vector<8x8xf32>
    tpu.vector_store %arg18[%c0_41, %c0_42], %107 {strides = array<i32>} : memref<8x32xf32, #tpu.memory_space<vmem>>, vector<8x8xf32>,
    %109 = vector.extract_strided_slice %67 {offsets = [0, 8], sizes = [8, 8], strides = [1, 1]} : vector<8x32xbf16> to vector<8x8xbf16>
    %110 = vector.extract_strided_slice %31 {offsets = [0, 8], sizes = [16, 8], strides = [1, 1]} : vector<16x32xbf16> to vector<16x8xbf16>
    %111 = vector.extract_strided_slice %33 {offsets = [0, 8], sizes = [16, 8], strides = [1, 1]} : vector<16x32xbf16> to vector<16x8xbf16>
    %112 = vector.extract_strided_slice %109 {offsets = [0, 0], sizes = [8, 4], strides = [1, 1]} : vector<8x8xbf16> to vector<8x4xbf16>
    %113 = vector.extract_strided_slice %110 {offsets = [0, 0], sizes = [16, 4], strides = [1, 1]} : vector<16x8xbf16> to vector<16x4xbf16>
    %114 = vector.extract_strided_slice %111 {offsets = [0, 0], sizes = [16, 4], strides = [1, 1]} : vector<16x8xbf16> to vector<16x4xbf16>
    %cst_43 = arith.constant dense<0.000000e+00> : vector<8x16xf32>
    %115 = tpu.matmul %112, %113, %cst_43 {dimension_numbers = #tpu.dot_dimension_numbers<[1], [1], [0], [0], [0, 0, 1, 0], [], []>} : vector<8x4xbf16>, vector<16x4xbf16>, vector<8x16xf32> -> vector<8x16xf32>
    %cst_44 = arith.constant dense<0xFF800000> : vector<8xf32>
    %116 = vector.multi_reduction <maximumf>, %115, %cst_44 [1] : vector<8x16xf32> to vector<8xf32>
    %117 = vector.shape_cast %116 : vector<8xf32> to vector<8x1xf32>
    %118 = vector.broadcast %117 : vector<8x1xf32> to vector<8x16xf32>
    %119 = arith.subf %115, %118 : vector<8x16xf32>
    %120 = math.exp %119 : vector<8x16xf32>
    %cst_45 = arith.constant dense<0.000000e+00> : vector<8xf32>
    %121 = vector.multi_reduction <add>, %120, %cst_45 [1] : vector<8x16xf32> to vector<8xf32>
    %122 = vector.shape_cast %121 : vector<8xf32> to vector<8x1xf32>
    %123 = tpu.reciprocal %122 {approx = true} : vector<8x1xf32> -> vector<8x1xf32>
    %cst_46 = arith.constant 0.176776692 : f32
    %124 = vector.broadcast %cst_46 : f32 to vector<8x1xf32>
    %125 = arith.mulf %124, %123 : vector<8x1xf32>
    %126 = arith.truncf %120 : vector<8x16xf32> to vector<8x16xbf16>
    %cst_47 = arith.constant dense<0.000000e+00> : vector<8x4xf32>
    %127 = tpu.matmul %126, %114, %cst_47 {dimension_numbers = #tpu.dot_dimension_numbers<[1], [0], [0], [1], [0, 0, 1, 1], [], []>} : vector<8x16xbf16>, vector<16x4xbf16>, vector<8x4xf32> -> vector<8x4xf32>
    %128 = vector.broadcast %125 : vector<8x1xf32> to vector<8x4xf32>
    %129 = arith.mulf %127, %128 : vector<8x4xf32>
    %130 = vector.extract_strided_slice %109 {offsets = [0, 4], sizes = [8, 4], strides = [1, 1]} : vector<8x8xbf16> to vector<8x4xbf16>
    %131 = vector.extract_strided_slice %110 {offsets = [0, 4], sizes = [16, 4], strides = [1, 1]} : vector<16x8xbf16> to vector<16x4xbf16>
    %132 = vector.extract_strided_slice %111 {offsets = [0, 4], sizes = [16, 4], strides = [1, 1]} : vector<16x8xbf16> to vector<16x4xbf16>
    %cst_48 = arith.constant dense<0.000000e+00> : vector<8x16xf32>
    %133 = tpu.matmul %130, %131, %cst_48 {dimension_numbers = #tpu.dot_dimension_numbers<[1], [1], [0], [0], [0, 0, 1, 0], [], []>} : vector<8x4xbf16>, vector<16x4xbf16>, vector<8x16xf32> -> vector<8x16xf32>
    %cst_49 = arith.constant dense<0xFF800000> : vector<8xf32>
    %134 = vector.multi_reduction <maximumf>, %133, %cst_49 [1] : vector<8x16xf32> to vector<8xf32>
    %135 = vector.shape_cast %134 : vector<8xf32> to vector<8x1xf32>
    %136 = vector.broadcast %135 : vector<8x1xf32> to vector<8x16xf32>
    %137 = arith.subf %133, %136 : vector<8x16xf32>
    %138 = math.exp %137 : vector<8x16xf32>
    %cst_50 = arith.constant dense<0.000000e+00> : vector<8xf32>
    %139 = vector.multi_reduction <add>, %138, %cst_50 [1] : vector<8x16xf32> to vector<8xf32>
    %140 = vector.shape_cast %139 : vector<8xf32> to vector<8x1xf32>
    %141 = tpu.reciprocal %140 {approx = true} : vector<8x1xf32> -> vector<8x1xf32>
    %cst_51 = arith.constant 0.176776692 : f32
    %142 = vector.broadcast %cst_51 : f32 to vector<8x1xf32>
    %143 = arith.mulf %142, %141 : vector<8x1xf32>
    %144 = arith.truncf %138 : vector<8x16xf32> to vector<8x16xbf16>
    %cst_52 = arith.constant dense<0.000000e+00> : vector<8x4xf32>
    %145 = tpu.matmul %144, %132, %cst_52 {dimension_numbers = #tpu.dot_dimension_numbers<[1], [0], [0], [1], [0, 0, 1, 1], [], []>} : vector<8x16xbf16>, vector<16x4xbf16>, vector<8x4xf32> -> vector<8x4xf32>
    %146 = vector.broadcast %143 : vector<8x1xf32> to vector<8x4xf32>
    %147 = arith.mulf %145, %146 : vector<8x4xf32>
    %148 = tpu.concatenate %129, %147 in 1 : vector<8x4xf32>, vector<8x4xf32> -> vector<8x8xf32>
    %c0_53 = arith.constant 0 : index
    %c8 = arith.constant 8 : index
    %149 = vector.load %arg18[%c0_53, %c8] : memref<8x32xf32, #tpu.memory_space<vmem>>, vector<8x8xf32>
    tpu.vector_store %arg18[%c0_53, %c8], %148 {strides = array<i32>} : memref<8x32xf32, #tpu.memory_space<vmem>>, vector<8x8xf32>,
    %150 = vector.extract_strided_slice %67 {offsets = [0, 16], sizes = [8, 8], strides = [1, 1]} : vector<8x32xbf16> to vector<8x8xbf16>
    %151 = vector.extract_strided_slice %31 {offsets = [0, 16], sizes = [16, 8], strides = [1, 1]} : vector<16x32xbf16> to vector<16x8xbf16>
    %152 = vector.extract_strided_slice %33 {offsets = [0, 16], sizes = [16, 8], strides = [1, 1]} : vector<16x32xbf16> to vector<16x8xbf16>
    %153 = vector.extract_strided_slice %150 {offsets = [0, 0], sizes = [8, 4], strides = [1, 1]} : vector<8x8xbf16> to vector<8x4xbf16>
    %154 = vector.extract_strided_slice %151 {offsets = [0, 0], sizes = [16, 4], strides = [1, 1]} : vector<16x8xbf16> to vector<16x4xbf16>
    %155 = vector.extract_strided_slice %152 {offsets = [0, 0], sizes = [16, 4], strides = [1, 1]} : vector<16x8xbf16> to vector<16x4xbf16>
    %cst_54 = arith.constant dense<0.000000e+00> : vector<8x16xf32>
    %156 = tpu.matmul %153, %154, %cst_54 {dimension_numbers = #tpu.dot_dimension_numbers<[1], [1], [0], [0], [0, 0, 1, 0], [], []>} : vector<8x4xbf16>, vector<16x4xbf16>, vector<8x16xf32> -> vector<8x16xf32>
    %cst_55 = arith.constant dense<0xFF800000> : vector<8xf32>
    %157 = vector.multi_reduction <maximumf>, %156, %cst_55 [1] : vector<8x16xf32> to vector<8xf32>
    %158 = vector.shape_cast %157 : vector<8xf32> to vector<8x1xf32>
    %159 = vector.broadcast %158 : vector<8x1xf32> to vector<8x16xf32>
    %160 = arith.subf %156, %159 : vector<8x16xf32>
    %161 = math.exp %160 : vector<8x16xf32>
    %cst_56 = arith.constant dense<0.000000e+00> : vector<8xf32>
    %162 = vector.multi_reduction <add>, %161, %cst_56 [1] : vector<8x16xf32> to vector<8xf32>
    %163 = vector.shape_cast %162 : vector<8xf32> to vector<8x1xf32>
    %164 = tpu.reciprocal %163 {approx = true} : vector<8x1xf32> -> vector<8x1xf32>
    %cst_57 = arith.constant 0.176776692 : f32
    %165 = vector.broadcast %cst_57 : f32 to vector<8x1xf32>
    %166 = arith.mulf %165, %164 : vector<8x1xf32>
    %167 = arith.truncf %161 : vector<8x16xf32> to vector<8x16xbf16>
    %cst_58 = arith.constant dense<0.000000e+00> : vector<8x4xf32>
    %168 = tpu.matmul %167, %155, %cst_58 {dimension_numbers = #tpu.dot_dimension_numbers<[1], [0], [0], [1], [0, 0, 1, 1], [], []>} : vector<8x16xbf16>, vector<16x4xbf16>, vector<8x4xf32> -> vector<8x4xf32>
    %169 = vector.broadcast %166 : vector<8x1xf32> to vector<8x4xf32>
    %170 = arith.mulf %168, %169 : vector<8x4xf32>
    %171 = vector.extract_strided_slice %150 {offsets = [0, 4], sizes = [8, 4], strides = [1, 1]} : vector<8x8xbf16> to vector<8x4xbf16>
    %172 = vector.extract_strided_slice %151 {offsets = [0, 4], sizes = [16, 4], strides = [1, 1]} : vector<16x8xbf16> to vector<16x4xbf16>
    %173 = vector.extract_strided_slice %152 {offsets = [0, 4], sizes = [16, 4], strides = [1, 1]} : vector<16x8xbf16> to vector<16x4xbf16>
    %cst_59 = arith.constant dense<0.000000e+00> : vector<8x16xf32>
    %174 = tpu.matmul %171, %172, %cst_59 {dimension_numbers = #tpu.dot_dimension_numbers<[1], [1], [0], [0], [0, 0, 1, 0], [], []>} : vector<8x4xbf16>, vector<16x4xbf16>, vector<8x16xf32> -> vector<8x16xf32>
    %cst_60 = arith.constant dense<0xFF800000> : vector<8xf32>
    %175 = vector.multi_reduction <maximumf>, %174, %cst_60 [1] : vector<8x16xf32> to vector<8xf32>
    %176 = vector.shape_cast %175 : vector<8xf32> to vector<8x1xf32>
    %177 = vector.broadcast %176 : vector<8x1xf32> to vector<8x16xf32>
    %178 = arith.subf %174, %177 : vector<8x16xf32>
    %179 = math.exp %178 : vector<8x16xf32>
    %cst_61 = arith.constant dense<0.000000e+00> : vector<8xf32>
    %180 = vector.multi_reduction <add>, %179, %cst_61 [1] : vector<8x16xf32> to vector<8xf32>
    %181 = vector.shape_cast %180 : vector<8xf32> to vector<8x1xf32>
    %182 = tpu.reciprocal %181 {approx = true} : vector<8x1xf32> -> vector<8x1xf32>
    %cst_62 = arith.constant 0.176776692 : f32
    %183 = vector.broadcast %cst_62 : f32 to vector<8x1xf32>
    %184 = arith.mulf %183, %182 : vector<8x1xf32>
    %185 = arith.truncf %179 : vector<8x16xf32> to vector<8x16xbf16>
    %cst_63 = arith.constant dense<0.000000e+00> : vector<8x4xf32>
    %186 = tpu.matmul %185, %173, %cst_63 {dimension_numbers = #tpu.dot_dimension_numbers<[1], [0], [0], [1], [0, 0, 1, 1], [], []>} : vector<8x16xbf16>, vector<16x4xbf16>, vector<8x4xf32> -> vector<8x4xf32>
    %187 = vector.broadcast %184 : vector<8x1xf32> to vector<8x4xf32>
    %188 = arith.mulf %186, %187 : vector<8x4xf32>
    %189 = tpu.concatenate %170, %188 in 1 : vector<8x4xf32>, vector<8x4xf32> -> vector<8x8xf32>
    %c0_64 = arith.constant 0 : index
    %c16 = arith.constant 16 : index
    %190 = vector.load %arg18[%c0_64, %c16] : memref<8x32xf32, #tpu.memory_space<vmem>>, vector<8x8xf32>
    tpu.vector_store %arg18[%c0_64, %c16], %189 {strides = array<i32>} : memref<8x32xf32, #tpu.memory_space<vmem>>, vector<8x8xf32>,
    %191 = vector.extract_strided_slice %67 {offsets = [0, 24], sizes = [8, 8], strides = [1, 1]} : vector<8x32xbf16> to vector<8x8xbf16>
    %192 = vector.extract_strided_slice %31 {offsets = [0, 24], sizes = [16, 8], strides = [1, 1]} : vector<16x32xbf16> to vector<16x8xbf16>
    %193 = vector.extract_strided_slice %33 {offsets = [0, 24], sizes = [16, 8], strides = [1, 1]} : vector<16x32xbf16> to vector<16x8xbf16>
    %194 = vector.extract_strided_slice %191 {offsets = [0, 0], sizes = [8, 4], strides = [1, 1]} : vector<8x8xbf16> to vector<8x4xbf16>
    %195 = vector.extract_strided_slice %192 {offsets = [0, 0], sizes = [16, 4], strides = [1, 1]} : vector<16x8xbf16> to vector<16x4xbf16>
    %196 = vector.extract_strided_slice %193 {offsets = [0, 0], sizes = [16, 4], strides = [1, 1]} : vector<16x8xbf16> to vector<16x4xbf16>
    %cst_65 = arith.constant dense<0.000000e+00> : vector<8x16xf32>
    %197 = tpu.matmul %194, %195, %cst_65 {dimension_numbers = #tpu.dot_dimension_numbers<[1], [1], [0], [0], [0, 0, 1, 0], [], []>} : vector<8x4xbf16>, vector<16x4xbf16>, vector<8x16xf32> -> vector<8x16xf32>
    %cst_66 = arith.constant dense<0xFF800000> : vector<8xf32>
    %198 = vector.multi_reduction <maximumf>, %197, %cst_66 [1] : vector<8x16xf32> to vector<8xf32>
    %199 = vector.shape_cast %198 : vector<8xf32> to vector<8x1xf32>
    %200 = vector.broadcast %199 : vector<8x1xf32> to vector<8x16xf32>
    %201 = arith.subf %197, %200 : vector<8x16xf32>
    %202 = math.exp %201 : vector<8x16xf32>
    %cst_67 = arith.constant dense<0.000000e+00> : vector<8xf32>
    %203 = vector.multi_reduction <add>, %202, %cst_67 [1] : vector<8x16xf32> to vector<8xf32>
    %204 = vector.shape_cast %203 : vector<8xf32> to vector<8x1xf32>
    %205 = tpu.reciprocal %204 {approx = true} : vector<8x1xf32> -> vector<8x1xf32>
    %cst_68 = arith.constant 0.176776692 : f32
    %206 = vector.broadcast %cst_68 : f32 to vector<8x1xf32>
    %207 = arith.mulf %206, %205 : vector<8x1xf32>
    %208 = arith.truncf %202 : vector<8x16xf32> to vector<8x16xbf16>
    %cst_69 = arith.constant dense<0.000000e+00> : vector<8x4xf32>
    %209 = tpu.matmul %208, %196, %cst_69 {dimension_numbers = #tpu.dot_dimension_numbers<[1], [0], [0], [1], [0, 0, 1, 1], [], []>} : vector<8x16xbf16>, vector<16x4xbf16>, vector<8x4xf32> -> vector<8x4xf32>
    %210 = vector.broadcast %207 : vector<8x1xf32> to vector<8x4xf32>
    %211 = arith.mulf %209, %210 : vector<8x4xf32>
    %212 = vector.extract_strided_slice %191 {offsets = [0, 4], sizes = [8, 4], strides = [1, 1]} : vector<8x8xbf16> to vector<8x4xbf16>
    %213 = vector.extract_strided_slice %192 {offsets = [0, 4], sizes = [16, 4], strides = [1, 1]} : vector<16x8xbf16> to vector<16x4xbf16>
    %214 = vector.extract_strided_slice %193 {offsets = [0, 4], sizes = [16, 4], strides = [1, 1]} : vector<16x8xbf16> to vector<16x4xbf16>
    %cst_70 = arith.constant dense<0.000000e+00> : vector<8x16xf32>
    %215 = tpu.matmul %212, %213, %cst_70 {dimension_numbers = #tpu.dot_dimension_numbers<[1], [1], [0], [0], [0, 0, 1, 0], [], []>} : vector<8x4xbf16>, vector<16x4xbf16>, vector<8x16xf32> -> vector<8x16xf32>
    %cst_71 = arith.constant dense<0xFF800000> : vector<8xf32>
    %216 = vector.multi_reduction <maximumf>, %215, %cst_71 [1] : vector<8x16xf32> to vector<8xf32>
    %217 = vector.shape_cast %216 : vector<8xf32> to vector<8x1xf32>
    %218 = vector.broadcast %217 : vector<8x1xf32> to vector<8x16xf32>
    %219 = arith.subf %215, %218 : vector<8x16xf32>
    %220 = math.exp %219 : vector<8x16xf32>
    %cst_72 = arith.constant dense<0.000000e+00> : vector<8xf32>
    %221 = vector.multi_reduction <add>, %220, %cst_72 [1] : vector<8x16xf32> to vector<8xf32>
    %222 = vector.shape_cast %221 : vector<8xf32> to vector<8x1xf32>
    %223 = tpu.reciprocal %222 {approx = true} : vector<8x1xf32> -> vector<8x1xf32>
    %cst_73 = arith.constant 0.176776692 : f32
    %224 = vector.broadcast %cst_73 : f32 to vector<8x1xf32>
    %225 = arith.mulf %224, %223 : vector<8x1xf32>
    %226 = arith.truncf %220 : vector<8x16xf32> to vector<8x16xbf16>
    %cst_74 = arith.constant dense<0.000000e+00> : vector<8x4xf32>
    %227 = tpu.matmul %226, %214, %cst_74 {dimension_numbers = #tpu.dot_dimension_numbers<[1], [0], [0], [1], [0, 0, 1, 1], [], []>} : vector<8x16xbf16>, vector<16x4xbf16>, vector<8x4xf32> -> vector<8x4xf32>
    %228 = vector.broadcast %225 : vector<8x1xf32> to vector<8x4xf32>
    %229 = arith.mulf %227, %228 : vector<8x4xf32>
    %230 = tpu.concatenate %211, %229 in 1 : vector<8x4xf32>, vector<8x4xf32> -> vector<8x8xf32>
    %c0_75 = arith.constant 0 : index
    %c24 = arith.constant 24 : index
    %231 = vector.load %arg18[%c0_75, %c24] : memref<8x32xf32, #tpu.memory_space<vmem>>, vector<8x8xf32>
    tpu.vector_store %arg18[%c0_75, %c24], %230 {strides = array<i32>} : memref<8x32xf32, #tpu.memory_space<vmem>>, vector<8x8xf32>,
    %c0_76 = arith.constant 0 : index
    %c0_77 = arith.constant 0 : index
    %232 = vector.load %arg18[%c0_76, %c0_77] : memref<8x32xf32, #tpu.memory_space<vmem>>, vector<8x32xf32>
    %233 = arith.addf %232, %60 : vector<8x32xf32>
    %234 = arith.truncf %233 : vector<8x32xf32> to vector<8x32xbf16>
    %c0_78 = arith.constant 0 : index
    %c0_79 = arith.constant 0 : index
    %235 = vector.load %arg9[%c0_78, %c0_79] : memref<32x32xbf16, #tpu.memory_space<vmem>>, vector<32x32xbf16>
    %cst_80 = arith.constant dense<0.000000e+00> : vector<8x32xf32>
    %236 = tpu.matmul %234, %235, %cst_80 {dimension_numbers = #tpu.dot_dimension_numbers<[1], [0], [0], [1], [0, 0, 1, 1], [], []>} : vector<8x32xbf16>, vector<32x32xbf16>, vector<8x32xf32> -> vector<8x32xf32>
    %c0_81 = arith.constant 0 : index
    %c0_82 = arith.constant 0 : index
    %237 = vector.load %arg10[%c0_81, %c0_82] : memref<1x32xf32, #tpu.memory_space<vmem>>, vector<1x32xf32>
    %238 = vector.broadcast %237 : vector<1x32xf32> to vector<8x32xf32>
    %239 = arith.addf %236, %238 : vector<8x32xf32>
    %c0_83 = arith.constant 0 : index
    %c0_84 = arith.constant 0 : index
    %240 = vector.load %arg11[%c0_83, %c0_84] : memref<1x32xf32, #tpu.memory_space<vmem>>, vector<1x32xf32>
    %c0_85 = arith.constant 0 : index
    %c0_86 = arith.constant 0 : index
    %241 = vector.load %arg12[%c0_85, %c0_86] : memref<1x32xf32, #tpu.memory_space<vmem>>, vector<1x32xf32>
    %cst_87 = arith.constant dense<0.000000e+00> : vector<8xf32>
    %242 = vector.multi_reduction <add>, %239, %cst_87 [1] : vector<8x32xf32> to vector<8xf32>
    %243 = vector.shape_cast %242 : vector<8xf32> to vector<8x1xf32>
    %cst_88 = arith.constant 3.200000e+01 : f32
    %244 = vector.broadcast %cst_88 : f32 to vector<8x1xf32>
    %245 = arith.divf %243, %244 : vector<8x1xf32>
    %246 = vector.broadcast %245 : vector<8x1xf32> to vector<8x32xf32>
    %247 = arith.subf %239, %246 : vector<8x32xf32>
    %248 = arith.mulf %247, %247 : vector<8x32xf32>
    %cst_89 = arith.constant dense<0.000000e+00> : vector<8xf32>
    %249 = vector.multi_reduction <add>, %248, %cst_89 [1] : vector<8x32xf32> to vector<8xf32>
    %250 = vector.shape_cast %249 : vector<8xf32> to vector<8x1xf32>
    %cst_90 = arith.constant 3.200000e+01 : f32
    %251 = vector.broadcast %cst_90 : f32 to vector<8x1xf32>
    %252 = arith.divf %250, %251 : vector<8x1xf32>
    %cst_91 = arith.constant 9.99999974E-6 : f32
    %253 = vector.broadcast %cst_91 : f32 to vector<8x1xf32>
    %254 = arith.addf %252, %253 : vector<8x1xf32>
    %255 = math.rsqrt %254 : vector<8x1xf32>
    %256 = vector.broadcast %255 : vector<8x1xf32> to vector<8x32xf32>
    %257 = arith.mulf %247, %256 : vector<8x32xf32>
    %258 = vector.broadcast %240 : vector<1x32xf32> to vector<8x32xf32>
    %259 = arith.mulf %257, %258 : vector<8x32xf32>
    %260 = vector.broadcast %241 : vector<1x32xf32> to vector<8x32xf32>
    %261 = arith.addf %259, %260 : vector<8x32xf32>
    %262 = arith.truncf %261 : vector<8x32xf32> to vector<8x32xbf16>
    %c0_92 = arith.constant 0 : index
    %c0_93 = arith.constant 0 : index
    %263 = vector.load %arg13[%c0_92, %c0_93] : memref<32x128xbf16, #tpu.memory_space<vmem>>, vector<32x128xbf16>
    %cst_94 = arith.constant dense<0.000000e+00> : vector<8x128xf32>
    %264 = tpu.matmul %262, %263, %cst_94 {dimension_numbers = #tpu.dot_dimension_numbers<[1], [0], [0], [1], [0, 0, 1, 1], [], []>} : vector<8x32xbf16>, vector<32x128xbf16>, vector<8x128xf32> -> vector<8x128xf32>
    %c0_95 = arith.constant 0 : index
    %c0_96 = arith.constant 0 : index
    %265 = vector.load %arg14[%c0_95, %c0_96] : memref<1x128xf32, #tpu.memory_space<vmem>>, vector<1x128xf32>
    %266 = vector.broadcast %265 : vector<1x128xf32> to vector<8x128xf32>
    %267 = arith.addf %264, %266 : vector<8x128xf32>
    %cst_97 = arith.constant 5.000000e-01 : f32
    %268 = vector.broadcast %cst_97 : f32 to vector<8x128xf32>
    %269 = arith.mulf %268, %267 : vector<8x128xf32>
    %cst_98 = arith.constant 4.471500e-02 : f32
    %270 = vector.broadcast %cst_98 : f32 to vector<8x128xf32>
    %271 = arith.mulf %270, %267 : vector<8x128xf32>
    %272 = arith.mulf %271, %267 : vector<8x128xf32>
    %273 = arith.mulf %272, %267 : vector<8x128xf32>
    %274 = arith.addf %267, %273 : vector<8x128xf32>
    %cst_99 = arith.constant 0.797884583 : f32
    %275 = vector.broadcast %cst_99 : f32 to vector<8x128xf32>
    %276 = arith.mulf %275, %274 : vector<8x128xf32>
    %277 = math.tanh %276 : vector<8x128xf32>
    %cst_100 = arith.constant 1.000000e+00 : f32
    %278 = vector.broadcast %cst_100 : f32 to vector<8x128xf32>
    %279 = arith.addf %278, %277 : vector<8x128xf32>
    %280 = arith.mulf %269, %279 : vector<8x128xf32>
    %281 = arith.truncf %280 : vector<8x128xf32> to vector<8x128xbf16>
    %c0_101 = arith.constant 0 : index
    %c0_102 = arith.constant 0 : index
    %282 = vector.load %arg15[%c0_101, %c0_102] : memref<128x32xbf16, #tpu.memory_space<vmem>>, vector<128x32xbf16>
    %cst_103 = arith.constant dense<0.000000e+00> : vector<8x32xf32>
    %283 = tpu.matmul %281, %282, %cst_103 {dimension_numbers = #tpu.dot_dimension_numbers<[1], [0], [0], [1], [0, 0, 1, 1], [], []>} : vector<8x128xbf16>, vector<128x32xbf16>, vector<8x32xf32> -> vector<8x32xf32>
    %c0_104 = arith.constant 0 : index
    %c0_105 = arith.constant 0 : index
    %284 = vector.load %arg16[%c0_104, %c0_105] : memref<1x32xf32, #tpu.memory_space<vmem>>, vector<1x32xf32>
    %285 = vector.broadcast %284 : vector<1x32xf32> to vector<8x32xf32>
    %286 = arith.addf %283, %285 : vector<8x32xf32>
    %287 = arith.addf %286, %261 : vector<8x32xf32>
    %c0_106 = arith.constant 0 : index
    %c0_107 = arith.constant 0 : index
    %c0_108 = arith.constant 0 : index
    %288 = vector.load %arg17[%c0_106, %c0_107, %c0_108] : memref<1x8x32xf32, #tpu.memory_space<vmem>>, vector<1x8x32xf32>
    %289 = vector.shape_cast %288 : vector<1x8x32xf32> to vector<8x32xf32>
    %290 = vector.shape_cast %287 : vector<8x32xf32> to vector<1x8x32xf32>
    tpu.vector_store %arg17[%c0_106, %c0_107, %c0_108], %290 {strides = array<i32>} : memref<1x8x32xf32, #tpu.memory_space<vmem>>, vector<1x8x32xf32>,
    return
  }
  func.func @transform_0(%arg0: i32, %arg1: i32) -> (i32, i32, i32) {
    %c0_i32 = arith.constant 0 : i32
    %c0_i32_0 = arith.constant 0 : i32
    %c0_i32_1 = arith.constant 0 : i32
    return %arg0, %c0_i32, %c0_i32_0 : i32, i32, i32
  }
  func.func @transform_1(%arg0: i32, %arg1: i32) -> (i32, i32) {
    %c0_i32 = arith.constant 0 : i32
    %c0_i32_0 = arith.constant 0 : i32
    %c0_i32_1 = arith.constant 0 : i32
    return %c0_i32, %c0_i32_0 : i32, i32
  }
  func.func @transform_2(%arg0: i32, %arg1: i32) -> (i32, i32) {
    %c0_i32 = arith.constant 0 : i32
    %c0_i32_0 = arith.constant 0 : i32
    %c0_i32_1 = arith.constant 0 : i32
    return %c0_i32, %c0_i32_0 : i32, i32
  }
  func.func @transform_3(%arg0: i32, %arg1: i32) -> (i32, i32) {
    %c0_i32 = arith.constant 0 : i32
    %c0_i32_0 = arith.constant 0 : i32
    %c0_i32_1 = arith.constant 0 : i32
    return %c0_i32, %c0_i32_0 : i32, i32
  }
  func.func @transform_4(%arg0: i32, %arg1: i32) -> (i32, i32) {
    %c0_i32 = arith.constant 0 : i32
    %c0_i32_0 = arith.constant 0 : i32
    %c0_i32_1 = arith.constant 0 : i32
    return %c0_i32, %c0_i32_0 : i32, i32
  }
  func.func @transform_5(%arg0: i32, %arg1: i32) -> (i32, i32) {
    %c0_i32 = arith.constant 0 : i32
    %c0_i32_0 = arith.constant 0 : i32
    %c0_i32_1 = arith.constant 0 : i32
    return %c0_i32, %c0_i32_0 : i32, i32
  }
  func.func @transform_6(%arg0: i32, %arg1: i32) -> (i32, i32) {
    %c0_i32 = arith.constant 0 : i32
    %c0_i32_0 = arith.constant 0 : i32
    %c0_i32_1 = arith.constant 0 : i32
    return %c0_i32, %c0_i32_0 : i32, i32
  }
  func.func @transform_7(%arg0: i32, %arg1: i32) -> (i32, i32) {
    %c0_i32 = arith.constant 0 : i32
    %c0_i32_0 = arith.constant 0 : i32
    %c0_i32_1 = arith.constant 0 : i32
    return %c0_i32, %c0_i32_0 : i32, i32
  }
  func.func @transform_8(%arg0: i32, %arg1: i32) -> (i32, i32) {
    %c0_i32 = arith.constant 0 : i32
    %c0_i32_0 = arith.constant 0 : i32
    %c0_i32_1 = arith.constant 0 : i32
    return %c0_i32, %c0_i32_0 : i32, i32
  }
  func.func @transform_9(%arg0: i32, %arg1: i32) -> (i32, i32) {
    %c0_i32 = arith.constant 0 : i32
    %c0_i32_0 = arith.constant 0 : i32
    %c0_i32_1 = arith.constant 0 : i32
    return %c0_i32, %c0_i32_0 : i32, i32
  }
  func.func @transform_10(%arg0: i32, %arg1: i32) -> (i32, i32) {
    %c0_i32 = arith.constant 0 : i32
    %c0_i32_0 = arith.constant 0 : i32
    %c0_i32_1 = arith.constant 0 : i32
    return %c0_i32, %c0_i32_0 : i32, i32
  }
  func.func @transform_11(%arg0: i32, %arg1: i32) -> (i32, i32) {
    %c0_i32 = arith.constant 0 : i32
    %c0_i32_0 = arith.constant 0 : i32
    %c0_i32_1 = arith.constant 0 : i32
    return %c0_i32, %c0_i32_0 : i32, i32
  }
  func.func @transform_12(%arg0: i32, %arg1: i32) -> (i32, i32) {
    %c0_i32 = arith.constant 0 : i32
    %c0_i32_0 = arith.constant 0 : i32
    %c0_i32_1 = arith.constant 0 : i32
    return %c0_i32, %c0_i32_0 : i32, i32
  }
  func.func @transform_13(%arg0: i32, %arg1: i32) -> (i32, i32) {
    %c0_i32 = arith.constant 0 : i32
    %c0_i32_0 = arith.constant 0 : i32
    %c0_i32_1 = arith.constant 0 : i32
    return %c0_i32, %c0_i32_0 : i32, i32
  }
  func.func @transform_14(%arg0: i32, %arg1: i32) -> (i32, i32) {
    %c0_i32 = arith.constant 0 : i32
    %c0_i32_0 = arith.constant 0 : i32
    %c0_i32_1 = arith.constant 0 : i32
    return %c0_i32, %c0_i32_0 : i32, i32
  }
  func.func @transform_15(%arg0: i32, %arg1: i32) -> (i32, i32, i32) {
    %c0_i32 = arith.constant 0 : i32
    %c0_i32_0 = arith.constant 0 : i32
    return %arg0, %arg1, %c0_i32 : i32, i32, i32
  }
}

module attributes {stable_mosaic.version = 11 : i64} {
  func.func @_encoder_block_kernel(%arg0: i32, %arg1: i32, %arg2: memref<1x16x32xf32, #tpu.memory_space<vmem>>, %arg3: memref<1x32xf32, #tpu.memory_space<vmem>>, %arg4: memref<1x32xf32, #tpu.memory_space<vmem>>, %arg5: memref<32x32xbf16, #tpu.memory_space<vmem>>, %arg6: memref<1x32xf32, #tpu.memory_space<vmem>>, %arg7: memref<32x64xbf16, #tpu.memory_space<vmem>>, %arg8: memref<1x64xf32, #tpu.memory_space<vmem>>, %arg9: memref<32x32xbf16, #tpu.memory_space<vmem>>, %arg10: memref<1x32xf32, #tpu.memory_space<vmem>>, %arg11: memref<1x32xf32, #tpu.memory_space<vmem>>, %arg12: memref<1x32xf32, #tpu.memory_space<vmem>>, %arg13: memref<32x128xbf16, #tpu.memory_space<vmem>>, %arg14: memref<1x128xf32, #tpu.memory_space<vmem>>, %arg15: memref<128x32xbf16, #tpu.memory_space<vmem>>, %arg16: memref<1x32xf32, #tpu.memory_space<vmem>>, %arg17: memref<1x8x32xf32, #tpu.memory_space<vmem>>, %arg18: memref<8x32xf32, #tpu.memory_space<vmem>>) attributes {dimension_semantics = [#tpu.dimension_semantics<parallel>, #tpu.dimension_semantics<parallel>], iteration_bounds = array<i64: 2, 2>, scalar_prefetch = 0 : i64, scratch_operands = 1 : i64, tpu.core_type = #tpu.core_type<tc>, window_params = [{transform_indices = @transform_0, window_bounds = array<i64: 1, 16, 32>}, {pipeline_mode = #tpu.pipeline_mode<synchronous>, transform_indices = @transform_1, window_bounds = array<i64: 1, 32>}, {pipeline_mode = #tpu.pipeline_mode<synchronous>, transform_indices = @transform_2, window_bounds = array<i64: 1, 32>}, {pipeline_mode = #tpu.pipeline_mode<synchronous>, transform_indices = @transform_3, window_bounds = array<i64: 32, 32>}, {pipeline_mode = #tpu.pipeline_mode<synchronous>, transform_indices = @transform_4, window_bounds = array<i64: 1, 32>}, {pipeline_mode = #tpu.pipeline_mode<synchronous>, transform_indices = @transform_5, window_bounds = array<i64: 32, 64>}, {pipeline_mode = #tpu.pipeline_mode<synchronous>, transform_indices = @transform_6, window_bounds = array<i64: 1, 64>}, {pipeline_mode = #tpu.pipeline_mode<synchronous>, transform_indices = @transform_7, window_bounds = array<i64: 32, 32>}, {pipeline_mode = #tpu.pipeline_mode<synchronous>, transform_indices = @transform_8, window_bounds = array<i64: 1, 32>}, {pipeline_mode = #tpu.pipeline_mode<synchronous>, transform_indices = @transform_9, window_bounds = array<i64: 1, 32>}, {pipeline_mode = #tpu.pipeline_mode<synchronous>, transform_indices = @transform_10, window_bounds = array<i64: 1, 32>}, {pipeline_mode = #tpu.pipeline_mode<synchronous>, transform_indices = @transform_11, window_bounds = array<i64: 32, 128>}, {pipeline_mode = #tpu.pipeline_mode<synchronous>, transform_indices = @transform_12, window_bounds = array<i64: 1, 128>}, {pipeline_mode = #tpu.pipeline_mode<synchronous>, transform_indices = @transform_13, window_bounds = array<i64: 128, 32>}, {pipeline_mode = #tpu.pipeline_mode<synchronous>, transform_indices = @transform_14, window_bounds = array<i64: 1, 32>}, {transform_indices = @transform_15, window_bounds = array<i64: 1, 8, 32>}]} {
    %c0 = arith.constant 0 : index
    %c0_0 = arith.constant 0 : index
    %c0_1 = arith.constant 0 : index
    %0 = vector.load %arg2[%c0, %c0_0, %c0_1] : memref<1x16x32xf32, #tpu.memory_space<vmem>>, vector<1x16x32xf32>
    %1 = vector.shape_cast %0 : vector<1x16x32xf32> to vector<16x32xf32>
    %c0_2 = arith.constant 0 : index
    %c0_3 = arith.constant 0 : index
    %2 = vector.load %arg3[%c0_2, %c0_3] : memref<1x32xf32, #tpu.memory_space<vmem>>, vector<1x32xf32>
    %c0_4 = arith.constant 0 : index
    %c0_5 = arith.constant 0 : index
    %3 = vector.load %arg4[%c0_4, %c0_5] : memref<1x32xf32, #tpu.memory_space<vmem>>, vector<1x32xf32>
    %cst = arith.constant dense<0.000000e+00> : vector<16xf32>
    %4 = vector.multi_reduction <add>, %1, %cst [1] : vector<16x32xf32> to vector<16xf32>
    %5 = vector.shape_cast %4 : vector<16xf32> to vector<16x1xf32>
    %cst_6 = arith.constant 3.200000e+01 : f32
    %6 = vector.broadcast %cst_6 : f32 to vector<16x1xf32>
    %7 = arith.divf %5, %6 : vector<16x1xf32>
    %8 = vector.broadcast %7 : vector<16x1xf32> to vector<16x32xf32>
    %9 = arith.subf %1, %8 : vector<16x32xf32>
    %10 = arith.mulf %9, %9 : vector<16x32xf32>
    %cst_7 = arith.constant dense<0.000000e+00> : vector<16xf32>
    %11 = vector.multi_reduction <add>, %10, %cst_7 [1] : vector<16x32xf32> to vector<16xf32>
    %12 = vector.shape_cast %11 : vector<16xf32> to vector<16x1xf32>
    %cst_8 = arith.constant 3.200000e+01 : f32
    %13 = vector.broadcast %cst_8 : f32 to vector<16x1xf32>
    %14 = arith.divf %12, %13 : vector<16x1xf32>
    %cst_9 = arith.constant 9.99999974E-6 : f32
    %15 = vector.broadcast %cst_9 : f32 to vector<16x1xf32>
    %16 = arith.addf %14, %15 : vector<16x1xf32>
    %17 = math.rsqrt %16 : vector<16x1xf32>
    %18 = vector.broadcast %17 : vector<16x1xf32> to vector<16x32xf32>
    %19 = arith.mulf %9, %18 : vector<16x32xf32>
    %20 = vector.broadcast %2 : vector<1x32xf32> to vector<16x32xf32>
    %21 = arith.mulf %19, %20 : vector<16x32xf32>
    %22 = vector.broadcast %3 : vector<1x32xf32> to vector<16x32xf32>
    %23 = arith.addf %21, %22 : vector<16x32xf32>
    %24 = arith.truncf %23 : vector<16x32xf32> to vector<16x32xbf16>
    %c0_10 = arith.constant 0 : index
    %c0_11 = arith.constant 0 : index
    %25 = vector.load %arg7[%c0_10, %c0_11] : memref<32x64xbf16, #tpu.memory_space<vmem>>, vector<32x64xbf16>
    %cst_12 = arith.constant dense<0.000000e+00> : vector<16x64xf32>
    %26 = tpu.matmul %24, %25, %cst_12 {dimension_numbers = #tpu.dot_dimension_numbers<[1], [0], [0], [1], [0, 0, 1, 1], [], []>} : vector<16x32xbf16>, vector<32x64xbf16>, vector<16x64xf32> -> vector<16x64xf32>
    %c0_13 = arith.constant 0 : index
    %c0_14 = arith.constant 0 : index
    %27 = vector.load %arg8[%c0_13, %c0_14] : memref<1x64xf32, #tpu.memory_space<vmem>>, vector<1x64xf32>
    %28 = vector.broadcast %27 : vector<1x64xf32> to vector<16x64xf32>
    %29 = arith.addf %26, %28 : vector<16x64xf32>
    %30 = vector.extract_strided_slice %29 {offsets = [0, 0], sizes = [16, 32], strides = [1, 1]} : vector<16x64xf32> to vector<16x32xf32>
    %31 = arith.truncf %30 : vector<16x32xf32> to vector<16x32xbf16>
    %32 = vector.extract_strided_slice %29 {offsets = [0, 32], sizes = [16, 32], strides = [1, 1]} : vector<16x64xf32> to vector<16x32xf32>
    %33 = arith.truncf %32 : vector<16x32xf32> to vector<16x32xbf16>
    %c8_i32 = arith.constant 8 : i32
    %34 = arith.muli %arg1, %c8_i32 : i32
    %35 = tpu.assume_multiple %34, 8 : i32
    %c0_15 = arith.constant 0 : index
    %36 = arith.index_cast %35 : i32 to index
    %c0_16 = arith.constant 0 : index
    %37 = vector.load %arg2[%c0_15, %36, %c0_16] : memref<1x16x32xf32, #tpu.memory_space<vmem>>, vector<1x8x32xf32>
    %38 = vector.shape_cast %37 : vector<1x8x32xf32> to vector<8x32xf32>
    %c0_17 = arith.constant 0 : index
    %c0_18 = arith.constant 0 : index
    %39 = vector.load %arg3[%c0_17, %c0_18] : memref<1x32xf32, #tpu.memory_space<vmem>>, vector<1x32xf32>
    %c0_19 = arith.constant 0 : index
    %c0_20 = arith.constant 0 : index
    %40 = vector.load %arg4[%c0_19, %c0_20] : memref<1x32xf32, #tpu.memory_space<vmem>>, vector<1x32xf32>
    %cst_21 = arith.constant dense<0.000000e+00> : vector<8xf32>
    %41 = vector.multi_reduction <add>, %38, %cst_21 [1] : vector<8x32xf32> to vector<8xf32>
    %42 = vector.shape_cast %41 : vector<8xf32> to vector<8x1xf32>
    %cst_22 = arith.constant 3.200000e+01 : f32
    %43 = vector.broadcast %cst_22 : f32 to vector<8x1xf32>
    %44 = arith.divf %42, %43 : vector<8x1xf32>
    %45 = vector.broadcast %44 : vector<8x1xf32> to vector<8x32xf32>
    %46 = arith.subf %38, %45 : vector<8x32xf32>
    %47 = arith.mulf %46, %46 : vector<8x32xf32>
    %cst_23 = arith.constant dense<0.000000e+00> : vector<8xf32>
    %48 = vector.multi_reduction <add>, %47, %cst_23 [1] : vector<8x32xf32> to vector<8xf32>
    %49 = vector.shape_cast %48 : vector<8xf32> to vector<8x1xf32>
    %cst_24 = arith.constant 3.200000e+01 : f32
    %50 = vector.broadcast %cst_24 : f32 to vector<8x1xf32>
    %51 = arith.divf %49, %50 : vector<8x1xf32>
    %cst_25 = arith.constant 9.99999974E-6 : f32
    %52 = vector.broadcast %cst_25 : f32 to vector<8x1xf32>
    %53 = arith.addf %51, %52 : vector<8x1xf32>
    %54 = math.rsqrt %53 : vector<8x1xf32>
    %55 = vector.broadcast %54 : vector<8x1xf32> to vector<8x32xf32>
    %56 = arith.mulf %46, %55 : vector<8x32xf32>
    %57 = vector.broadcast %39 : vector<1x32xf32> to vector<8x32xf32>
    %58 = arith.mulf %56, %57 : vector<8x32xf32>
    %59 = vector.broadcast %40 : vector<1x32xf32> to vector<8x32xf32>
    %60 = arith.addf %58, %59 : vector<8x32xf32>
    %61 = arith.truncf %60 : vector<8x32xf32> to vector<8x32xbf16>
    %c0_26 = arith.constant 0 : index
    %c0_27 = arith.constant 0 : index
    %62 = vector.load %arg5[%c0_26, %c0_27] : memref<32x32xbf16, #tpu.memory_space<vmem>>, vector<32x32xbf16>
    %cst_28 = arith.constant dense<0.000000e+00> : vector<8x32xf32>
    %63 = tpu.matmul %61, %62, %cst_28 {dimension_numbers = #tpu.dot_dimension_numbers<[1], [0], [0], [1], [0, 0, 1, 1], [], []>} : vector<8x32xbf16>, vector<32x32xbf16>, vector<8x32xf32> -> vector<8x32xf32>
    %c0_29 = arith.constant 0 : index
    %c0_30 = arith.constant 0 : index
    %64 = vector.load %arg6[%c0_29, %c0_30] : memref<1x32xf32, #tpu.memory_space<vmem>>, vector<1x32xf32>
    %65 = vector.broadcast %64 : vector<1x32xf32> to vector<8x32xf32>
    %66 = arith.addf %63, %65 : vector<8x32xf32>
    %67 = arith.truncf %66 : vector<8x32xf32> to vector<8x32xbf16>
    %68 = vector.extract_strided_slice %67 {offsets = [0, 0], sizes = [8, 8], strides = [1, 1]} : vector<8x32xbf16> to vector<8x8xbf16>
    %69 = vector.extract_strided_slice %31 {offsets = [0, 0], sizes = [16, 8], strides = [1, 1]} : vector<16x32xbf16> to vector<16x8xbf16>
    %70 = vector.extract_strided_slice %33 {offsets = [0, 0], sizes = [16, 8], strides = [1, 1]} : vector<16x32xbf16> to vector<16x8xbf16>
    %71 = vector.extract_strided_slice %68 {offsets = [0, 0], sizes = [8, 4], strides = [1, 1]} : vector<8x8xbf16> to vector<8x4xbf16>
    %72 = vector.extract_strided_slice %69 {offsets = [0, 0], sizes = [16, 4], strides = [1, 1]} : vector<16x8xbf16> to vector<16x4xbf16>
    %73 = vector.extract_strided_slice %70 {offsets = [0, 0], sizes = [16, 4], strides = [1, 1]} : vector<16x8xbf16> to vector<16x4xbf16>
    %cst_31 = arith.constant dense<0.000000e+00> : vector<8x16xf32>
    %74 = tpu.matmul %71, %72, %cst_31 {dimension_numbers = #tpu.dot_dimension_numbers<[1], [1], [0], [0], [0, 0, 1, 0], [], []>} : vector<8x4xbf16>, vector<16x4xbf16>, vector<8x16xf32> -> vector<8x16xf32>
    %cst_32 = arith.constant dense<0xFF800000> : vector<8xf32>
    %75 = vector.multi_reduction <maximumf>, %74, %cst_32 [1] : vector<8x16xf32> to vector<8xf32>
    %76 = vector.shape_cast %75 : vector<8xf32> to vector<8x1xf32>
    %77 = vector.broadcast %76 : vector<8x1xf32> to vector<8x16xf32>
    %78 = arith.subf %74, %77 : vector<8x16xf32>
    %79 = math.exp %78 : vector<8x16xf32>
    %cst_33 = arith.constant dense<0.000000e+00> : vector<8xf32>
    %80 = vector.multi_reduction <add>, %79, %cst_33 [1] : vector<8x16xf32> to vector<8xf32>
    %81 = vector.shape_cast %80 : vector<8xf32> to vector<8x1xf32>
    %82 = tpu.reciprocal %81 {approx = true} : vector<8x1xf32> -> vector<8x1xf32>
    %cst_34 = arith.constant 0.176776692 : f32
    %83 = vector.broadcast %cst_34 : f32 to vector<8x1xf32>
    %84 = arith.mulf %83, %82 : vector<8x1xf32>
    %85 = arith.truncf %79 : vector<8x16xf32> to vector<8x16xbf16>
    %cst_35 = arith.constant dense<0.000000e+00> : vector<8x4xf32>
    %86 = tpu.matmul %85, %73, %cst_35 {dimension_numbers = #tpu.dot_dimension_numbers<[1], [0], [0], [1], [0, 0, 1, 1], [], []>} : vector<8x16xbf16>, vector<16x4xbf16>, vector<8x4xf32> -> vector<8x4xf32>
    %87 = vector.broadcast %84 : vector<8x1xf32> to vector<8x4xf32>
    %88 = arith.mulf %86, %87 : vector<8x4xf32>
    %89 = vector.extract_strided_slice %68 {offsets = [0, 4], sizes = [8, 4], strides = [1, 1]} : vector<8x8xbf16> to vector<8x4xbf16>
    %90 = vector.extract_strided_slice %69 {offsets = [0, 4], sizes = [16, 4], strides = [1, 1]} : vector<16x8xbf16> to vector<16x4xbf16>
    %91 = vector.extract_strided_slice %70 {offsets = [0, 4], sizes = [16, 4], strides = [1, 1]} : vector<16x8xbf16> to vector<16x4xbf16>
    %cst_36 = arith.constant dense<0.000000e+00> : vector<8x16xf32>
    %92 = tpu.matmul %89, %90, %cst_36 {dimension_numbers = #tpu.dot_dimension_numbers<[1], [1], [0], [0], [0, 0, 1, 0], [], []>} : vector<8x4xbf16>, vector<16x4xbf16>, vector<8x16xf32> -> vector<8x16xf32>
    %cst_37 = arith.constant dense<0xFF800000> : vector<8xf32>
    %93 = vector.multi_reduction <maximumf>, %92, %cst_37 [1] : vector<8x16xf32> to vector<8xf32>
    %94 = vector.shape_cast %93 : vector<8xf32> to vector<8x1xf32>
    %95 = vector.broadcast %94 : vector<8x1xf32> to vector<8x16xf32>
    %96 = arith.subf %92, %95 : vector<8x16xf32>
    %97 = math.exp %96 : vector<8x16xf32>
    %cst_38 = arith.constant dense<0.000000e+00> : vector<8xf32>
    %98 = vector.multi_reduction <add>, %97, %cst_38 [1] : vector<8x16xf32> to vector<8xf32>
    %99 = vector.shape_cast %98 : vector<8xf32> to vector<8x1xf32>
    %100 = tpu.reciprocal %99 {approx = true} : vector<8x1xf32> -> vector<8x1xf32>
    %cst_39 = arith.constant 0.176776692 : f32
    %101 = vector.broadcast %cst_39 : f32 to vector<8x1xf32>
    %102 = arith.mulf %101, %100 : vector<8x1xf32>
    %103 = arith.truncf %97 : vector<8x16xf32> to vector<8x16xbf16>
    %cst_40 = arith.constant dense<0.000000e+00> : vector<8x4xf32>
    %104 = tpu.matmul %103, %91, %cst_40 {dimension_numbers = #tpu.dot_dimension_numbers<[1], [0], [0], [1], [0, 0, 1, 1], [], []>} : vector<8x16xbf16>, vector<16x4xbf16>, vector<8x4xf32> -> vector<8x4xf32>
    %105 = vector.broadcast %102 : vector<8x1xf32> to vector<8x4xf32>
    %106 = arith.mulf %104, %105 : vector<8x4xf32>
    %107 = tpu.concatenate %88, %106 in 1 : vector<8x4xf32>, vector<8x4xf32> -> vector<8x8xf32>
    %c0_41 = arith.constant 0 : index
    %c0_42 = arith.constant 0 : index
    %108 = vector.load %arg18[%c0_41, %c0_42] : memref<8x32xf32, #tpu.memory_space<vmem>>, vector<8x8xf32>
    tpu.vector_store %arg18[%c0_41, %c0_42], %107 {strides = array<i32>} : memref<8x32xf32, #tpu.memory_space<vmem>>, vector<8x8xf32>,
    %109 = vector.extract_strided_slice %67 {offsets = [0, 8], sizes = [8, 8], strides = [1, 1]} : vector<8x32xbf16> to vector<8x8xbf16>
    %110 = vector.extract_strided_slice %31 {offsets = [0, 8], sizes = [16, 8], strides = [1, 1]} : vector<16x32xbf16> to vector<16x8xbf16>
    %111 = vector.extract_strided_slice %33 {offsets = [0, 8], sizes = [16, 8], strides = [1, 1]} : vector<16x32xbf16> to vector<16x8xbf16>
    %112 = vector.extract_strided_slice %109 {offsets = [0, 0], sizes = [8, 4], strides = [1, 1]} : vector<8x8xbf16> to vector<8x4xbf16>
    %113 = vector.extract_strided_slice %110 {offsets = [0, 0], sizes = [16, 4], strides = [1, 1]} : vector<16x8xbf16> to vector<16x4xbf16>
    %114 = vector.extract_strided_slice %111 {offsets = [0, 0], sizes = [16, 4], strides = [1, 1]} : vector<16x8xbf16> to vector<16x4xbf16>
    %cst_43 = arith.constant dense<0.000000e+00> : vector<8x16xf32>
    %115 = tpu.matmul %112, %113, %cst_43 {dimension_numbers = #tpu.dot_dimension_numbers<[1], [1], [0], [0], [0, 0, 1, 0], [], []>} : vector<8x4xbf16>, vector<16x4xbf16>, vector<8x16xf32> -> vector<8x16xf32>
    %cst_44 = arith.constant dense<0xFF800000> : vector<8xf32>
    %116 = vector.multi_reduction <maximumf>, %115, %cst_44 [1] : vector<8x16xf32> to vector<8xf32>
    %117 = vector.shape_cast %116 : vector<8xf32> to vector<8x1xf32>
    %118 = vector.broadcast %117 : vector<8x1xf32> to vector<8x16xf32>
    %119 = arith.subf %115, %118 : vector<8x16xf32>
    %120 = math.exp %119 : vector<8x16xf32>
    %cst_45 = arith.constant dense<0.000000e+00> : vector<8xf32>
    %121 = vector.multi_reduction <add>, %120, %cst_45 [1] : vector<8x16xf32> to vector<8xf32>
    %122 = vector.shape_cast %121 : vector<8xf32> to vector<8x1xf32>
    %123 = tpu.reciprocal %122 {approx = true} : vector<8x1xf32> -> vector<8x1xf32>
    %cst_46 = arith.constant 0.176776692 : f32
    %124 = vector.broadcast %cst_46 : f32 to vector<8x1xf32>
    %125 = arith.mulf %124, %123 : vector<8x1xf32>
    %126 = arith.truncf %120 : vector<8x16xf32> to vector<8x16xbf16>
    %cst_47 = arith.constant dense<0.000000e+00> : vector<8x4xf32>
    %127 = tpu.matmul %126, %114, %cst_47 {dimension_numbers = #tpu.dot_dimension_numbers<[1], [0], [0], [1], [0, 0, 1, 1], [], []>} : vector<8x16xbf16>, vector<16x4xbf16>, vector<8x4xf32> -> vector<8x4xf32>
    %128 = vector.broadcast %125 : vector<8x1xf32> to vector<8x4xf32>
    %129 = arith.mulf %127, %128 : vector<8x4xf32>
    %130 = vector.extract_strided_slice %109 {offsets = [0, 4], sizes = [8, 4], strides = [1, 1]} : vector<8x8xbf16> to vector<8x4xbf16>
    %131 = vector.extract_strided_slice %110 {offsets = [0, 4], sizes = [16, 4], strides = [1, 1]} : vector<16x8xbf16> to vector<16x4xbf16>
    %132 = vector.extract_strided_slice %111 {offsets = [0, 4], sizes = [16, 4], strides = [1, 1]} : vector<16x8xbf16> to vector<16x4xbf16>
    %cst_48 = arith.constant dense<0.000000e+00> : vector<8x16xf32>
    %133 = tpu.matmul %130, %131, %cst_48 {dimension_numbers = #tpu.dot_dimension_numbers<[1], [1], [0], [0], [0, 0, 1, 0], [], []>} : vector<8x4xbf16>, vector<16x4xbf16>, vector<8x16xf32> -> vector<8x16xf32>
    %cst_49 = arith.constant dense<0xFF800000> : vector<8xf32>
    %134 = vector.multi_reduction <maximumf>, %133, %cst_49 [1] : vector<8x16xf32> to vector<8xf32>
    %135 = vector.shape_cast %134 : vector<8xf32> to vector<8x1xf32>
    %136 = vector.broadcast %135 : vector<8x1xf32> to vector<8x16xf32>
    %137 = arith.subf %133, %136 : vector<8x16xf32>
    %138 = math.exp %137 : vector<8x16xf32>
    %cst_50 = arith.constant dense<0.000000e+00> : vector<8xf32>
    %139 = vector.multi_reduction <add>, %138, %cst_50 [1] : vector<8x16xf32> to vector<8xf32>
    %140 = vector.shape_cast %139 : vector<8xf32> to vector<8x1xf32>
    %141 = tpu.reciprocal %140 {approx = true} : vector<8x1xf32> -> vector<8x1xf32>
    %cst_51 = arith.constant 0.176776692 : f32
    %142 = vector.broadcast %cst_51 : f32 to vector<8x1xf32>
    %143 = arith.mulf %142, %141 : vector<8x1xf32>
    %144 = arith.truncf %138 : vector<8x16xf32> to vector<8x16xbf16>
    %cst_52 = arith.constant dense<0.000000e+00> : vector<8x4xf32>
    %145 = tpu.matmul %144, %132, %cst_52 {dimension_numbers = #tpu.dot_dimension_numbers<[1], [0], [0], [1], [0, 0, 1, 1], [], []>} : vector<8x16xbf16>, vector<16x4xbf16>, vector<8x4xf32> -> vector<8x4xf32>
    %146 = vector.broadcast %143 : vector<8x1xf32> to vector<8x4xf32>
    %147 = arith.mulf %145, %146 : vector<8x4xf32>
    %148 = tpu.concatenate %129, %147 in 1 : vector<8x4xf32>, vector<8x4xf32> -> vector<8x8xf32>
    %c0_53 = arith.constant 0 : index
    %c8 = arith.constant 8 : index
    %149 = vector.load %arg18[%c0_53, %c8] : memref<8x32xf32, #tpu.memory_space<vmem>>, vector<8x8xf32>
    tpu.vector_store %arg18[%c0_53, %c8], %148 {strides = array<i32>} : memref<8x32xf32, #tpu.memory_space<vmem>>, vector<8x8xf32>,
    %150 = vector.extract_strided_slice %67 {offsets = [0, 16], sizes = [8, 8], strides = [1, 1]} : vector<8x32xbf16> to vector<8x8xbf16>
    %151 = vector.extract_strided_slice %31 {offsets = [0, 16], sizes = [16, 8], strides = [1, 1]} : vector<16x32xbf16> to vector<16x8xbf16>
    %152 = vector.extract_strided_slice %33 {offsets = [0, 16], sizes = [16, 8], strides = [1, 1]} : vector<16x32xbf16> to vector<16x8xbf16>
    %153 = vector.extract_strided_slice %150 {offsets = [0, 0], sizes = [8, 4], strides = [1, 1]} : vector<8x8xbf16> to vector<8x4xbf16>
    %154 = vector.extract_strided_slice %151 {offsets = [0, 0], sizes = [16, 4], strides = [1, 1]} : vector<16x8xbf16> to vector<16x4xbf16>
    %155 = vector.extract_strided_slice %152 {offsets = [0, 0], sizes = [16, 4], strides = [1, 1]} : vector<16x8xbf16> to vector<16x4xbf16>
    %cst_54 = arith.constant dense<0.000000e+00> : vector<8x16xf32>
    %156 = tpu.matmul %153, %154, %cst_54 {dimension_numbers = #tpu.dot_dimension_numbers<[1], [1], [0], [0], [0, 0, 1, 0], [], []>} : vector<8x4xbf16>, vector<16x4xbf16>, vector<8x16xf32> -> vector<8x16xf32>
    %cst_55 = arith.constant dense<0xFF800000> : vector<8xf32>
    %157 = vector.multi_reduction <maximumf>, %156, %cst_55 [1] : vector<8x16xf32> to vector<8xf32>
    %158 = vector.shape_cast %157 : vector<8xf32> to vector<8x1xf32>
    %159 = vector.broadcast %158 : vector<8x1xf32> to vector<8x16xf32>
    %160 = arith.subf %156, %159 : vector<8x16xf32>
    %161 = math.exp %160 : vector<8x16xf32>
    %cst_56 = arith.constant dense<0.000000e+00> : vector<8xf32>
    %162 = vector.multi_reduction <add>, %161, %cst_56 [1] : vector<8x16xf32> to vector<8xf32>
    %163 = vector.shape_cast %162 : vector<8xf32> to vector<8x1xf32>
    %164 = tpu.reciprocal %163 {approx = true} : vector<8x1xf32> -> vector<8x1xf32>
    %cst_57 = arith.constant 0.176776692 : f32
    %165 = vector.broadcast %cst_57 : f32 to vector<8x1xf32>
    %166 = arith.mulf %165, %164 : vector<8x1xf32>
    %167 = arith.truncf %161 : vector<8x16xf32> to vector<8x16xbf16>
    %cst_58 = arith.constant dense<0.000000e+00> : vector<8x4xf32>
    %168 = tpu.matmul %167, %155, %cst_58 {dimension_numbers = #tpu.dot_dimension_numbers<[1], [0], [0], [1], [0, 0, 1, 1], [], []>} : vector<8x16xbf16>, vector<16x4xbf16>, vector<8x4xf32> -> vector<8x4xf32>
    %169 = vector.broadcast %166 : vector<8x1xf32> to vector<8x4xf32>
    %170 = arith.mulf %168, %169 : vector<8x4xf32>
    %171 = vector.extract_strided_slice %150 {offsets = [0, 4], sizes = [8, 4], strides = [1, 1]} : vector<8x8xbf16> to vector<8x4xbf16>
    %172 = vector.extract_strided_slice %151 {offsets = [0, 4], sizes = [16, 4], strides = [1, 1]} : vector<16x8xbf16> to vector<16x4xbf16>
    %173 = vector.extract_strided_slice %152 {offsets = [0, 4], sizes = [16, 4], strides = [1, 1]} : vector<16x8xbf16> to vector<16x4xbf16>
    %cst_59 = arith.constant dense<0.000000e+00> : vector<8x16xf32>
    %174 = tpu.matmul %171, %172, %cst_59 {dimension_numbers = #tpu.dot_dimension_numbers<[1], [1], [0], [0], [0, 0, 1, 0], [], []>} : vector<8x4xbf16>, vector<16x4xbf16>, vector<8x16xf32> -> vector<8x16xf32>
    %cst_60 = arith.constant dense<0xFF800000> : vector<8xf32>
    %175 = vector.multi_reduction <maximumf>, %174, %cst_60 [1] : vector<8x16xf32> to vector<8xf32>
    %176 = vector.shape_cast %175 : vector<8xf32> to vector<8x1xf32>
    %177 = vector.broadcast %176 : vector<8x1xf32> to vector<8x16xf32>
    %178 = arith.subf %174, %177 : vector<8x16xf32>
    %179 = math.exp %178 : vector<8x16xf32>
    %cst_61 = arith.constant dense<0.000000e+00> : vector<8xf32>
    %180 = vector.multi_reduction <add>, %179, %cst_61 [1] : vector<8x16xf32> to vector<8xf32>
    %181 = vector.shape_cast %180 : vector<8xf32> to vector<8x1xf32>
    %182 = tpu.reciprocal %181 {approx = true} : vector<8x1xf32> -> vector<8x1xf32>
    %cst_62 = arith.constant 0.176776692 : f32
    %183 = vector.broadcast %cst_62 : f32 to vector<8x1xf32>
    %184 = arith.mulf %183, %182 : vector<8x1xf32>
    %185 = arith.truncf %179 : vector<8x16xf32> to vector<8x16xbf16>
    %cst_63 = arith.constant dense<0.000000e+00> : vector<8x4xf32>
    %186 = tpu.matmul %185, %173, %cst_63 {dimension_numbers = #tpu.dot_dimension_numbers<[1], [0], [0], [1], [0, 0, 1, 1], [], []>} : vector<8x16xbf16>, vector<16x4xbf16>, vector<8x4xf32> -> vector<8x4xf32>
    %187 = vector.broadcast %184 : vector<8x1xf32> to vector<8x4xf32>
    %188 = arith.mulf %186, %187 : vector<8x4xf32>
    %189 = tpu.concatenate %170, %188 in 1 : vector<8x4xf32>, vector<8x4xf32> -> vector<8x8xf32>
    %c0_64 = arith.constant 0 : index
    %c16 = arith.constant 16 : index
    %190 = vector.load %arg18[%c0_64, %c16] : memref<8x32xf32, #tpu.memory_space<vmem>>, vector<8x8xf32>
    tpu.vector_store %arg18[%c0_64, %c16], %189 {strides = array<i32>} : memref<8x32xf32, #tpu.memory_space<vmem>>, vector<8x8xf32>,
    %191 = vector.extract_strided_slice %67 {offsets = [0, 24], sizes = [8, 8], strides = [1, 1]} : vector<8x32xbf16> to vector<8x8xbf16>
    %192 = vector.extract_strided_slice %31 {offsets = [0, 24], sizes = [16, 8], strides = [1, 1]} : vector<16x32xbf16> to vector<16x8xbf16>
    %193 = vector.extract_strided_slice %33 {offsets = [0, 24], sizes = [16, 8], strides = [1, 1]} : vector<16x32xbf16> to vector<16x8xbf16>
    %194 = vector.extract_strided_slice %191 {offsets = [0, 0], sizes = [8, 4], strides = [1, 1]} : vector<8x8xbf16> to vector<8x4xbf16>
    %195 = vector.extract_strided_slice %192 {offsets = [0, 0], sizes = [16, 4], strides = [1, 1]} : vector<16x8xbf16> to vector<16x4xbf16>
    %196 = vector.extract_strided_slice %193 {offsets = [0, 0], sizes = [16, 4], strides = [1, 1]} : vector<16x8xbf16> to vector<16x4xbf16>
    %cst_65 = arith.constant dense<0.000000e+00> : vector<8x16xf32>
    %197 = tpu.matmul %194, %195, %cst_65 {dimension_numbers = #tpu.dot_dimension_numbers<[1], [1], [0], [0], [0, 0, 1, 0], [], []>} : vector<8x4xbf16>, vector<16x4xbf16>, vector<8x16xf32> -> vector<8x16xf32>
    %cst_66 = arith.constant dense<0xFF800000> : vector<8xf32>
    %198 = vector.multi_reduction <maximumf>, %197, %cst_66 [1] : vector<8x16xf32> to vector<8xf32>
    %199 = vector.shape_cast %198 : vector<8xf32> to vector<8x1xf32>
    %200 = vector.broadcast %199 : vector<8x1xf32> to vector<8x16xf32>
    %201 = arith.subf %197, %200 : vector<8x16xf32>
    %202 = math.exp %201 : vector<8x16xf32>
    %cst_67 = arith.constant dense<0.000000e+00> : vector<8xf32>
    %203 = vector.multi_reduction <add>, %202, %cst_67 [1] : vector<8x16xf32> to vector<8xf32>
    %204 = vector.shape_cast %203 : vector<8xf32> to vector<8x1xf32>
    %205 = tpu.reciprocal %204 {approx = true} : vector<8x1xf32> -> vector<8x1xf32>
    %cst_68 = arith.constant 0.176776692 : f32
    %206 = vector.broadcast %cst_68 : f32 to vector<8x1xf32>
    %207 = arith.mulf %206, %205 : vector<8x1xf32>
    %208 = arith.truncf %202 : vector<8x16xf32> to vector<8x16xbf16>
    %cst_69 = arith.constant dense<0.000000e+00> : vector<8x4xf32>
    %209 = tpu.matmul %208, %196, %cst_69 {dimension_numbers = #tpu.dot_dimension_numbers<[1], [0], [0], [1], [0, 0, 1, 1], [], []>} : vector<8x16xbf16>, vector<16x4xbf16>, vector<8x4xf32> -> vector<8x4xf32>
    %210 = vector.broadcast %207 : vector<8x1xf32> to vector<8x4xf32>
    %211 = arith.mulf %209, %210 : vector<8x4xf32>
    %212 = vector.extract_strided_slice %191 {offsets = [0, 4], sizes = [8, 4], strides = [1, 1]} : vector<8x8xbf16> to vector<8x4xbf16>
    %213 = vector.extract_strided_slice %192 {offsets = [0, 4], sizes = [16, 4], strides = [1, 1]} : vector<16x8xbf16> to vector<16x4xbf16>
    %214 = vector.extract_strided_slice %193 {offsets = [0, 4], sizes = [16, 4], strides = [1, 1]} : vector<16x8xbf16> to vector<16x4xbf16>
    %cst_70 = arith.constant dense<0.000000e+00> : vector<8x16xf32>
    %215 = tpu.matmul %212, %213, %cst_70 {dimension_numbers = #tpu.dot_dimension_numbers<[1], [1], [0], [0], [0, 0, 1, 0], [], []>} : vector<8x4xbf16>, vector<16x4xbf16>, vector<8x16xf32> -> vector<8x16xf32>
    %cst_71 = arith.constant dense<0xFF800000> : vector<8xf32>
    %216 = vector.multi_reduction <maximumf>, %215, %cst_71 [1] : vector<8x16xf32> to vector<8xf32>
    %217 = vector.shape_cast %216 : vector<8xf32> to vector<8x1xf32>
    %218 = vector.broadcast %217 : vector<8x1xf32> to vector<8x16xf32>
    %219 = arith.subf %215, %218 : vector<8x16xf32>
    %220 = math.exp %219 : vector<8x16xf32>
    %cst_72 = arith.constant dense<0.000000e+00> : vector<8xf32>
    %221 = vector.multi_reduction <add>, %220, %cst_72 [1] : vector<8x16xf32> to vector<8xf32>
    %222 = vector.shape_cast %221 : vector<8xf32> to vector<8x1xf32>
    %223 = tpu.reciprocal %222 {approx = true} : vector<8x1xf32> -> vector<8x1xf32>
    %cst_73 = arith.constant 0.176776692 : f32
    %224 = vector.broadcast %cst_73 : f32 to vector<8x1xf32>
    %225 = arith.mulf %224, %223 : vector<8x1xf32>
    %226 = arith.truncf %220 : vector<8x16xf32> to vector<8x16xbf16>
    %cst_74 = arith.constant dense<0.000000e+00> : vector<8x4xf32>
    %227 = tpu.matmul %226, %214, %cst_74 {dimension_numbers = #tpu.dot_dimension_numbers<[1], [0], [0], [1], [0, 0, 1, 1], [], []>} : vector<8x16xbf16>, vector<16x4xbf16>, vector<8x4xf32> -> vector<8x4xf32>
    %228 = vector.broadcast %225 : vector<8x1xf32> to vector<8x4xf32>
    %229 = arith.mulf %227, %228 : vector<8x4xf32>
    %230 = tpu.concatenate %211, %229 in 1 : vector<8x4xf32>, vector<8x4xf32> -> vector<8x8xf32>
    %c0_75 = arith.constant 0 : index
    %c24 = arith.constant 24 : index
    %231 = vector.load %arg18[%c0_75, %c24] : memref<8x32xf32, #tpu.memory_space<vmem>>, vector<8x8xf32>
    tpu.vector_store %arg18[%c0_75, %c24], %230 {strides = array<i32>} : memref<8x32xf32, #tpu.memory_space<vmem>>, vector<8x8xf32>,
    %c0_76 = arith.constant 0 : index
    %c0_77 = arith.constant 0 : index
    %232 = vector.load %arg18[%c0_76, %c0_77] : memref<8x32xf32, #tpu.memory_space<vmem>>, vector<8x32xf32>
    %233 = arith.addf %232, %60 : vector<8x32xf32>
    %234 = arith.truncf %233 : vector<8x32xf32> to vector<8x32xbf16>
    %c0_78 = arith.constant 0 : index
    %c0_79 = arith.constant 0 : index
    %235 = vector.load %arg9[%c0_78, %c0_79] : memref<32x32xbf16, #tpu.memory_space<vmem>>, vector<32x32xbf16>
    %cst_80 = arith.constant dense<0.000000e+00> : vector<8x32xf32>
    %236 = tpu.matmul %234, %235, %cst_80 {dimension_numbers = #tpu.dot_dimension_numbers<[1], [0], [0], [1], [0, 0, 1, 1], [], []>} : vector<8x32xbf16>, vector<32x32xbf16>, vector<8x32xf32> -> vector<8x32xf32>
    %c0_81 = arith.constant 0 : index
    %c0_82 = arith.constant 0 : index
    %237 = vector.load %arg10[%c0_81, %c0_82] : memref<1x32xf32, #tpu.memory_space<vmem>>, vector<1x32xf32>
    %238 = vector.broadcast %237 : vector<1x32xf32> to vector<8x32xf32>
    %239 = arith.addf %236, %238 : vector<8x32xf32>
    %c0_83 = arith.constant 0 : index
    %c0_84 = arith.constant 0 : index
    %240 = vector.load %arg11[%c0_83, %c0_84] : memref<1x32xf32, #tpu.memory_space<vmem>>, vector<1x32xf32>
    %c0_85 = arith.constant 0 : index
    %c0_86 = arith.constant 0 : index
    %241 = vector.load %arg12[%c0_85, %c0_86] : memref<1x32xf32, #tpu.memory_space<vmem>>, vector<1x32xf32>
    %cst_87 = arith.constant dense<0.000000e+00> : vector<8xf32>
    %242 = vector.multi_reduction <add>, %239, %cst_87 [1] : vector<8x32xf32> to vector<8xf32>
    %243 = vector.shape_cast %242 : vector<8xf32> to vector<8x1xf32>
    %cst_88 = arith.constant 3.200000e+01 : f32
    %244 = vector.broadcast %cst_88 : f32 to vector<8x1xf32>
    %245 = arith.divf %243, %244 : vector<8x1xf32>
    %246 = vector.broadcast %245 : vector<8x1xf32> to vector<8x32xf32>
    %247 = arith.subf %239, %246 : vector<8x32xf32>
    %248 = arith.mulf %247, %247 : vector<8x32xf32>
    %cst_89 = arith.constant dense<0.000000e+00> : vector<8xf32>
    %249 = vector.multi_reduction <add>, %248, %cst_89 [1] : vector<8x32xf32> to vector<8xf32>
    %250 = vector.shape_cast %249 : vector<8xf32> to vector<8x1xf32>
    %cst_90 = arith.constant 3.200000e+01 : f32
    %251 = vector.broadcast %cst_90 : f32 to vector<8x1xf32>
    %252 = arith.divf %250, %251 : vector<8x1xf32>
    %cst_91 = arith.constant 9.99999974E-6 : f32
    %253 = vector.broadcast %cst_91 : f32 to vector<8x1xf32>
    %254 = arith.addf %252, %253 : vector<8x1xf32>
    %255 = math.rsqrt %254 : vector<8x1xf32>
    %256 = vector.broadcast %255 : vector<8x1xf32> to vector<8x32xf32>
    %257 = arith.mulf %247, %256 : vector<8x32xf32>
    %258 = vector.broadcast %240 : vector<1x32xf32> to vector<8x32xf32>
    %259 = arith.mulf %257, %258 : vector<8x32xf32>
    %260 = vector.broadcast %241 : vector<1x32xf32> to vector<8x32xf32>
    %261 = arith.addf %259, %260 : vector<8x32xf32>
    %262 = arith.truncf %261 : vector<8x32xf32> to vector<8x32xbf16>
    %c0_92 = arith.constant 0 : index
    %c0_93 = arith.constant 0 : index
    %263 = vector.load %arg13[%c0_92, %c0_93] : memref<32x128xbf16, #tpu.memory_space<vmem>>, vector<32x128xbf16>
    %cst_94 = arith.constant dense<0.000000e+00> : vector<8x128xf32>
    %264 = tpu.matmul %262, %263, %cst_94 {dimension_numbers = #tpu.dot_dimension_numbers<[1], [0], [0], [1], [0, 0, 1, 1], [], []>} : vector<8x32xbf16>, vector<32x128xbf16>, vector<8x128xf32> -> vector<8x128xf32>
    %c0_95 = arith.constant 0 : index
    %c0_96 = arith.constant 0 : index
    %265 = vector.load %arg14[%c0_95, %c0_96] : memref<1x128xf32, #tpu.memory_space<vmem>>, vector<1x128xf32>
    %266 = vector.broadcast %265 : vector<1x128xf32> to vector<8x128xf32>
    %267 = arith.addf %264, %266 : vector<8x128xf32>
    %cst_97 = arith.constant 5.000000e-01 : f32
    %268 = vector.broadcast %cst_97 : f32 to vector<8x128xf32>
    %269 = arith.mulf %268, %267 : vector<8x128xf32>
    %cst_98 = arith.constant 4.471500e-02 : f32
    %270 = vector.broadcast %cst_98 : f32 to vector<8x128xf32>
    %271 = arith.mulf %270, %267 : vector<8x128xf32>
    %272 = arith.mulf %271, %267 : vector<8x128xf32>
    %273 = arith.mulf %272, %267 : vector<8x128xf32>
    %274 = arith.addf %267, %273 : vector<8x128xf32>
    %cst_99 = arith.constant 0.797884583 : f32
    %275 = vector.broadcast %cst_99 : f32 to vector<8x128xf32>
    %276 = arith.mulf %275, %274 : vector<8x128xf32>
    %277 = math.tanh %276 : vector<8x128xf32>
    %cst_100 = arith.constant 1.000000e+00 : f32
    %278 = vector.broadcast %cst_100 : f32 to vector<8x128xf32>
    %279 = arith.addf %278, %277 : vector<8x128xf32>
    %280 = arith.mulf %269, %279 : vector<8x128xf32>
    %281 = arith.truncf %280 : vector<8x128xf32> to vector<8x128xbf16>
    %c0_101 = arith.constant 0 : index
    %c0_102 = arith.constant 0 : index
    %282 = vector.load %arg15[%c0_101, %c0_102] : memref<128x32xbf16, #tpu.memory_space<vmem>>, vector<128x32xbf16>
    %cst_103 = arith.constant dense<0.000000e+00> : vector<8x32xf32>
    %283 = tpu.matmul %281, %282, %cst_103 {dimension_numbers = #tpu.dot_dimension_numbers<[1], [0], [0], [1], [0, 0, 1, 1], [], []>} : vector<8x128xbf16>, vector<128x32xbf16>, vector<8x32xf32> -> vector<8x32xf32>
    %c0_104 = arith.constant 0 : index
    %c0_105 = arith.constant 0 : index
    %284 = vector.load %arg16[%c0_104, %c0_105] : memref<1x32xf32, #tpu.memory_space<vmem>>, vector<1x32xf32>
    %285 = vector.broadcast %284 : vector<1x32xf32> to vector<8x32xf32>
    %286 = arith.addf %283, %285 : vector<8x32xf32>
    %287 = arith.addf %286, %261 : vector<8x32xf32>
    %c0_106 = arith.constant 0 : index
    %c0_107 = arith.constant 0 : index
    %c0_108 = arith.constant 0 : index
    %288 = vector.load %arg17[%c0_106, %c0_107, %c0_108] : memref<1x8x32xf32, #tpu.memory_space<vmem>>, vector<1x8x32xf32>
    %289 = vector.shape_cast %288 : vector<1x8x32xf32> to vector<8x32xf32>
    %290 = vector.shape_cast %287 : vector<8x32xf32> to vector<1x8x32xf32>
    tpu.vector_store %arg17[%c0_106, %c0_107, %c0_108], %290 {strides = array<i32>} : memref<1x8x32xf32, #tpu.memory_space<vmem>>, vector<1x8x32xf32>,
    return
  }
  func.func @transform_0(%arg0: i32, %arg1: i32) -> (i32, i32, i32) {
    %c0_i32 = arith.constant 0 : i32
    %c0_i32_0 = arith.constant 0 : i32
    %c0_i32_1 = arith.constant 0 : i32
    return %arg0, %c0_i32, %c0_i32_0 : i32, i32, i32
  }
  func.func @transform_1(%arg0: i32, %arg1: i32) -> (i32, i32) {
    %c0_i32 = arith.constant 0 : i32
    %c0_i32_0 = arith.constant 0 : i32
    %c0_i32_1 = arith.constant 0 : i32
    return %c0_i32, %c0_i32_0 : i32, i32
  }
  func.func @transform_2(%arg0: i32, %arg1: i32) -> (i32, i32) {
    %c0_i32 = arith.constant 0 : i32
    %c0_i32_0 = arith.constant 0 : i32
    %c0_i32_1 = arith.constant 0 : i32
    return %c0_i32, %c0_i32_0 : i32, i32
  }
  func.func @transform_3(%arg0: i32, %arg1: i32) -> (i32, i32) {
    %c0_i32 = arith.constant 0 : i32
    %c0_i32_0 = arith.constant 0 : i32
    %c0_i32_1 = arith.constant 0 : i32
    return %c0_i32, %c0_i32_0 : i32, i32
  }
  func.func @transform_4(%arg0: i32, %arg1: i32) -> (i32, i32) {
    %c0_i32 = arith.constant 0 : i32
    %c0_i32_0 = arith.constant 0 : i32
    %c0_i32_1 = arith.constant 0 : i32
    return %c0_i32, %c0_i32_0 : i32, i32
  }
  func.func @transform_5(%arg0: i32, %arg1: i32) -> (i32, i32) {
    %c0_i32 = arith.constant 0 : i32
    %c0_i32_0 = arith.constant 0 : i32
    %c0_i32_1 = arith.constant 0 : i32
    return %c0_i32, %c0_i32_0 : i32, i32
  }
  func.func @transform_6(%arg0: i32, %arg1: i32) -> (i32, i32) {
    %c0_i32 = arith.constant 0 : i32
    %c0_i32_0 = arith.constant 0 : i32
    %c0_i32_1 = arith.constant 0 : i32
    return %c0_i32, %c0_i32_0 : i32, i32
  }
  func.func @transform_7(%arg0: i32, %arg1: i32) -> (i32, i32) {
    %c0_i32 = arith.constant 0 : i32
    %c0_i32_0 = arith.constant 0 : i32
    %c0_i32_1 = arith.constant 0 : i32
    return %c0_i32, %c0_i32_0 : i32, i32
  }
  func.func @transform_8(%arg0: i32, %arg1: i32) -> (i32, i32) {
    %c0_i32 = arith.constant 0 : i32
    %c0_i32_0 = arith.constant 0 : i32
    %c0_i32_1 = arith.constant 0 : i32
    return %c0_i32, %c0_i32_0 : i32, i32
  }
  func.func @transform_9(%arg0: i32, %arg1: i32) -> (i32, i32) {
    %c0_i32 = arith.constant 0 : i32
    %c0_i32_0 = arith.constant 0 : i32
    %c0_i32_1 = arith.constant 0 : i32
    return %c0_i32, %c0_i32_0 : i32, i32
  }
  func.func @transform_10(%arg0: i32, %arg1: i32) -> (i32, i32) {
    %c0_i32 = arith.constant 0 : i32
    %c0_i32_0 = arith.constant 0 : i32
    %c0_i32_1 = arith.constant 0 : i32
    return %c0_i32, %c0_i32_0 : i32, i32
  }
  func.func @transform_11(%arg0: i32, %arg1: i32) -> (i32, i32) {
    %c0_i32 = arith.constant 0 : i32
    %c0_i32_0 = arith.constant 0 : i32
    %c0_i32_1 = arith.constant 0 : i32
    return %c0_i32, %c0_i32_0 : i32, i32
  }
  func.func @transform_12(%arg0: i32, %arg1: i32) -> (i32, i32) {
    %c0_i32 = arith.constant 0 : i32
    %c0_i32_0 = arith.constant 0 : i32
    %c0_i32_1 = arith.constant 0 : i32
    return %c0_i32, %c0_i32_0 : i32, i32
  }
  func.func @transform_13(%arg0: i32, %arg1: i32) -> (i32, i32) {
    %c0_i32 = arith.constant 0 : i32
    %c0_i32_0 = arith.constant 0 : i32
    %c0_i32_1 = arith.constant 0 : i32
    return %c0_i32, %c0_i32_0 : i32, i32
  }
  func.func @transform_14(%arg0: i32, %arg1: i32) -> (i32, i32) {
    %c0_i32 = arith.constant 0 : i32
    %c0_i32_0 = arith.constant 0 : i32
    %c0_i32_1 = arith.constant 0 : i32
    return %c0_i32, %c0_i32_0 : i32, i32
  }
  func.func @transform_15(%arg0: i32, %arg1: i32) -> (i32, i32, i32) {
    %c0_i32 = arith.constant 0 : i32
    %c0_i32_0 = arith.constant 0 : i32
    return %arg0, %arg1, %c0_i32 : i32, i32, i32
  }
}

</mosaic_0001>

<bundles_post_ra>
// kernel: tpu_custom_call.1
= control target key start
LH: loop header
LB: loop body
LE: loop exit
PB: predicated region body
PF: predicated region fallthrough
CT: control target
= control target key end

     0   :  { %s3398_s0 = inlined_call_operand.vmem [shape: f32[2,16,32], index: 0, kind: input, shape index: {}]   ;;  %s3399_s1 = inlined_call_operand.vmem [shape: f32[1,32], index: 1, kind: input, shape index: {}]   ;;  %s3400_s2 = inlined_call_operand.vmem [shape: f32[1,32], index: 2, kind: input, shape index: {}]   ;;  %s3401_s3 = inlined_call_operand.vmem [shape: bf16[32,32], index: 3, kind: input, shape index: {}]   ;;  %s3402_s4 = inlined_call_operand.hbm [shape: f32[1,32], index: 4, kind: input, shape index: {}]   ;;  %s3403_s5 = inlined_call_operand.vmem [shape: bf16[32,64], index: 5, kind: input, shape index: {}]   ;;  %s3404_s6 = inlined_call_operand.hbm [shape: f32[1,64], index: 6, kind: input, shape index: {}]   ;;  %s3405_s7 = inlined_call_operand.vmem [shape: bf16[32,32], index: 7, kind: input, shape index: {}]   ;;  %s3406_s8 = inlined_call_operand.hbm [shape: f32[1,32], index: 8, kind: input, shape index: {}]   ;;  %s3407_s9 = inlined_call_operand.hbm [shape: f32[1,32], index: 9, kind: input, shape index: {}]   ;;  %s3408_s10 = inlined_call_operand.vmem [shape: f32[1,32], index: 10, kind: input, shape index: {}]   ;;  %s3409_s11 = inlined_call_operand.vmem [shape: bf16[32,128], index: 11, kind: input, shape index: {}]   ;;  %s3410_s12 = inlined_call_operand.vmem [shape: f32[1,128], index: 12, kind: input, shape index: {}]   ;;  %s3411_s13 = inlined_call_operand.vmem [shape: bf16[128,32], index: 13, kind: input, shape index: {}]   ;;  %s3412_s14 = inlined_call_operand.vmem [shape: f32[1,32], index: 14, kind: input, shape index: {}]   ;;  %s3413_s15 = inlined_call_operand.hbm [shape: f32[2,16,32], index: 15, kind: output, shape index: {}]  }
   0x1   :  { %3431 = sst [smem:[#allocation27_spill]] %s3410_s12 }
   0x2   :  { %3432 = sst [smem:[#allocation28_spill]] %s3412_s14 }
   0x3   :  { %3433 = sst [smem:[#allocation29_spill]] %s3413_s15 }
   0x4   :  { %20 = vsyncpa [#allocation4], 0 }
   0x5   :  { %21 = vsyncpa [#allocation7], 0 }
   0x6   :  { %22 = vsyncpa [#allocation10], 0 }
   0x7   :  { %23 = vsyncpa [#allocation5], 0 }
   0x8   :  { %25 = vsyncpa [#allocation5 + $0x1], 0  ;;  %s2879_s18 = smov 0   ;;  %s2881_s19 = smov 0  }
   0x9   :  { %s2883_s20 = smov 0   ;;  %s2885_s21 = smov 0  }
   0xa   :  { %s2887_s22 = smov 0   ;;  %s2889_s23 = smov 0  }
   0xb   :  { %s2891_s24 = smov 0   ;;  %s2893_s25 = smov 0  }
   0xc LB: > { %3434 = sst [smem:[#allocation16_spill]] %s2743_s18  ;;  %s2093_s26 = sadd.s32 4294967295, %s2771_s25   ;;  %s2771_s25 = sphi %s2893_s25, %s31_s25   ;;  %s2767_s24 = sphi %s2891_s24, %s3469_s24   ;;  %s2763_s23 = sphi %s2889_s23, %s3468_s23   ;;  %s2759_s22 = sphi %s2887_s22, %s3467_s22   ;;  %s2755_s21 = sphi %s2885_s21, %s3466_s21   ;;  %s2751_s20 = sphi %s2883_s20, %s3465_s20   ;;  %s2747_s19 = sphi %s2881_s19, %s3464_s19   ;;  %s2743_s18 = sphi %s2879_s18, %s3463_s18  }
   0xd   : > { %3435 = sst [smem:[#allocation17_spill]] %s2747_s19  ;;  %s2094_s27 = sadd.s32 4294967294, %s2771_s25  }
   0xe   : > { %3436 = sst [smem:[#allocation18_spill]] %s2751_s20  ;;  %s40_s28 = sadd.s32 1, %s2763_s23 }
   0xf   : > { %3437 = sst [smem:[#allocation19_spill]] %s2763_s23  ;;  %s43_s29 = sadd.s32 1, %s2767_s24 }
  0x10   : > { %3438 = sst [smem:[#allocation20_spill]] %s2767_s24  ;;  %p41_p0 = scmp.ge.s32.totalorder %s40_s28, 2 }
  0x11   : > { %3439 = sst [smem:[#allocation21_spill]] %s2771_s25  ;;  %s372_s30 = sadd.s32 1, %s2751_s20 }
  0x12   : > { %p382_p1 = scmp.ne.s32.totalorder %s2751_s20, %s2747_s19  ;;  %p383_p2 = scmp.eq.s32.totalorder %s2093_s26, 3 }
  0x13   : > { %s3471_s28 = smov (%p41_p0, %s40_s28), 0  ;;  %s3473_s29 = smov (!%p41_p0, %s43_s29), %s2767_s24 }
  0x14   : > { %3440 = sst [smem:[#allocation22_spill]] %s3471_s28  ;;  %s368_s16 = ssub.s32 %s2763_s23, %s3471_s28 }
  0x15   : > { %p2931_p3 = por %p383_p2, %p382_p1  ;;  %p45_p4 = scmp.ge.s32.totalorder %s3473_s29, 2 }
  0x16   : > { %p388_p5 = scmp.ne.s32.totalorder %s2747_s19, %s2743_s18  ;;  %p389_p6 = scmp.eq.s32.totalorder %s2094_s27, 3 }
  0x17   : > { %s3441_s17 = scalar_select %p2931_p3, 1, 0 }
  0x18   : > { %p2095_p7 = scmp.ge.s32.totalorder %s2771_s25, 1  ;;  %s3475_s29 = smov (%p45_p4, %s3473_s29), 0 }
  0x19   : > { %3442 = sst [smem:[#allocation23_spill]] %s3441_s17  ;;  %p2940_p8 = por %p389_p6, %p388_p5 }
  0x1a   : > { %3443 = sst [smem:[#allocation24_spill]] %s3475_s29  ;;  %p396_p9 = scmp.lt.s32.totalorder %s2771_s25, 5 }
  0x1b   : > { %s3444_s15 = scalar_select %p2940_p8, 1, 0 }
  0x1c   : > { %s367_s14 = ssub.s32 %s2767_s24, %s3475_s29  ;;  %p2947_p10 = pnand %p2095_p7, %p396_p9 }
  0x1d   : > { %3445 = sst [smem:[#allocation25_spill]] %s3444_s15  ;;  %s369_s12 = sor.u32 %s368_s16, %s367_s14 }
  0x1e   : > { %s3446_s28 = scalar_select %p2947_p10, 1, 0 }
  0x1f   : > { %p370_p11 = scmp.eq.s32.totalorder %s369_s12, 0  ;;  %p2951_p12 = scmp.eq.s32.totalorder %s2093_s26, 0 }
  0x20   : > { %p2380_p13 = pneg %p2947_p10  ;;  %s2773_s14 = smov [#allocation6]  }
  0x21   : > { %s3447_s23 = scalar_select %p2951_p12, 1, 0 }
  0x22   : > { %s2958_s27 = scalar_select %p370_p11, %s2751_s20, %s372_s30  }
  0x23   : > { %p2962_p0 = pnand %p2951_p12, %p2380_p13  ;;  %s432_s16 = sshll.u32 %s2773_s14, 4  ;;  %s433_s16 = int_to_ptr.vmem [resolvable:$true] %s432_s16 }
  0x24   : > { %3448 = sst [smem:[#allocation26_spill]] %s2958_s27  ;;  %s2553_s26 = scalar_lea.hbm %s3404_s6, 16 }
  0x25   : > { %p2554_p1 = scmp.ne.s32.totalorder %s3404_s6, %s2553_s26  ;;  %p2974_p2 = pneg %p2962_p0 }
  0x26   : > { %p2560_p6 = scmp.lt.u32.totalorder %s2553_s26, %s3404_s6 }
  0x27   : > { %p2556_p4 = pnand %p2974_p2, %p2554_p1 }
  0x29   : > { %p2557_p5 = pneg %p2556_p4 }
  0x2b   : > { %p2562_p7 = pnand %p2560_p6, %p2557_p5 }
  0x2d   : > { %2565 = shalt.err (!%p2562_p7)
}
  0x2e   : > { %s2566_s29 = scalar_lea.vmem %s433_s16, 16  ;;  %s2573_s18 = scalar_lea.vmem %s433_s16, 32 }
  0x2f   : > { %p2567_p9 = scmp.ne.s32.totalorder %s433_s16, %s2566_s29  ;;  %p2574_p8 = scmp.lt.s32.totalorder %s433_s16, %s433_s16 }
  0x30   : > { %p2575_p3 = scmp.lt.s32.totalorder %s2573_s18, %s2566_s29 }
  0x31   : > { %p2569_p11 = pnand %p2567_p9, %p2974_p2 }
  0x32   : > { %p2576_p12 = por %p2575_p3, %p2574_p8 }
  0x33   : > { %p2570_p13 = pneg %p2569_p11 }
  0x35   : > { %p2577_p10 = pnand %p2576_p12, %p2570_p13 }
  0x37   : > { %2580 = shalt.err (!%p2577_p10)
}
  0x38   : > { %2386 = dma.hbm_to_vmem [thread:$0]  (!%p2962_p0), %s3404_s6, 16, %s433_s16, [#allocation7]  }
  0x39   : > { %s2774_s27 = smov [#allocation3]   ;;  %s2775_s14 = smov [#allocation8]  }
  0x3a   : > { %s418_s26 = sshll.u32 %s2774_s27, 4  ;;  %s446_s20 = sshll.u32 %s2775_s14, 4  ;;  %s419_s26 = int_to_ptr.vmem [resolvable:$true] %s418_s26  ;;  %s2990_s20 = int_to_ptr.vmem [resolvable:$true] %s446_s20 }
  0x3b   : > { %s2581_s29 = scalar_lea.hbm %s3402_s4, 16 }
  0x3c   : > { %p2582_p3 = scmp.ne.s32.totalorder %s3402_s4, %s2581_s29  ;;  %p2588_p12 = scmp.lt.u32.totalorder %s2581_s29, %s3402_s4 }
  0x3e   : > { %p2584_p8 = pnand %p2582_p3, %p2974_p2 }
  0x40   : > { %p2585_p10 = pneg %p2584_p8 }
  0x42   : > { %p2590_p1 = pnand %p2588_p12, %p2585_p10 }
  0x44   : > { %2593 = shalt.err (!%p2590_p1)
}
  0x45   : > { %s2594_s12 = scalar_lea.vmem %s419_s26, 16  ;;  %s2601_s25 = scalar_lea.vmem %s419_s26, 32 }
  0x46   : > { %p2595_p4 = scmp.ne.s32.totalorder %s419_s26, %s2594_s12  ;;  %p2602_p7 = scmp.lt.s32.totalorder %s419_s26, %s419_s26 }
  0x47   : > { %p2603_p9 = scmp.lt.s32.totalorder %s2601_s25, %s2594_s12 }
  0x48   : > { %p2597_p5 = pnand %p2595_p4, %p2974_p2 }
  0x49   : > { %p2604_p11 = por %p2603_p9, %p2602_p7 }
  0x4a   : > { %p2598_p6 = pneg %p2597_p5 }
  0x4c   : > { %p2605_p13 = pnand %p2604_p11, %p2598_p6 }
  0x4e   : > { %2608 = shalt.err (!%p2605_p13)
}
  0x4f   : > { %2383 = dma.hbm_to_vmem [thread:$0]  (!%p2962_p0), %s3402_s4, 16, %s419_s26, [#allocation4]  }
  0x50   : > { %s2609_s29 = scalar_lea.hbm %s3406_s8, 16 }
  0x51   : > { %p2610_p3 = scmp.ne.s32.totalorder %s3406_s8, %s2609_s29  ;;  %p2616_p12 = scmp.lt.u32.totalorder %s2609_s29, %s3406_s8 }
  0x53   : > { %p2612_p8 = pnand %p2610_p3, %p2974_p2 }
  0x55   : > { %p2613_p10 = pneg %p2612_p8 }
  0x57   : > { %p2618_p1 = pnand %p2616_p12, %p2613_p10 }
  0x59   : > { %2621 = shalt.err (!%p2618_p1)
}
  0x5a   : > { %s2622_s26 = scalar_lea.vmem %s2990_s20, 16  ;;  %s2629_s25 = scalar_lea.vmem %s2990_s20, 32 }
  0x5b   : > { %p2623_p4 = scmp.ne.s32.totalorder %s2990_s20, %s2622_s26  ;;  %p2630_p7 = scmp.lt.s32.totalorder %s2990_s20, %s2990_s20 }
  0x5c   : > { %p2631_p9 = scmp.lt.s32.totalorder %s2629_s25, %s2622_s26 }
  0x5d   : > { %p2625_p5 = pnand %p2623_p4, %p2974_p2 }
  0x5e   : > { %p2632_p11 = por %p2631_p9, %p2630_p7 }
  0x5f   : > { %p2626_p6 = pneg %p2625_p5 }
  0x61   : > { %p2633_p13 = pnand %p2632_p11, %p2626_p6 }
  0x63   : > { %2636 = shalt.err (!%p2633_p13)
}
  0x64   : > { %2389 = dma.hbm_to_vmem [thread:$0]  (!%p2962_p0), %s3406_s8, 16, %s2990_s20, [#allocation7]  }
  0x65   : > { %s2776_s27 = smov [#allocation9]   ;;  %s2637_s24 = scalar_lea.hbm %s3407_s9, 16 }
  0x66   : > { %s457_s14 = sshll.u32 %s2776_s27, 4  ;;  %p2638_p3 = scmp.ne.s32.totalorder %s3407_s9, %s2637_s24  ;;  %s458_s14 = int_to_ptr.vmem [resolvable:$true] %s457_s14 }
  0x67   : > { %p2644_p12 = scmp.lt.u32.totalorder %s2637_s24, %s3407_s9 }
  0x68   : > { %p2640_p8 = pnand %p2638_p3, %p2974_p2 }
  0x6a   : > { %p2641_p10 = pneg %p2640_p8 }
  0x6c   : > { %p2646_p1 = pnand %p2644_p12, %p2641_p10 }
  0x6e   : > { %2649 = shalt.err (!%p2646_p1)
}
  0x6f   : > { %s2650_s20 = scalar_lea.vmem %s458_s14, 16  ;;  %s2657_s19 = scalar_lea.vmem %s458_s14, 32 }
  0x70   : > { %p2651_p4 = scmp.ne.s32.totalorder %s458_s14, %s2650_s20  ;;  %p2658_p7 = scmp.lt.s32.totalorder %s458_s14, %s458_s14 }
  0x71   : > { %p2659_p9 = scmp.lt.s32.totalorder %s2657_s19, %s2650_s20 }
  0x72   : > { %p2653_p5 = pnand %p2651_p4, %p2974_p2 }
  0x73   : > { %p2660_p11 = por %p2659_p9, %p2658_p7 }
  0x74   : > { %p2654_p6 = pneg %p2653_p5 }
  0x76   : > { %p2661_p13 = pnand %p2660_p11, %p2654_p6 }
  0x78   : > { %2664 = shalt.err (!%p2661_p13)
}
  0x79   : > { %2392 = dma.hbm_to_vmem [thread:$0]  (!%p2962_p0), %s3407_s9, 16, %s458_s14, [#allocation10]  }
  0x7a   : > { %p3451_p3 = scmp.ne.s32.totalorder %s3446_s28, 0 }
  0x7b   : > { %p3452_p8 = scmp.ne.s32.totalorder (!%p3451_p3), %s3447_s23, 0 }
  0x7c   : > { %493 = sbr.rel (%p3451_p3) target bundleno = 2743 (0xab7), region = 80 }
  0x83   : > { %2726 = dma.done.wait (%p3452_p8), [#allocation4], 16  }
  0x84   : > { %2728 = vsyncadd (%p3452_p8), [#allocation4], 4294967280 }
  0x85   : > { %2730 = dma.done.wait (%p3452_p8), [#allocation7], 32  }
  0x86   : > { %2732 = vsyncadd (%p3452_p8), [#allocation7], 4294967264 }
  0x87   : > { %2734 = dma.done.wait (%p3452_p8), [#allocation10], 16  }
  0x88   : > { %2736 = vsyncadd (%p3452_p8), [#allocation10], 4294967280  ;;  %p553_p0 = scmp.lt.s32.totalorder %s2759_s22, 1  ;;  %s2115_s28 = sshll.u32 %s2755_s21, 3  ;;  %vm563_vm0 = vcmask 261120   ;;  %v2495_v21 = vld [vmem:[%s3403_s5] sm:$0xff]  }
  0x89   : > { %v2777_v22 = vmov 0.0   ;;  %v2496_v23 = vld [vmem:[%s3403_s5 + $0x8] sm:$0xff]   ;;  %vm2778_vm1 = vmmov 0   ;;  %v2109_v35 = vld [vmem:[%s3399_s1] ss:$0 sm:$0xff]  ;;  %vm762_vm2 = vcmask 31744  }
  0x8a   : > { %s554_s15 = scalar_select %p553_p0, %s2759_s22, 1  ;;  %2214 = vmatprep.subr.bf16.mxu1 %v2777_v22  ;;  %2242 = vmatprep.subr.bf16.mxu0 %v2777_v22  ;;  %v2110_v40 = vld [vmem:[%s3400_s2] ss:$0 sm:$0xff]  ;;  %v2498_v48 = vld [vmem:[%s3401_s3 + $0x8] sm:$0xff]   ;;  %vm809_vm3 = vcmask 130048   ;;  %vm985_vm4 = vcmask 64512  }
  0x8b   : > { %2215 = vmatpush3.bf16.msra.mxu1 %v2495_v21  ;;  %2218 = vmatprep.mubr.msk.bf16.mxu1 %vm2778_vm1, %v2777_v22  ;;  %v2497_v45 = vld [vmem:[%s3401_s3] sm:$0xff]   ;;  %v2111_v51 = vld [vmem:[#allocation6] ss:$0 sm:$0xff]  ;;  %v2116_v59 = vld [vmem:[#allocation3] ss:$0 sm:$0xff]  ;;  %s2779_s14 = smov 124  }
  0x8c   : > { %s2160_s30 = sshll.u32 %s554_s15, 4  ;;  %2216 = vmatprep.subr.bf16.mxu1 %v2777_v22  ;;  %2244 = vmatprep.mubr.msk.bf16.mxu0 %vm2778_vm1, %v2777_v22  ;;  %s2780_s29 = smov 116   ;;  %vm1214_vm5 = vcmask 130112   ;;  %vm1443_vm6 = vcmask 195712   ;;  %vm1672_vm7 = vcmask 261312  }
  0x8d   : > { %s557_s18 = scalar_lea.vmem %s3398_s0, %s2160_s30  ;;  %s2783_s23 = smov 108  }
  0x8e   : > { %s677_s24 = scalar_lea.vmem %s557_s18, %s2115_s28  ;;  %v559_v0 = vld [vmem:[%s557_s18] sm:$0xff]  ;;  %v560_v2 = vld [vmem:[%s557_s18 + $0x8] sm:$0xff]  ;;  %s2781_s18 = smov 112  }
  0x8f   : > { %v678_v1 = vld [vmem:[%s677_s24] sm:$0xff]  ;;  %v564_v3 = vsel %vm563_vm0, %v559_v0, 0.0  ;;  %v567_v5 = vsel %vm563_vm0, %v560_v2, 0.0  ;;  %2217 = vmatpush3.bf16.msra.mxu1 %v2496_v23  ;;  %s2782_s24 = smov 120   ;;  %s2784_s16 = smov 104  }
  0x90   : > { %v679_v4 = vsel %vm563_vm0, %v678_v1, 0.0  ;;  %565 = vadd.xlane.f32.xlu0 %v564_v3  ;;  %2222 = vmatprep.subr.bf16.mxu1 %v2777_v22  ;;  %s2785_s12 = smov 100   ;;  %s2786_s26 = smov 96  }
  0x91   : > { %680 = vadd.xlane.f32.xlu1 %v679_v4  ;;  %s2787_s25 = smov 88   ;;  %s2788_s20 = smov 92  }
  0x92   : > { %s2789_s19 = smov 80   ;;  %s2790_s17 = smov 84  }
  0x93   : > { %s2791_s27 = smov 76   ;;  %s2792_s15 = smov 72  }
  0x94   : > { %568 = vadd.xlane.f32.xlu0 %v567_v5  ;;  %s2793_s28 = smov 68   ;;  %s2794_s30 = smov 4  }
 0x11d   : > { %v566_v6 = vpop.xlane.xlu0 %565 }
 0x11e   : > { %v681_v7 = vpop.xlane.xlu1 %680  ;;  %v571_v8 = vmul.f32 0.03125, %v566_v6 }
 0x11f   : > { %v682_v9 = vmul.f32 0.03125, %v681_v7 }
 0x120   : > { %v573_v10 = vsub.f32 %v559_v0, %v571_v8 }
 0x121   : > { %v683_v11 = vsub.f32 %v678_v1, %v682_v9  ;;  %v569_v12 = vpop.xlane.xlu0 %568 }
 0x122   : > { %v572_v13 = vmul.f32 0.03125, %v569_v12  ;;  %v575_v14 = vmul.f32 %v573_v10, %v573_v10 }
 0x123   : > { %v684_v15 = vmul.f32 %v683_v11, %v683_v11 }
 0x124   : > { %v574_v16 = vsub.f32 %v560_v2, %v572_v13  ;;  %v577_v17 = vsel %vm563_vm0, %v575_v14, 0.0 }
 0x125   : > { %578 = vadd.xlane.f32.xlu1 %v577_v17  ;;  %v685_v18 = vsel %vm563_vm0, %v684_v15, 0.0 }
 0x126   : > { %v576_v19 = vmul.f32 %v574_v16, %v574_v16 }
 0x128   : > { %v580_v20 = vsel %vm563_vm0, %v576_v19, 0.0 }
 0x129   : > { %686 = vadd.xlane.f32.xlu1 %v685_v18  ;;  %581 = vadd.xlane.f32.xlu0 %v580_v20 }
 0x1b2   : > { %v579_v24 = vpop.xlane.xlu1 %578 }
 0x1b3   : > { %v583_v25 = vmul.f32 0.03125, %v579_v24 }
 0x1b5   : > { %v585_v26 = vadd.f32 1e-05, %v583_v25 }
 0x1b6   : > { %v687_v27 = vpop.xlane.xlu1 %686  ;;  %v582_v28 = vpop.xlane.xlu0 %581 }
 0x1b7   : > { %2511 = vrsqrt.f32 %v585_v26  ;;  %v688_v29 = vmul.f32 0.03125, %v687_v27  ;;  %v584_v30 = vmul.f32 0.03125, %v582_v28 }
 0x1b9   : > { %v689_v31 = vadd.f32 1e-05, %v688_v29  ;;  %v586_v32 = vadd.f32 1e-05, %v584_v30 }
 0x1bb   : > { %2513 = vrsqrt.f32 %v689_v31 }
 0x1bc   : > { %2515 = vrsqrt.f32 %v586_v32 }
 0x1c1   : > { %v2512_v33 = vpop.eup %2511 }
 0x1c2   : > { %v589_v34 = vmul.f32 %v2512_v33, %v573_v10 }
 0x1c4   : > { %v597_v39 = vmul.f32 %v2109_v35, %v589_v34 }
 0x1c5   : > { %v2514_v36 = vpop.eup %2513 }
 0x1c6   : > { %v2516_v37 = vpop.eup %2515  ;;  %v691_v41 = vmul.f32 %v2514_v36, %v683_v11  ;;  %v605_v43 = vadd.f32 %v2110_v40, %v597_v39 }
 0x1c7   : > { %v590_v38 = vmul.f32 %v2516_v37, %v574_v16 }
 0x1c8   : > { %v692_v47 = vmul.f32 %v2109_v35, %v691_v41 }
 0x1c9   : > { %v598_v42 = vmul.f32 %v2109_v35, %v590_v38 }
 0x1ca   : > { %v3108_v49 = vadd.f32 %v2110_v40, %v692_v47 }
 0x1cb   : > { %v606_v44 = vadd.f32 %v2110_v40, %v598_v42 }
 0x1cc   : > { %v694_v50 = vpack.c.bf16 %v3108_v49, %v3108_v49 }
 0x1cd   : > { %v607_v46 = vpack.c.bf16 %v606_v44, %v605_v43 }
 0x1cf   : > { %2219 = vmatmul.mubr.msk.bf16.vlgmr.msra.gmra.mrb[0].mxu1 %vm563_vm0, %v607_v46 }
 0x1d0   : > { %2223 = vmatpush3.bf16.msra.mxu1 %v2497_v45  ;;  %2226 = vmatprep.mubr.msk.bf16.mxu1 %vm2778_vm1, %v2777_v22 }
 0x1d1   : > { %2224 = vmatprep.subr.bf16.mxu1 %v2777_v22 }
 0x1d4   : > { %2225 = vmatpush3.bf16.msra.mxu1 %v2498_v48 }
 0x1d5   : > { %2230 = vmatprep.subr.bf16.mxu1 %v2777_v22 }
 0x1d7   : > { %2227 = vmatmul.mubr.msk.bf16.vlgmr.msra.gmra.mrb[4].mxu1 %vm563_vm0, %v694_v50 }
 0x1d8   : > { %2232 = vmatprep.mubr.msk.bf16.mxu1 %vm2778_vm1, %v2777_v22 }
 0x2a2   : > { %v668_v52 = vpop.f32.mrb[0].mxu1 }
 0x2a3   : > { %v2220_v53 = vpop.f32.mrb[1].mxu1  ;;  %v669_v55 = vadd.f32 %v2111_v51, %v668_v52 }
 0x2a4   : > { %v671_v54 = vpop.f32.mrb[2].mxu1 }
 0x2a5   : > { %v672_v56 = vadd.f32 %v2111_v51, %v671_v54  ;;  %v2221_v57 = vpop.f32.mrb[3].mxu1 }
 0x2a7   : > { %v3116_v58 = vpack.c.bf16 %v672_v56, %v669_v55 }
 0x2a9   : > { %873 = vrot.lane.b32.xlu0 %v3116_v58, %s2779_s14  ;;  %v767_v60 = vsel %vm762_vm2, %v3116_v58, 0 }
 0x2aa   : > { %v755_v61 = vpop.f32.mrb[4].mxu1  ;;  %2231 = vmatpush3.bf16.xpose.msra.mxu1 %v767_v60 }
 0x2ab   : > { %v756_v62 = vadd.f32 %v2116_v59, %v755_v61  ;;  %v2228_v63 = vpop.f32.mrb[5].mxu1  ;;  %2236 = vmatprep.subr.bf16.mxu1 %v2777_v22 }
 0x2ac   : > { %v758_v0 = vpop.f32.mrb[6].mxu1 }
 0x2ad   : > { %v761_v1 = vpack.c.bf16 %v756_v62, %v756_v62  ;;  %1098 = vrot.lane.b32.xlu0 %v3116_v58, %s2780_s29  ;;  %v2229_v2 = vpop.f32.mrb[7].mxu1 }
 0x2af   : > { %871 = vrot.lane.b32.xlu1 %v761_v1, %s2779_s14  ;;  %s2795_s14 = smov 8  }
 0x2b1   : > { %1218 = vrot.lane.b32.xlu0 %v3116_v58, %s2781_s18  ;;  %2233 = vmatmul.mubr.msk.bf16.vlgmr.msra.gmra.mrb[8].mxu1 %vm762_vm2, %v761_v1 }
 0x2b2   : > { %2238 = vmatprep.mubr.msk.bf16.mxu1 %vm2778_vm1, %v2777_v22 }
 0x2b3   : > { %989 = vrot.lane.b32.xlu1 %v3116_v58, %s2782_s24 }
 0x2b5   : > { %1327 = vrot.lane.b32.xlu0 %v3116_v58, %s2783_s23 }
 0x2b7   : > { %987 = vrot.lane.b32.xlu1 %v761_v1, %s2782_s24  ;;  %s2156_s24 = sshll.u32 %s2759_s22, 1 }
 0x2b9   : > { %1447 = vrot.lane.b32.xlu0 %v3116_v58, %s2784_s16 }
 0x2bb   : > { %1096 = vrot.lane.b32.xlu1 %v761_v1, %s2780_s29  ;;  %s2796_s29 = smov 16  }
 0x2bd   : > { %1556 = vrot.lane.b32.xlu0 %v3116_v58, %s2785_s12 }
 0x2bf   : > { %1216 = vrot.lane.b32.xlu1 %v761_v1, %s2781_s18 }
 0x2c1   : > { %823 = vrot.lane.b32.xlu0 %v3116_v58, %s2786_s26  ;;  %s3455_s26 = sld [smem:[#allocation28_spill]] }
 0x2c3   : > { %1325 = vrot.lane.b32.xlu1 %v761_v1, %s2783_s23  ;;  %s1974_s23 = sadd.s32 %s2755_s21, %s2156_s24 }
 0x2c5   : > { %1049 = vrot.lane.b32.xlu0 %v3116_v58, %s2787_s25  ;;  %s3456_s25 = sld [smem:[#allocation23_spill]] }
 0x2c7   : > { %1445 = vrot.lane.b32.xlu1 %v761_v1, %s2784_s16 }
 0x2cb   : > { %1554 = vrot.lane.b32.xlu1 %v761_v1, %s2785_s12  ;;  %s2797_s12 = smov 24   ;;  %p3458_p10 = scmp.ne.s32.totalorder %s3456_s25, 0 }
 0x2cf   : > { %933 = vrot.lane.b32.xlu1 %v3116_v58, %s2788_s20  ;;  %s2157_s20 = sshll.u32 %s1974_s23, 7 }
 0x31b   : > { %v874_v3 = vpop.permute.xlu0 %873 }
 0x31c   : > { %v879_v4 = vsel %vm762_vm2, %v874_v3, 0 }
 0x31d   : > { %2243 = vmatpush3.bf16.xpose.msra.mxu0 %v879_v4 }
 0x31e   : > { %2254 = vmatprep.subr.bf16.mxu0 %v2777_v22 }
 0x31f   : > { %v1099_v5 = vpop.permute.xlu0 %1098 }
 0x320   : > { %v1104_v13 = vsel %vm762_vm2, %v1099_v5, 0 }
 0x321   : > { %v872_v6 = vpop.permute.xlu1 %871 }
 0x323   : > { %v1219_v7 = vpop.permute.xlu0 %1218 }
 0x324   : > { %2245 = vmatmul.mubr.msk.bf16.vlgmr.msra.gmra.mrb[0].mxu0 %vm762_vm2, %v872_v6  ;;  %v1224_v17 = vsel %vm762_vm2, %v1219_v7, 0 }
 0x325   : > { %v990_v8 = vpop.permute.xlu1 %989  ;;  %2256 = vmatprep.mubr.msk.bf16.mxu0 %vm2778_vm1, %v2777_v22 }
 0x326   : > { %v995_v9 = vsel %vm762_vm2, %v990_v8, 0 }
 0x327   : > { %v1328_v10 = vpop.permute.xlu0 %1327  ;;  %2255 = vmatpush3.bf16.xpose.msra.mxu0 %v995_v9 }
 0x328   : > { %2266 = vmatprep.subr.bf16.mxu0 %v2777_v22  ;;  %v1333_v19 = vsel %vm762_vm2, %v1328_v10, 0 }
 0x329   : > { %v988_v12 = vpop.permute.xlu1 %987 }
 0x32b   : > { %v1448_v11 = vpop.permute.xlu0 %1447 }
 0x32c   : > { %v1453_v21 = vsel %vm762_vm2, %v1448_v11, 0 }
 0x32d   : > { %v1097_v16 = vpop.permute.xlu1 %1096 }
 0x32e   : > { %2257 = vmatmul.mubr.msk.bf16.vlgmr.msra.gmra.mrb[4].mxu0 %vm762_vm2, %v988_v12 }
 0x32f   : > { %v1557_v14 = vpop.permute.xlu0 %1556  ;;  %2267 = vmatpush3.bf16.xpose.msra.mxu0 %v1104_v13  ;;  %2268 = vmatprep.mubr.msk.bf16.mxu0 %vm2778_vm1, %v2777_v22 }
 0x330   : > { %2278 = vmatprep.subr.bf16.mxu0 %v2777_v22  ;;  %v1562_v24 = vsel %vm762_vm2, %v1557_v14, 0 }
 0x331   : > { %v1217_v18 = vpop.permute.xlu1 %1216 }
 0x333   : > { %v824_v15 = vpop.permute.xlu0 %823 }
 0x334   : > { %2237 = vmatpush3.bf16.msra.mxu1 %v824_v15 }
 0x335   : > { %2248 = vmatprep.subr.bf16.mxu1 %v2777_v22  ;;  %v1326_v20 = vpop.permute.xlu1 %1325 }
 0x336   : > { %2269 = vmatmul.mubr.msk.bf16.vlgmr.msra.gmra.mrb[8].mxu0 %vm762_vm2, %v1097_v16 }
 0x337   : > { %2279 = vmatpush3.bf16.xpose.msra.mxu0 %v1224_v17  ;;  %2280 = vmatprep.mubr.msk.bf16.mxu0 %vm2778_vm1, %v2777_v22  ;;  %v1050_v46 = vpop.permute.xlu0 %1049 }
 0x338   : > { %2290 = vmatprep.subr.bf16.mxu0 %v2777_v22 }
 0x339   : > { %v1446_v23 = vpop.permute.xlu1 %1445 }
 0x33d   : > { %v1555_v25 = vpop.permute.xlu1 %1554 }
 0x33e   : > { %2281 = vmatmul.mubr.msk.bf16.vlgmr.msra.gmra.mrb[12].mxu0 %vm762_vm2, %v1217_v18 }
 0x33f   : > { %2291 = vmatpush3.bf16.xpose.msra.mxu0 %v1333_v19  ;;  %2292 = vmatprep.mubr.msk.bf16.mxu0 %vm2778_vm1, %v2777_v22 }
 0x340   : > { %2302 = vmatprep.subr.bf16.mxu0 %v2777_v22 }
 0x341   : > { %v934_v2 = vpop.permute.xlu1 %933 }
 0x346   : > { %2293 = vmatmul.mubr.msk.bf16.vlgmr.msra.gmra.mrb[16].mxu0 %vm762_vm2, %v1326_v20 }
 0x347   : > { %2303 = vmatpush3.bf16.xpose.msra.mxu0 %v1453_v21  ;;  %2304 = vmatprep.mubr.msk.bf16.mxu0 %vm2778_vm1, %v2777_v22 }
 0x348   : > { %2314 = vmatprep.subr.bf16.mxu0 %v2777_v22 }
 0x34e   : > { %2305 = vmatmul.mubr.msk.bf16.vlgmr.msra.gmra.mrb[20].mxu0 %vm762_vm2, %v1446_v23 }
 0x34f   : > { %2315 = vmatpush3.bf16.xpose.msra.mxu0 %v1562_v24  ;;  %2316 = vmatprep.mubr.msk.bf16.mxu0 %vm2778_vm1, %v2777_v22 }
 0x350   : > { %2326 = vmatprep.subr.bf16.mxu0 %v2777_v22 }
 0x356   : > { %2317 = vmatmul.mubr.msk.bf16.vlgmr.msra.gmra.mrb[24].mxu0 %vm762_vm2, %v1555_v25 }
 0x357   : > { %2330 = vmatprep.mubr.msk.bf16.mxu0 %vm2778_vm1, %v2777_v22 }
 0x384   : > { %v803_v26 = vpop.f32.mrb[8].mxu1 }
 0x385   : > { %v2234_v27 = vpop.f32.mrb[9].mxu1  ;;  %v810_v28 = vsel %vm809_vm3, %v803_v26, -inf }
 0x386   : > { %811 = vmax.xlane.f32.xlu0 %v810_v28  ;;  %v806_v29 = vpop.f32.mrb[10].mxu1 }
 0x387   : > { %v2235_v30 = vpop.f32.mrb[11].mxu1 }
 0x3f7   : > { %v3171_v31 = vpop.f32.mrb[0].mxu0 }
 0x3f8   : > { %v2246_v32 = vpop.f32.mrb[1].mxu0  ;;  %v921_v33 = vsel %vm809_vm3, %v3171_v31, -inf }
 0x3f9   : > { %922 = vmax.xlane.f32.xlu1 %v921_v33  ;;  %v918_v34 = vpop.f32.mrb[2].mxu0 }
 0x3fa   : > { %v2247_v35 = vpop.f32.mrb[3].mxu0 }
 0x401   : > { %v3175_v36 = vpop.f32.mrb[4].mxu0 }
 0x402   : > { %v2258_v37 = vpop.f32.mrb[5].mxu0  ;;  %v1037_v38 = vsel %vm809_vm3, %v3175_v36, -inf }
 0x403   : > { %v1034_v39 = vpop.f32.mrb[6].mxu0  ;;  %1038 = vmax.xlane.f32.xlu0 %v1037_v38 }
 0x404   : > { %v2259_v40 = vpop.f32.mrb[7].mxu0 }
 0x409   : > { %v3179_v41 = vpop.f32.mrb[8].mxu0 }
 0x40a   : > { %1278 = vrot.lane.b32.xlu1 %v3116_v58, %s2789_s19  ;;  %v2270_v42 = vpop.f32.mrb[9].mxu0  ;;  %v1146_v43 = vsel %vm809_vm3, %v3179_v41, -inf }
 0x40b   : > { %v1143_v44 = vpop.f32.mrb[10].mxu0  ;;  %1147 = vmax.xlane.f32.xlu0 %v1146_v43 }
 0x40c   : > { %v2271_v45 = vpop.f32.mrb[11].mxu0 }
 0x411   : > { %v3184_v47 = vpop.f32.mrb[12].mxu0 }
 0x412   : > { %v2282_v48 = vpop.f32.mrb[13].mxu0  ;;  %v1266_v7 = vsel %vm809_vm3, %v3184_v47, -inf }
 0x413   : > { %v1263_v50 = vpop.f32.mrb[14].mxu0  ;;  %v812_v51 = vpop.xlane.xlu0 %811 }
 0x414   : > { %v813_v52 = vsub.f32 %v803_v26, %v812_v51  ;;  %v2283_v53 = vpop.f32.mrb[15].mxu0 }
 0x416   : > { %v814_v54 = vmul.f32 1.442695, %v813_v52 }
 0x418   : > { %2517 = vpow2.f32 %v814_v54 }
 0x419   : > { %v3186_v55 = vpop.f32.mrb[16].mxu0 }
 0x41a   : > { %v2294_v56 = vpop.f32.mrb[17].mxu0  ;;  %v1375_v8 = vsel %vm809_vm3, %v3186_v55, -inf }
 0x41b   : > { %v1372_v57 = vpop.f32.mrb[18].mxu0 }
 0x41c   : > { %v2295_v59 = vpop.f32.mrb[19].mxu0 }
 0x421   : > { %v3188_v60 = vpop.f32.mrb[20].mxu0  ;;  %1158 = vrot.lane.b32.xlu0 %v3116_v58, %s2790_s17 }
 0x422   : > { %v3191_v61 = vpop.eup %2517  ;;  %v2306_v62 = vpop.f32.mrb[21].mxu0  ;;  %v1495_v9 = vsel %vm809_vm3, %v3188_v60, -inf }
 0x423   : > { %v1492_v63 = vpop.f32.mrb[22].mxu0  ;;  %v821_v0 = vpack.c.bf16 %v3191_v61, %v3191_v61 }
 0x424   : > { %v2307_v1 = vpop.f32.mrb[23].mxu0 }
 0x425   : > { %2239 = vmatmul.mubr.msk.bf16.vlgmr.msra.gmra.mrb[12].mxu1 %vm809_vm3, %v821_v0 }
 0x426   : > { %2249 = vmatpush3.bf16.msra.mxu1 %v934_v2  ;;  %2250 = vmatprep.mubr.msk.bf16.mxu1 %vm2778_vm1, %v2777_v22 }
 0x427   : > { %2260 = vmatprep.subr.bf16.mxu1 %v2777_v22 }
 0x429   : > { %v3199_v3 = vpop.f32.mrb[24].mxu0 }
 0x42a   : > { %v2318_v4 = vpop.f32.mrb[25].mxu0  ;;  %v1604_v10 = vsel %vm809_vm3, %v3199_v3, -inf }
 0x42b   : > { %v1601_v5 = vpop.f32.mrb[26].mxu0 }
 0x42c   : > { %v2319_v6 = vpop.f32.mrb[27].mxu0 }
 0x42e   : > { %1267 = vmax.xlane.f32.xlu1 %v1266_v7 }
 0x432   : > { %1376 = vmax.xlane.f32.xlu1 %v1375_v8 }
 0x440   : > { %1496 = vmax.xlane.f32.xlu0 %v1495_v9 }
 0x443   : > { %1387 = vrot.lane.b32.xlu1 %v3116_v58, %s2791_s27 }
 0x456   : > { %1507 = vrot.lane.b32.xlu0 %v3116_v58, %s2792_s15 }
 0x467   : > { %1605 = vmax.xlane.f32.xlu1 %v1604_v10 }
 0x478   : > { %1616 = vrot.lane.b32.xlu1 %v3116_v58, %s2793_s28  ;;  %s3457_s28 = sld [smem:[#allocation29_spill]] }
 0x486   : > { %v923_v11 = vpop.xlane.xlu1 %922 }
 0x487   : > { %v924_v12 = vsub.f32 %v3171_v31, %v923_v11 }
 0x489   : > { %v925_v13 = vmul.f32 1.442695, %v924_v12 }
 0x48a   : > { %v1279_v28 = vpop.permute.xlu1 %1278 }
 0x48b   : > { %2519 = vpow2.f32 %v925_v13 }
 0x490   : > { %v1039_v14 = vpop.xlane.xlu0 %1038 }
 0x491   : > { %v1040_v15 = vsub.f32 %v3175_v36, %v1039_v14 }
 0x493   : > { %v1041_v16 = vmul.f32 1.442695, %v1040_v15 }
 0x495   : > { %v3214_v17 = vpop.eup %2519  ;;  %2521 = vpow2.f32 %v1041_v16 }
 0x496   : > { %v932_v18 = vpack.c.bf16 %v3214_v17, %v3214_v17  ;;  %v927_v62 = vsel %vm809_vm3, %v3214_v17, 0.0 }
 0x498   : > { %2251 = vmatmul.mubr.msk.bf16.vlgmr.msra.gmra.mrb[16].mxu1 %vm809_vm3, %v932_v18  ;;  %v1148_v19 = vpop.xlane.xlu0 %1147 }
 0x499   : > { %2261 = vmatpush3.bf16.msra.mxu1 %v1050_v46  ;;  %v1149_v58 = vsub.f32 %v3179_v41, %v1148_v19  ;;  %2262 = vmatprep.mubr.msk.bf16.mxu1 %vm2778_vm1, %v2777_v22 }
 0x49a   : > { %2272 = vmatprep.subr.bf16.mxu1 %v2777_v22 }
 0x49b   : > { %v1150_v20 = vmul.f32 1.442695, %v1149_v58 }
 0x49c   : > { %v1159_v24 = vpop.permute.xlu0 %1158 }
 0x49d   : > { %2523 = vpow2.f32 %v1150_v20 }
 0x49f   : > { %v3223_v21 = vpop.eup %2521 }
 0x4a0   : > { %v1048_v23 = vpack.c.bf16 %v3223_v21, %v3223_v21  ;;  %v1043_v63 = vsel %vm809_vm3, %v3223_v21, 0.0 }
 0x4a2   : > { %2263 = vmatmul.mubr.msk.bf16.vlgmr.msra.gmra.mrb[20].mxu1 %vm809_vm3, %v1048_v23 }
 0x4a3   : > { %2273 = vmatpush3.bf16.msra.mxu1 %v1159_v24  ;;  %2274 = vmatprep.mubr.msk.bf16.mxu1 %vm2778_vm1, %v2777_v22 }
 0x4a4   : > { %2284 = vmatprep.subr.bf16.mxu1 %v2777_v22 }
 0x4a7   : > { %v2524_v25 = vpop.eup %2523 }
 0x4a8   : > { %v1152_v26 = vsel %vm809_vm3, %v2524_v25, 0.0  ;;  %v1157_v27 = vpack.c.bf16 %v2524_v25, %v2524_v25 }
 0x4a9   : > { %1153 = vadd.xlane.f32.xlu0 %v1152_v26 }
 0x4aa   : > { %2275 = vmatmul.mubr.msk.bf16.vlgmr.msra.gmra.mrb[24].mxu1 %vm809_vm3, %v1157_v27 }
 0x4ab   : > { %2285 = vmatpush3.bf16.msra.mxu1 %v1279_v28  ;;  %2286 = vmatprep.mubr.msk.bf16.mxu1 %vm2778_vm1, %v2777_v22 }
 0x4ac   : > { %2296 = vmatprep.subr.bf16.mxu1 %v2777_v22 }
 0x4bb   : > { %v1268_v29 = vpop.xlane.xlu1 %1267 }
 0x4bc   : > { %v1269_v30 = vsub.f32 %v3184_v47, %v1268_v29 }
 0x4be   : > { %v1270_v31 = vmul.f32 1.442695, %v1269_v30 }
 0x4bf   : > { %v1377_v32 = vpop.xlane.xlu1 %1376 }
 0x4c0   : > { %2525 = vpow2.f32 %v1270_v31  ;;  %v1378_v33 = vsub.f32 %v3186_v55, %v1377_v32 }
 0x4c2   : > { %v1379_v34 = vmul.f32 1.442695, %v1378_v33 }
 0x4c3   : > { %v1388_v37 = vpop.permute.xlu1 %1387 }
 0x4c4   : > { %2527 = vpow2.f32 %v1379_v34 }
 0x4ca   : > { %v2526_v35 = vpop.eup %2525 }
 0x4cb   : > { %v1277_v36 = vpack.c.bf16 %v2526_v35, %v2526_v35  ;;  %v1272_v43 = vsel %vm809_vm3, %v2526_v35, 0.0 }
 0x4cd   : > { %2287 = vmatmul.mubr.msk.bf16.vlgmr.msra.gmra.mrb[28].mxu1 %vm809_vm3, %v1277_v36  ;;  %v1497_v38 = vpop.xlane.xlu0 %1496 }
 0x4ce   : > { %v2528_v39 = vpop.eup %2527  ;;  %2297 = vmatpush3.bf16.msra.mxu1 %v1388_v37  ;;  %v1498_v40 = vsub.f32 %v3188_v60, %v1497_v38  ;;  %2298 = vmatprep.mubr.msk.bf16.mxu1 %vm2778_vm1, %v2777_v22 }
 0x4cf   : > { %v1381_v41 = vsel %vm809_vm3, %v2528_v39, 0.0  ;;  %2308 = vmatprep.subr.bf16.mxu1 %v2777_v22  ;;  %v1386_v44 = vpack.c.bf16 %v2528_v39, %v2528_v39 }
 0x4d0   : > { %v1499_v42 = vmul.f32 1.442695, %v1498_v40  ;;  %1382 = vadd.xlane.f32.xlu1 %v1381_v41 }
 0x4d1   : > { %v1508_v45 = vpop.permute.xlu0 %1507 }
 0x4d2   : > { %2529 = vpow2.f32 %v1499_v42 }
 0x4d4   : > { %1273 = vadd.xlane.f32.xlu1 %v1272_v43 }
 0x4d5   : > { %2299 = vmatmul.mubr.msk.bf16.vlgmr.msra.gmra.mrb[32].mxu1 %vm809_vm3, %v1386_v44 }
 0x4d6   : > { %2309 = vmatpush3.bf16.msra.mxu1 %v1508_v45  ;;  %2310 = vmatprep.mubr.msk.bf16.mxu1 %vm2778_vm1, %v2777_v22 }
 0x4d7   : > { %2320 = vmatprep.subr.bf16.mxu1 %v2777_v22 }
 0x4dc   : > { %v2530_v46 = vpop.eup %2529 }
 0x4dd   : > { %v1506_v47 = vpack.c.bf16 %v2530_v46, %v2530_v46  ;;  %v1501_v0 = vsel %vm809_vm3, %v2530_v46, 0.0 }
 0x4df   : > { %2311 = vmatmul.mubr.msk.bf16.vlgmr.msra.gmra.mrb[36].mxu1 %vm809_vm3, %v1506_v47 }
 0x4e0   : > { %2322 = vmatprep.mubr.msk.bf16.mxu1 %vm2778_vm1, %v2777_v22 }
 0x4f4   : > { %v1606_v48 = vpop.xlane.xlu1 %1605 }
 0x4f5   : > { %v1607_v50 = vsub.f32 %v3199_v3, %v1606_v48 }
 0x4f7   : > { %v1608_v51 = vmul.f32 1.442695, %v1607_v50 }
 0x4f8   : > { %v1617_v52 = vpop.permute.xlu1 %1616  ;;  %v3253_v53 = vpop.f32.mrb[12].mxu1 }
 0x4f9   : > { %2531 = vpow2.f32 %v1608_v51  ;;  %v2240_v54 = vpop.f32.mrb[13].mxu1  ;;  %2321 = vmatpush3.bf16.msra.mxu1 %v1617_v52 }
 0x4fa   : > { %v866_v55 = vpop.f32.mrb[14].mxu1  ;;  %2334 = vmatprep.subr.bf16.mxu1 %v2777_v22  ;;  %v816_v54 = vsel %vm809_vm3, %v3191_v61, 0.0  ;;  %v2500_v61 = vld [vmem:[%s3405_s7 + $0x8] sm:$0xff]  }
 0x4fb   : > { %v2241_v56 = vpop.f32.mrb[15].mxu1 }
 0x503   : > { %v2532_v57 = vpop.eup %2531 }
 0x504   : > { %v1610_v59 = vsel %vm809_vm3, %v2532_v57, 0.0  ;;  %v1615_v60 = vpack.c.bf16 %v2532_v57, %v2532_v57 }
 0x505   : > { %1611 = vadd.xlane.f32.xlu0 %v1610_v59 }
 0x506   : > { %2323 = vmatmul.mubr.msk.bf16.vlgmr.msra.gmra.mrb[40].mxu1 %vm809_vm3, %v1615_v60 }
 0x507   : > { %2338 = vmatprep.mubr.msk.bf16.mxu1 %vm2778_vm1, %v2777_v22 }
 0x509   : > { %928 = vadd.xlane.f32.xlu0 %v927_v62 }
 0x50d   : > { %1044 = vadd.xlane.f32.xlu0 %v1043_v63  ;;  %v2499_v63 = vld [vmem:[%s3405_s7] sm:$0xff]  }
 0x50e   : > { %2327 = vmatpush3.bf16.msra.mxu0 %v2499_v63 }
 0x50f   : > { %2328 = vmatprep.subr.bf16.mxu0 %v2777_v22 }
 0x511   : > { %1502 = vadd.xlane.f32.xlu0 %v1501_v0 }
 0x512   : > { %2329 = vmatpush3.bf16.msra.mxu0 %v2500_v61 }
 0x513   : > { %2342 = vmatprep.subr.bf16.mxu0 %v2777_v22 }
 0x536   : > { %v1154_v2 = vpop.xlane.xlu0 %1153 }
 0x537   : > { %2533 = vrcp.f32 %v1154_v2 }
 0x541   : > { %v2534_v10 = vpop.eup %2533 }
 0x542   : > { %v1156_v11 = vmul.f32 0.17677669, %v2534_v10 }
 0x55d   : > { %v1383_v18 = vpop.xlane.xlu1 %1382 }
 0x55e   : > { %2535 = vrcp.f32 %v1383_v18 }
 0x561   : > { %v1274_v48 = vpop.xlane.xlu1 %1273 }
 0x568   : > { %v2536_v24 = vpop.eup %2535 }
 0x569   : > { %v1385_v26 = vmul.f32 0.17677669, %v2536_v24 }
 0x56b   : > { %v973_v1 = vpop.f32.mrb[16].mxu1 }
 0x56c   : > { %v2252_v3 = vpop.f32.mrb[17].mxu1 }
 0x56d   : > { %v976_v4 = vpop.f32.mrb[18].mxu1 }
 0x56e   : > { %v2253_v5 = vpop.f32.mrb[19].mxu1 }
 0x575   : > { %v1089_v6 = vpop.f32.mrb[20].mxu1 }
 0x576   : > { %v2264_v7 = vpop.f32.mrb[21].mxu1 }
 0x577   : > { %v1092_v8 = vpop.f32.mrb[22].mxu1 }
 0x578   : > { %v2265_v9 = vpop.f32.mrb[23].mxu1 }
 0x57d   : > { %v1198_v12 = vpop.f32.mrb[24].mxu1 }
 0x57e   : > { %v1204_v13 = vmul.f32 %v1198_v12, %v1156_v11  ;;  %v2276_v14 = vpop.f32.mrb[25].mxu1 }
 0x57f   : > { %v1201_v15 = vpop.f32.mrb[26].mxu1 }
 0x580   : > { %1206 = vrot.lane.b32.xlu1 %v1204_v13, %s2794_s30  ;;  %v2277_v16 = vpop.f32.mrb[27].mxu1 }
 0x592   : > { %v1612_v17 = vpop.xlane.xlu0 %1611 }
 0x596   : > { %v929_v19 = vpop.xlane.xlu0 %928 }
 0x597   : > { %2537 = vrcp.f32 %v929_v19 }
 0x598   : > { %2539 = vrcp.f32 %v1612_v17 }
 0x59a   : > { %v1045_v45 = vpop.xlane.xlu0 %1044 }
 0x59b   : > { %2541 = vrcp.f32 %v1045_v45  ;;  %v2509_v45 = vld [vmem:[%s3411_s13 + $0x30] sm:$0xff]  }
 0x59c   : > { %2543 = vrcp.f32 %v1274_v48 }
 0x59e   : > { %v1503_v56 = vpop.xlane.xlu0 %1502 }
 0x59f   : > { %2545 = vrcp.f32 %v1503_v56 }
 0x5a0   : > { %v1318_v58 = vpop.f32.mrb[28].mxu1 }
 0x5a1   : > { %v2288_v20 = vpop.f32.mrb[29].mxu1  ;;  %v2538_v25 = vpop.eup %2537 }
 0x5a2   : > { %v1321_v21 = vpop.f32.mrb[30].mxu1  ;;  %v931_v28 = vmul.f32 0.17677669, %v2538_v25  ;;  %v2540_v38 = vpop.eup %2539 }
 0x5a3   : > { %v2289_v23 = vpop.f32.mrb[31].mxu1  ;;  %v1614_v39 = vmul.f32 0.17677669, %v2540_v38 }
 0x5a4   : > { %v979_v33 = vmul.f32 %v973_v1, %v931_v28  ;;  %v2502_v28 = vld [vmem:[%s3409_s11 + $0x8] sm:$0xff]  }
 0x5a5   : > { %v2542_v46 = vpop.eup %2541 }
 0x5a6   : > { %v1047_v47 = vmul.f32 0.17677669, %v2542_v46  ;;  %v2544_v55 = vpop.eup %2543  ;;  %v2510_v46 = vld [vmem:[%s3411_s13 + $0x38] sm:$0xff]  }
 0x5a7   : > { %v1276_v57 = vmul.f32 0.17677669, %v2544_v55 }
 0x5a8   : > { %v1427_v27 = vpop.f32.mrb[32].mxu1  ;;  %v1095_v50 = vmul.f32 %v1089_v6, %v1047_v47 }
 0x5a9   : > { %v1433_v29 = vmul.f32 %v1427_v27, %v1385_v26  ;;  %v2300_v30 = vpop.f32.mrb[33].mxu1  ;;  %v1324_v59 = vmul.f32 %v1318_v58, %v1276_v57  ;;  %v2546_v0 = vpop.eup %2545  ;;  %v2501_v27 = vld [vmem:[%s3409_s11] sm:$0xff]  }
 0x5aa   : > { %v1430_v31 = vpop.f32.mrb[34].mxu1  ;;  %v1505_v1 = vmul.f32 0.17677669, %v2546_v0  ;;  %2335 = vmatpush3.bf16.msra.mxu1 %v2501_v27 }
 0x5ab   : > { %1435 = vrot.lane.b32.xlu0 %v1433_v29, %s2794_s30  ;;  %v2301_v32 = vpop.f32.mrb[35].mxu1  ;;  %2336 = vmatprep.subr.bf16.mxu1 %v2777_v22  ;;  %v2503_v29 = vld [vmem:[%s3411_s13] sm:$0xff]  }
 0x5ae   : > { %2337 = vmatpush3.bf16.msra.mxu1 %v2502_v28 }
 0x5af   : > { %981 = vrot.lane.b32.xlu0 %v979_v33, %s2794_s30 }
 0x5b2   : > { %v1547_v34 = vpop.f32.mrb[36].mxu1 }
 0x5b3   : > { %v2312_v35 = vpop.f32.mrb[37].mxu1  ;;  %v1553_v2 = vmul.f32 %v1547_v34, %v1505_v1  ;;  %v2140_v34 = vld [vmem:[#allocation9] ss:$0 sm:$0xff]  ;;  %v2146_v1 = vld [vmem:[%s3455_s26] ss:$0 sm:$0xff] }
 0x5b4   : > { %v1550_v36 = vpop.f32.mrb[38].mxu1 }
 0x5b5   : > { %v2313_v37 = vpop.f32.mrb[39].mxu1  ;;  %v2141_v36 = vld [vmem:[%s3408_s10] ss:$0 sm:$0xff] }
 0x5d9   : > { %v1656_v40 = vpop.f32.mrb[40].mxu1 }
 0x5da   : > { %v1662_v41 = vmul.f32 %v1656_v40, %v1614_v39  ;;  %v2324_v42 = vpop.f32.mrb[41].mxu1  ;;  %v2504_v40 = vld [vmem:[%s3411_s13 + $0x8] sm:$0xff]  }
 0x5db   : > { %v1659_v43 = vpop.f32.mrb[42].mxu1  ;;  %v2506_v42 = vld [vmem:[%s3411_s13 + $0x18] sm:$0xff]  }
 0x5dc   : > { %1664 = vrot.lane.b32.xlu1 %v1662_v41, %s2794_s30  ;;  %v2325_v44 = vpop.f32.mrb[43].mxu1  ;;  %v2505_v41 = vld [vmem:[%s3411_s13 + $0x10] sm:$0xff]   ;;  %v2507_v43 = vld [vmem:[%s3411_s13 + $0x20] sm:$0xff]   ;;  %s3453_s30 = sld [smem:[#allocation27_spill]] }
 0x5dd   : > { %v2508_v44 = vld [vmem:[%s3411_s13 + $0x28] sm:$0xff]  }
 0x5e2   : > { %v2142_v47 = vld [vmem:[%s3453_s30] ss:$0 sm:$0xff]  ;;  %s3344_s30 = scalar_lea.hbm %s3457_s28, %s2157_s20 }
 0x5f2   : > { %v1207_v51 = vpop.permute.xlu1 %1206 }
 0x5f3   : > { %v1209_v52 = vsel %vm762_vm2, %v1095_v50, %v1207_v51 }
 0x5f4   : > { %1211 = vrot.lane.b32.xlu0 %v1209_v52, %s2795_s14  ;;  %s3454_s14 = sld [smem:[#allocation17_spill]] }
 0x600   : > { %817 = vadd.xlane.f32.xlu1 %v816_v54 }
 0x61d   : > { %v1436_v60 = vpop.permute.xlu0 %1435 }
 0x61e   : > { %v1438_v62 = vsel %vm762_vm2, %v1324_v59, %v1436_v60 }
 0x61f   : > { %1440 = vrot.lane.b32.xlu0 %v1438_v62, %s2796_s29  ;;  %s550_s29 = sand.u32 1, %s3454_s14   ;;  %s2798_s14 = smov [#allocation11]  }
 0x620   : > { %s2106_s18 = sshll.u32 %s550_s29, 3  ;;  %s1963_s21 = scalar_lea.sflag [#allocation5], %s550_s29 }
 0x621   : > { %v982_v6 = vpop.permute.xlu0 %981  ;;  %s552_s19 = scalar_lea.vmem [#allocation11], %s2106_s18  ;;  %s2669_s18 = sshll.u32 %s2798_s14, 4  ;;  %s2670_s18 = int_to_ptr.vmem [resolvable:$false] %s2669_s18 }
 0x622   : > { %s1978_s17 = sshll.u32 %s552_s19, 4  ;;  %s2671_s24 = scalar_lea.vmem %s2670_s18, 256  ;;  %s3346_s17 = int_to_ptr.vmem [resolvable:$true] %s1978_s17 }
 0x623   : > { %s2665_s22 = scalar_lea.vmem %s3346_s17, 128  ;;  %p2672_p4 = scmp.lt.s32.totalorder %s3346_s17, %s2670_s18 }
 0x624   : > { %p2666_p2 = scmp.ne.s32.totalorder %s3346_s17, %s2665_s22  ;;  %p2673_p5 = scmp.lt.s32.totalorder %s2671_s24, %s2665_s22 }
 0x626   : > { %p2667_p12 = pnand %p2666_p2, %p3458_p10  ;;  %p2674_p6 = por %p2673_p5, %p2672_p4 }
 0x628   : > { %p2668_p1 = pneg %p2667_p12 }
 0x62a   : > { %p2675_p7 = pnand %p2674_p6, %p2668_p1 }
 0x64e   : > { %v1665_v3 = vpop.permute.xlu1 %1664 }
 0x64f   : > { %v1667_v4 = vsel %vm762_vm2, %v1553_v2, %v1665_v3 }
 0x650   : > { %1669 = vrot.lane.b32.xlu0 %v1667_v4, %s2797_s12 }
 0x666   : > { %v1212_v9 = vpop.permute.xlu0 %1211 }
 0x68d   : > { %v818_v5 = vpop.xlane.xlu1 %817 }
 0x68e   : > { %2547 = vrcp.f32 %v818_v5 }
 0x691   : > { %v1441_v12 = vpop.permute.xlu0 %1440 }
 0x698   : > { %v2548_v7 = vpop.eup %2547 }
 0x699   : > { %v820_v8 = vmul.f32 0.17677669, %v2548_v7 }
 0x69b   : > { %v869_v10 = vmul.f32 %v3253_v53, %v820_v8  ;;  %v2136_v53 = vld [vmem:[#allocation8] ss:$0 sm:$0xff] }
 0x69d   : > { %v984_v11 = vsel %vm762_vm2, %v869_v10, %v982_v6 }
 0x69e   : > { %986 = vst.msk [vmem:[#allocation2] sm:$0xff] %vm985_vm4, %v984_v11 }
 0x69f   : > { %1215 = vst.msk [vmem:[#allocation2] sm:$0xff] %vm1214_vm5, %v1212_v9 }
 0x6a0   : > { %1444 = vst.msk [vmem:[#allocation2] sm:$0xff] %vm1443_vm6, %v1441_v12 }
 0x6c2   : > { %v1670_v13 = vpop.permute.xlu0 %1669 }
 0x6c3   : > { %1673 = vst.msk [vmem:[#allocation2] sm:$0xff] %vm1672_vm7, %v1670_v13 }
 0x6ca   : > { %v1674_v14 = vld [vmem:[#allocation2] sm:$0xff] }
 0x6cb   : > { %v1675_v15 = vadd.f32 %v1674_v14, %v3108_v49 }
 0x6cd   : > { %v1676_v16 = vpack.c.bf16 %v1675_v15, %v1675_v15 }
 0x6cf   : > { %2331 = vmatmul.mubr.msk.bf16.vlgmr.msra.gmra.mrb[28].mxu0 %vm563_vm0, %v1676_v16 }
 0x6d0   : > { %2358 = vmatprep.mubr.msk.bf16.mxu0 %vm2778_vm1, %v2777_v22  ;;  %2343 = vmatpush3.bf16.msra.mxu0 %v2503_v29 }
 0x6d1   : > { %2344 = vmatprep.subr.bf16.mxu0 %v2777_v22 }
 0x6d4   : > { %2345 = vmatpush3.bf16.msra.mxu0 %v2504_v40 }
 0x6d5   : > { %2346 = vmatprep.subr.bf16.mxu0 %v2777_v22 }
 0x6d8   : > { %2347 = vmatpush3.bf16.msra.mxu0 %v2505_v41 }
 0x6d9   : > { %2348 = vmatprep.subr.bf16.mxu0 %v2777_v22 }
 0x6dc   : > { %2349 = vmatpush3.bf16.msra.mxu0 %v2506_v42 }
 0x6dd   : > { %2350 = vmatprep.subr.bf16.mxu0 %v2777_v22 }
 0x6e0   : > { %2351 = vmatpush3.bf16.msra.mxu0 %v2507_v43 }
 0x6e1   : > { %2352 = vmatprep.subr.bf16.mxu0 %v2777_v22 }
 0x6e4   : > { %2353 = vmatpush3.bf16.msra.mxu0 %v2508_v44 }
 0x6e5   : > { %2354 = vmatprep.subr.bf16.mxu0 %v2777_v22 }
 0x6e8   : > { %2355 = vmatpush3.bf16.msra.mxu0 %v2509_v45 }
 0x6e9   : > { %2356 = vmatprep.subr.bf16.mxu0 %v2777_v22 }
 0x6ec   : > { %2357 = vmatpush3.bf16.msra.mxu0 %v2510_v46 }
 0x7a2   : > { %v1737_v17 = vpop.f32.mrb[28].mxu0 }
 0x7a3   : > { %v1738_v18 = vadd.f32 %v2136_v53, %v1737_v17  ;;  %v2332_v19 = vpop.f32.mrb[29].mxu0 }
 0x7a4   : > { %v1740_v58 = vpop.f32.mrb[30].mxu0 }
 0x7a5   : > { %v2333_v20 = vpop.f32.mrb[31].mxu0  ;;  %v1745_v21 = vsel %vm563_vm0, %v1738_v18, 0.0 }
 0x7a6   : > { %1746 = vadd.xlane.f32.xlu0 %v1745_v21 }
 0x833   : > { %v1747_v23 = vpop.xlane.xlu0 %1746 }
 0x834   : > { %v1748_v24 = vmul.f32 0.03125, %v1747_v23 }
 0x836   : > { %v1749_v25 = vsub.f32 %v1738_v18, %v1748_v24 }
 0x838   : > { %v1750_v26 = vmul.f32 %v1749_v25, %v1749_v25 }
 0x83a   : > { %v1751_v49 = vsel %vm563_vm0, %v1750_v26, 0.0 }
 0x83b   : > { %1752 = vadd.xlane.f32.xlu1 %v1751_v49 }
 0x8c8   : > { %v1753_v30 = vpop.xlane.xlu1 %1752 }
 0x8c9   : > { %v1754_v31 = vmul.f32 0.03125, %v1753_v30 }
 0x8cb   : > { %v1755_v32 = vadd.f32 1e-05, %v1754_v31 }
 0x8cd   : > { %2549 = vrsqrt.f32 %v1755_v32 }
 0x8d7   : > { %v2550_v33 = vpop.eup %2549 }
 0x8d8   : > { %v1757_v35 = vmul.f32 %v2550_v33, %v1749_v25 }
 0x8da   : > { %v1764_v37 = vmul.f32 %v2140_v34, %v1757_v35 }
 0x8dc   : > { %v1771_v38 = vadd.f32 %v2141_v36, %v1764_v37 }
 0x8de   : > { %v1772_v39 = vpack.c.bf16 %v1771_v38, %v1771_v38 }
 0x8e0   : > { %2339 = vmatmul.mubr.msk.bf16.vlgmr.msra.gmra.mrb[44].mxu1 %vm563_vm0, %v1772_v39 }
 0x9b3   : > { %v1833_v48 = vpop.f32.mrb[44].mxu1 }
 0x9b4   : > { %v1834_v50 = vadd.f32 %v2142_v47, %v1833_v48  ;;  %v2340_v51 = vpop.f32.mrb[45].mxu1 }
 0x9b5   : > { %v1836_v52 = vpop.f32.mrb[46].mxu1 }
 0x9b6   : > { %v1840_v54 = vmul.f32 0.044715, %v1834_v50  ;;  %v2341_v55 = vpop.f32.mrb[47].mxu1  ;;  %v1839_v62 = vmul.f32 0.5, %v1834_v50 }
 0x9b8   : > { %v1841_v56 = vmul.f32 %v1840_v54, %v1834_v50 }
 0x9ba   : > { %v1842_v57 = vmul.f32 %v1841_v56, %v1834_v50 }
 0x9bc   : > { %v1843_v59 = vadd.f32 %v1842_v57, %v1834_v50 }
 0x9be   : > { %v1844_v60 = vmul.f32 0.7978846, %v1843_v59 }
 0x9c0   : > { %2551 = vtanh.f32 %v1844_v60 }
 0x9ca   : > { %v2552_v22 = vpop.eup %2551 }
 0x9cb   : > { %v1846_v63 = vadd.f32 1.0, %v2552_v22 }
 0x9cd   : > { %v1847_v61 = vmul.f32 %v1846_v63, %v1839_v62 }
 0x9cf   : > { %v1848_v0 = vpack.c.bf16 %v1847_v61, %v1847_v61 }
 0x9d1   : > { %2359 = vmatmul.mubr.bf16.vlgmr.msra.gmra.mrb[32].mxu0 %v1848_v0 }
 0xaa4   : > { %v1954_v2 = vpop.f32.mrb[32].mxu0 }
 0xaa5   : > { %v1955_v3 = vadd.f32 %v2146_v1, %v1954_v2  ;;  %v2360_v4 = vpop.f32.mrb[33].mxu0 }
 0xaa6   : > { %v1957_v5 = vpop.f32.mrb[34].mxu0 }
 0xaa7   : > { %v1960_v6 = vadd.f32 %v1955_v3, %v1771_v38  ;;  %v2361_v7 = vpop.f32.mrb[35].mxu0 }
 0xaa9   : > { %1961 = vst.msk [vmem:[%s552_s19] sm:$0xff] %vm563_vm0, %v1960_v6 }
 0xaaa   : > { %2678 = shalt.err (!%p2675_p7)
}
 0xaab   : > { %s2679_s29 = scalar_lea.hbm %s3344_s30, 128  ;;  %s2683_s12 = scalar_lea.hbm %s3457_s28, 512 }
 0xaac   : > { %p2680_p9 = scmp.ne.s32.totalorder %s3344_s30, %s2679_s29  ;;  %p2684_p3 = scmp.lt.u32.totalorder %s3344_s30, %s3457_s28 }
 0xaad   : > { %p2685_p8 = scmp.lt.u32.totalorder %s2683_s12, %s2679_s29  ;;  %p2687_p2 = scmp.lt.u32.totalorder %s2679_s29, %s3344_s30 }
 0xaae   : > { %p2681_p11 = pnand %p2680_p9, %p3458_p10 }
 0xaaf   : > { %p2686_p0 = por %p2685_p8, %p2684_p3 }
 0xab0   : > { %p2682_p13 = pneg %p2681_p11 }
 0xab1   : > { %p2688_p12 = por %p2687_p2, %p2686_p0 }
 0xab3   : > { %p2689_p1 = pnand %p2688_p12, %p2682_p13 }
 0xab5   : > { %2692 = shalt.err (!%p2689_p1)
}
 0xab6   : > { %2378 = dma.vmem_to_hbm [thread:$0]  (%p3458_p10), %s3346_s17, 128, %s3344_s30, %s1963_s21  }
 0xab7 PF: > { %s3459_s19 = sld [smem:[#allocation21_spill]]  ;;  %s3460_s27 = sld [smem:[#allocation16_spill]] }
 0xab8   : > { %s3461_s15 = sld [smem:[#allocation25_spill]] }
 0xabd   : > { %p2405_p4 = scmp.ge.s32.totalorder %s3459_s19, 2  ;;  %s1990_s22 = sand.u32 1, %s3460_s27  }
 0xabe   : > { %p3462_p5 = scmp.ne.s32.totalorder %s3461_s15, 0  ;;  %s1991_s14 = scalar_lea.sflag [#allocation5], %s1990_s22 }
 0xac0   : > { %p2394_p6 = pnand %p2405_p4, %p3462_p5 }
 0xac2   : > { %2738 = dma.done.wait (!%p2394_p6), %s1991_s14, 128  }
 0xac3   : > { %2740 = vsyncadd (!%p2394_p6), %s1991_s14, 4294967168  ;;  %s31_s25 = sadd.s32 1, %s3459_s19   ;;  %s3463_s18 = sld [smem:[#allocation17_spill]] }
 0xac4   : > { %p28_p7 = scmp.ge.s32.totalorder %s31_s25, 6   ;;  %s3464_s19 = sld [smem:[#allocation18_spill]] }
 0xac5   : > { %s3465_s20 = sld [smem:[#allocation26_spill]]  ;;  %s3466_s21 = sld [smem:[#allocation19_spill]] }
 0xac6   : > { %s3467_s22 = sld [smem:[#allocation20_spill]]  ;;  %s3468_s23 = sld [smem:[#allocation22_spill]] }
 0xac7   : > { %s3469_s24 = sld [smem:[#allocation24_spill]]  ;;  %30 = sbr.rel (!%p28_p7) target bundleno = 12 (0xc), region = 133 }
 0xace   :  { %1996 = vsyncpa [#allocation4], 1 }
 0xacf   :  { %1998 = vsyncpa [#allocation4 + $0x1], 1 }
 0xad0   :  { %1999 = vsyncpa [#allocation7], 1 }
 0xad1   :  { %2000 = vsyncpa [#allocation10], 1 }
 0xad2   :  { %2001 = vsyncpa [#allocation5], 1 }
 0xad3   :  { %2003 = vsyncpa [#allocation5 + $0x1], 1 }

// kernel: tpu_custom_call.1
= control target key start
LH: loop header
LB: loop body
LE: loop exit
PB: predicated region body
PF: predicated region fallthrough
CT: control target
= control target key end

     0   :  { %s3398_s0 = inlined_call_operand.vmem [shape: f32[2,16,32], index: 0, kind: input, shape index: {}]   ;;  %s3399_s1 = inlined_call_operand.vmem [shape: f32[1,32], index: 1, kind: input, shape index: {}]   ;;  %s3400_s2 = inlined_call_operand.vmem [shape: f32[1,32], index: 2, kind: input, shape index: {}]   ;;  %s3401_s3 = inlined_call_operand.vmem [shape: bf16[32,32], index: 3, kind: input, shape index: {}]   ;;  %s3402_s4 = inlined_call_operand.hbm [shape: f32[1,32], index: 4, kind: input, shape index: {}]   ;;  %s3403_s5 = inlined_call_operand.vmem [shape: bf16[32,64], index: 5, kind: input, shape index: {}]   ;;  %s3404_s6 = inlined_call_operand.hbm [shape: f32[1,64], index: 6, kind: input, shape index: {}]   ;;  %s3405_s7 = inlined_call_operand.vmem [shape: bf16[32,32], index: 7, kind: input, shape index: {}]   ;;  %s3406_s8 = inlined_call_operand.hbm [shape: f32[1,32], index: 8, kind: input, shape index: {}]   ;;  %s3407_s9 = inlined_call_operand.hbm [shape: f32[1,32], index: 9, kind: input, shape index: {}]   ;;  %s3408_s10 = inlined_call_operand.vmem [shape: f32[1,32], index: 10, kind: input, shape index: {}]   ;;  %s3409_s11 = inlined_call_operand.vmem [shape: bf16[32,128], index: 11, kind: input, shape index: {}]   ;;  %s3410_s12 = inlined_call_operand.vmem [shape: f32[1,128], index: 12, kind: input, shape index: {}]   ;;  %s3411_s13 = inlined_call_operand.vmem [shape: bf16[128,32], index: 13, kind: input, shape index: {}]   ;;  %s3412_s14 = inlined_call_operand.vmem [shape: f32[1,32], index: 14, kind: input, shape index: {}]   ;;  %s3413_s15 = inlined_call_operand.hbm [shape: f32[2,16,32], index: 15, kind: output, shape index: {}]  }
   0x1   :  { %3431 = sst [smem:[#allocation27_spill]] %s3410_s12 }
   0x2   :  { %3432 = sst [smem:[#allocation28_spill]] %s3412_s14 }
   0x3   :  { %3433 = sst [smem:[#allocation29_spill]] %s3413_s15 }
   0x4   :  { %20 = vsyncpa [#allocation4], 0 }
   0x5   :  { %21 = vsyncpa [#allocation7], 0 }
   0x6   :  { %22 = vsyncpa [#allocation10], 0 }
   0x7   :  { %23 = vsyncpa [#allocation5], 0 }
   0x8   :  { %25 = vsyncpa [#allocation5 + $0x1], 0  ;;  %s2879_s18 = smov 0   ;;  %s2881_s19 = smov 0  }
   0x9   :  { %s2883_s20 = smov 0   ;;  %s2885_s21 = smov 0  }
   0xa   :  { %s2887_s22 = smov 0   ;;  %s2889_s23 = smov 0  }
   0xb   :  { %s2891_s24 = smov 0   ;;  %s2893_s25 = smov 0  }
   0xc LB: > { %3434 = sst [smem:[#allocation16_spill]] %s2743_s18  ;;  %s2093_s26 = sadd.s32 4294967295, %s2771_s25   ;;  %s2771_s25 = sphi %s2893_s25, %s31_s25   ;;  %s2767_s24 = sphi %s2891_s24, %s3469_s24   ;;  %s2763_s23 = sphi %s2889_s23, %s3468_s23   ;;  %s2759_s22 = sphi %s2887_s22, %s3467_s22   ;;  %s2755_s21 = sphi %s2885_s21, %s3466_s21   ;;  %s2751_s20 = sphi %s2883_s20, %s3465_s20   ;;  %s2747_s19 = sphi %s2881_s19, %s3464_s19   ;;  %s2743_s18 = sphi %s2879_s18, %s3463_s18  }
   0xd   : > { %3435 = sst [smem:[#allocation17_spill]] %s2747_s19  ;;  %s2094_s27 = sadd.s32 4294967294, %s2771_s25  }
   0xe   : > { %3436 = sst [smem:[#allocation18_spill]] %s2751_s20  ;;  %s40_s28 = sadd.s32 1, %s2763_s23 }
   0xf   : > { %3437 = sst [smem:[#allocation19_spill]] %s2763_s23  ;;  %s43_s29 = sadd.s32 1, %s2767_s24 }
  0x10   : > { %3438 = sst [smem:[#allocation20_spill]] %s2767_s24  ;;  %p41_p0 = scmp.ge.s32.totalorder %s40_s28, 2 }
  0x11   : > { %3439 = sst [smem:[#allocation21_spill]] %s2771_s25  ;;  %s372_s30 = sadd.s32 1, %s2751_s20 }
  0x12   : > { %p382_p1 = scmp.ne.s32.totalorder %s2751_s20, %s2747_s19  ;;  %p383_p2 = scmp.eq.s32.totalorder %s2093_s26, 3 }
  0x13   : > { %s3471_s28 = smov (%p41_p0, %s40_s28), 0  ;;  %s3473_s29 = smov (!%p41_p0, %s43_s29), %s2767_s24 }
  0x14   : > { %3440 = sst [smem:[#allocation22_spill]] %s3471_s28  ;;  %s368_s16 = ssub.s32 %s2763_s23, %s3471_s28 }
  0x15   : > { %p2931_p3 = por %p383_p2, %p382_p1  ;;  %p45_p4 = scmp.ge.s32.totalorder %s3473_s29, 2 }
  0x16   : > { %p388_p5 = scmp.ne.s32.totalorder %s2747_s19, %s2743_s18  ;;  %p389_p6 = scmp.eq.s32.totalorder %s2094_s27, 3 }
  0x17   : > { %s3441_s17 = scalar_select %p2931_p3, 1, 0 }
  0x18   : > { %p2095_p7 = scmp.ge.s32.totalorder %s2771_s25, 1  ;;  %s3475_s29 = smov (%p45_p4, %s3473_s29), 0 }
  0x19   : > { %3442 = sst [smem:[#allocation23_spill]] %s3441_s17  ;;  %p2940_p8 = por %p389_p6, %p388_p5 }
  0x1a   : > { %3443 = sst [smem:[#allocation24_spill]] %s3475_s29  ;;  %p396_p9 = scmp.lt.s32.totalorder %s2771_s25, 5 }
  0x1b   : > { %s3444_s15 = scalar_select %p2940_p8, 1, 0 }
  0x1c   : > { %s367_s14 = ssub.s32 %s2767_s24, %s3475_s29  ;;  %p2947_p10 = pnand %p2095_p7, %p396_p9 }
  0x1d   : > { %3445 = sst [smem:[#allocation25_spill]] %s3444_s15  ;;  %s369_s12 = sor.u32 %s368_s16, %s367_s14 }
  0x1e   : > { %s3446_s28 = scalar_select %p2947_p10, 1, 0 }
  0x1f   : > { %p370_p11 = scmp.eq.s32.totalorder %s369_s12, 0  ;;  %p2951_p12 = scmp.eq.s32.totalorder %s2093_s26, 0 }
  0x20   : > { %p2380_p13 = pneg %p2947_p10  ;;  %s2773_s14 = smov [#allocation6]  }
  0x21   : > { %s3447_s23 = scalar_select %p2951_p12, 1, 0 }
  0x22   : > { %s2958_s27 = scalar_select %p370_p11, %s2751_s20, %s372_s30  }
  0x23   : > { %p2962_p0 = pnand %p2951_p12, %p2380_p13  ;;  %s432_s16 = sshll.u32 %s2773_s14, 4  ;;  %s433_s16 = int_to_ptr.vmem [resolvable:$true] %s432_s16 }
  0x24   : > { %3448 = sst [smem:[#allocation26_spill]] %s2958_s27  ;;  %s2553_s26 = scalar_lea.hbm %s3404_s6, 16 }
  0x25   : > { %p2554_p1 = scmp.ne.s32.totalorder %s3404_s6, %s2553_s26  ;;  %p2974_p2 = pneg %p2962_p0 }
  0x26   : > { %p2560_p6 = scmp.lt.u32.totalorder %s2553_s26, %s3404_s6 }
  0x27   : > { %p2556_p4 = pnand %p2974_p2, %p2554_p1 }
  0x29   : > { %p2557_p5 = pneg %p2556_p4 }
  0x2b   : > { %p2562_p7 = pnand %p2560_p6, %p2557_p5 }
  0x2d   : > { %2565 = shalt.err (!%p2562_p7)
}
  0x2e   : > { %s2566_s29 = scalar_lea.vmem %s433_s16, 16  ;;  %s2573_s18 = scalar_lea.vmem %s433_s16, 32 }
  0x2f   : > { %p2567_p9 = scmp.ne.s32.totalorder %s433_s16, %s2566_s29  ;;  %p2574_p8 = scmp.lt.s32.totalorder %s433_s16, %s433_s16 }
  0x30   : > { %p2575_p3 = scmp.lt.s32.totalorder %s2573_s18, %s2566_s29 }
  0x31   : > { %p2569_p11 = pnand %p2567_p9, %p2974_p2 }
  0x32   : > { %p2576_p12 = por %p2575_p3, %p2574_p8 }
  0x33   : > { %p2570_p13 = pneg %p2569_p11 }
  0x35   : > { %p2577_p10 = pnand %p2576_p12, %p2570_p13 }
  0x37   : > { %2580 = shalt.err (!%p2577_p10)
}
  0x38   : > { %2386 = dma.hbm_to_vmem [thread:$0]  (!%p2962_p0), %s3404_s6, 16, %s433_s16, [#allocation7]  }
  0x39   : > { %s2774_s27 = smov [#allocation3]   ;;  %s2775_s14 = smov [#allocation8]  }
  0x3a   : > { %s418_s26 = sshll.u32 %s2774_s27, 4  ;;  %s446_s20 = sshll.u32 %s2775_s14, 4  ;;  %s419_s26 = int_to_ptr.vmem [resolvable:$true] %s418_s26  ;;  %s2990_s20 = int_to_ptr.vmem [resolvable:$true] %s446_s20 }
  0x3b   : > { %s2581_s29 = scalar_lea.hbm %s3402_s4, 16 }
  0x3c   : > { %p2582_p3 = scmp.ne.s32.totalorder %s3402_s4, %s2581_s29  ;;  %p2588_p12 = scmp.lt.u32.totalorder %s2581_s29, %s3402_s4 }
  0x3e   : > { %p2584_p8 = pnand %p2582_p3, %p2974_p2 }
  0x40   : > { %p2585_p10 = pneg %p2584_p8 }
  0x42   : > { %p2590_p1 = pnand %p2588_p12, %p2585_p10 }
  0x44   : > { %2593 = shalt.err (!%p2590_p1)
}
  0x45   : > { %s2594_s12 = scalar_lea.vmem %s419_s26, 16  ;;  %s2601_s25 = scalar_lea.vmem %s419_s26, 32 }
  0x46   : > { %p2595_p4 = scmp.ne.s32.totalorder %s419_s26, %s2594_s12  ;;  %p2602_p7 = scmp.lt.s32.totalorder %s419_s26, %s419_s26 }
  0x47   : > { %p2603_p9 = scmp.lt.s32.totalorder %s2601_s25, %s2594_s12 }
  0x48   : > { %p2597_p5 = pnand %p2595_p4, %p2974_p2 }
  0x49   : > { %p2604_p11 = por %p2603_p9, %p2602_p7 }
  0x4a   : > { %p2598_p6 = pneg %p2597_p5 }
  0x4c   : > { %p2605_p13 = pnand %p2604_p11, %p2598_p6 }
  0x4e   : > { %2608 = shalt.err (!%p2605_p13)
}
  0x4f   : > { %2383 = dma.hbm_to_vmem [thread:$0]  (!%p2962_p0), %s3402_s4, 16, %s419_s26, [#allocation4]  }
  0x50   : > { %s2609_s29 = scalar_lea.hbm %s3406_s8, 16 }
  0x51   : > { %p2610_p3 = scmp.ne.s32.totalorder %s3406_s8, %s2609_s29  ;;  %p2616_p12 = scmp.lt.u32.totalorder %s2609_s29, %s3406_s8 }
  0x53   : > { %p2612_p8 = pnand %p2610_p3, %p2974_p2 }
  0x55   : > { %p2613_p10 = pneg %p2612_p8 }
  0x57   : > { %p2618_p1 = pnand %p2616_p12, %p2613_p10 }
  0x59   : > { %2621 = shalt.err (!%p2618_p1)
}
  0x5a   : > { %s2622_s26 = scalar_lea.vmem %s2990_s20, 16  ;;  %s2629_s25 = scalar_lea.vmem %s2990_s20, 32 }
  0x5b   : > { %p2623_p4 = scmp.ne.s32.totalorder %s2990_s20, %s2622_s26  ;;  %p2630_p7 = scmp.lt.s32.totalorder %s2990_s20, %s2990_s20 }
  0x5c   : > { %p2631_p9 = scmp.lt.s32.totalorder %s2629_s25, %s2622_s26 }
  0x5d   : > { %p2625_p5 = pnand %p2623_p4, %p2974_p2 }
  0x5e   : > { %p2632_p11 = por %p2631_p9, %p2630_p7 }
  0x5f   : > { %p2626_p6 = pneg %p2625_p5 }
  0x61   : > { %p2633_p13 = pnand %p2632_p11, %p2626_p6 }
  0x63   : > { %2636 = shalt.err (!%p2633_p13)
}
  0x64   : > { %2389 = dma.hbm_to_vmem [thread:$0]  (!%p2962_p0), %s3406_s8, 16, %s2990_s20, [#allocation7]  }
  0x65   : > { %s2776_s27 = smov [#allocation9]   ;;  %s2637_s24 = scalar_lea.hbm %s3407_s9, 16 }
  0x66   : > { %s457_s14 = sshll.u32 %s2776_s27, 4  ;;  %p2638_p3 = scmp.ne.s32.totalorder %s3407_s9, %s2637_s24  ;;  %s458_s14 = int_to_ptr.vmem [resolvable:$true] %s457_s14 }
  0x67   : > { %p2644_p12 = scmp.lt.u32.totalorder %s2637_s24, %s3407_s9 }
  0x68   : > { %p2640_p8 = pnand %p2638_p3, %p2974_p2 }
  0x6a   : > { %p2641_p10 = pneg %p2640_p8 }
  0x6c   : > { %p2646_p1 = pnand %p2644_p12, %p2641_p10 }
  0x6e   : > { %2649 = shalt.err (!%p2646_p1)
}
  0x6f   : > { %s2650_s20 = scalar_lea.vmem %s458_s14, 16  ;;  %s2657_s19 = scalar_lea.vmem %s458_s14, 32 }
  0x70   : > { %p2651_p4 = scmp.ne.s32.totalorder %s458_s14, %s2650_s20  ;;  %p2658_p7 = scmp.lt.s32.totalorder %s458_s14, %s458_s14 }
  0x71   : > { %p2659_p9 = scmp.lt.s32.totalorder %s2657_s19, %s2650_s20 }
  0x72   : > { %p2653_p5 = pnand %p2651_p4, %p2974_p2 }
  0x73   : > { %p2660_p11 = por %p2659_p9, %p2658_p7 }
  0x74   : > { %p2654_p6 = pneg %p2653_p5 }
  0x76   : > { %p2661_p13 = pnand %p2660_p11, %p2654_p6 }
  0x78   : > { %2664 = shalt.err (!%p2661_p13)
}
  0x79   : > { %2392 = dma.hbm_to_vmem [thread:$0]  (!%p2962_p0), %s3407_s9, 16, %s458_s14, [#allocation10]  }
  0x7a   : > { %p3451_p3 = scmp.ne.s32.totalorder %s3446_s28, 0 }
  0x7b   : > { %p3452_p8 = scmp.ne.s32.totalorder (!%p3451_p3), %s3447_s23, 0 }
  0x7c   : > { %493 = sbr.rel (%p3451_p3) target bundleno = 2743 (0xab7), region = 80 }
  0x83   : > { %2726 = dma.done.wait (%p3452_p8), [#allocation4], 16  }
  0x84   : > { %2728 = vsyncadd (%p3452_p8), [#allocation4], 4294967280 }
  0x85   : > { %2730 = dma.done.wait (%p3452_p8), [#allocation7], 32  }
  0x86   : > { %2732 = vsyncadd (%p3452_p8), [#allocation7], 4294967264 }
  0x87   : > { %2734 = dma.done.wait (%p3452_p8), [#allocation10], 16  }
  0x88   : > { %2736 = vsyncadd (%p3452_p8), [#allocation10], 4294967280  ;;  %p553_p0 = scmp.lt.s32.totalorder %s2759_s22, 1  ;;  %s2115_s28 = sshll.u32 %s2755_s21, 3  ;;  %vm563_vm0 = vcmask 261120   ;;  %v2495_v21 = vld [vmem:[%s3403_s5] sm:$0xff]  }
  0x89   : > { %v2777_v22 = vmov 0.0   ;;  %v2496_v23 = vld [vmem:[%s3403_s5 + $0x8] sm:$0xff]   ;;  %vm2778_vm1 = vmmov 0   ;;  %v2109_v35 = vld [vmem:[%s3399_s1] ss:$0 sm:$0xff]  ;;  %vm762_vm2 = vcmask 31744  }
  0x8a   : > { %s554_s15 = scalar_select %p553_p0, %s2759_s22, 1  ;;  %2214 = vmatprep.subr.bf16.mxu1 %v2777_v22  ;;  %2242 = vmatprep.subr.bf16.mxu0 %v2777_v22  ;;  %v2110_v40 = vld [vmem:[%s3400_s2] ss:$0 sm:$0xff]  ;;  %v2498_v48 = vld [vmem:[%s3401_s3 + $0x8] sm:$0xff]   ;;  %vm809_vm3 = vcmask 130048   ;;  %vm985_vm4 = vcmask 64512  }
  0x8b   : > { %2215 = vmatpush3.bf16.msra.mxu1 %v2495_v21  ;;  %2218 = vmatprep.mubr.msk.bf16.mxu1 %vm2778_vm1, %v2777_v22  ;;  %v2497_v45 = vld [vmem:[%s3401_s3] sm:$0xff]   ;;  %v2111_v51 = vld [vmem:[#allocation6] ss:$0 sm:$0xff]  ;;  %v2116_v59 = vld [vmem:[#allocation3] ss:$0 sm:$0xff]  ;;  %s2779_s14 = smov 124  }
  0x8c   : > { %s2160_s30 = sshll.u32 %s554_s15, 4  ;;  %2216 = vmatprep.subr.bf16.mxu1 %v2777_v22  ;;  %2244 = vmatprep.mubr.msk.bf16.mxu0 %vm2778_vm1, %v2777_v22  ;;  %s2780_s29 = smov 116   ;;  %vm1214_vm5 = vcmask 130112   ;;  %vm1443_vm6 = vcmask 195712   ;;  %vm1672_vm7 = vcmask 261312  }
  0x8d   : > { %s557_s18 = scalar_lea.vmem %s3398_s0, %s2160_s30  ;;  %s2783_s23 = smov 108  }
  0x8e   : > { %s677_s24 = scalar_lea.vmem %s557_s18, %s2115_s28  ;;  %v559_v0 = vld [vmem:[%s557_s18] sm:$0xff]  ;;  %v560_v2 = vld [vmem:[%s557_s18 + $0x8] sm:$0xff]  ;;  %s2781_s18 = smov 112  }
  0x8f   : > { %v678_v1 = vld [vmem:[%s677_s24] sm:$0xff]  ;;  %v564_v3 = vsel %vm563_vm0, %v559_v0, 0.0  ;;  %v567_v5 = vsel %vm563_vm0, %v560_v2, 0.0  ;;  %2217 = vmatpush3.bf16.msra.mxu1 %v2496_v23  ;;  %s2782_s24 = smov 120   ;;  %s2784_s16 = smov 104  }
  0x90   : > { %v679_v4 = vsel %vm563_vm0, %v678_v1, 0.0  ;;  %565 = vadd.xlane.f32.xlu0 %v564_v3  ;;  %2222 = vmatprep.subr.bf16.mxu1 %v2777_v22  ;;  %s2785_s12 = smov 100   ;;  %s2786_s26 = smov 96  }
  0x91   : > { %680 = vadd.xlane.f32.xlu1 %v679_v4  ;;  %s2787_s25 = smov 88   ;;  %s2788_s20 = smov 92  }
  0x92   : > { %s2789_s19 = smov 80   ;;  %s2790_s17 = smov 84  }
  0x93   : > { %s2791_s27 = smov 76   ;;  %s2792_s15 = smov 72  }
  0x94   : > { %568 = vadd.xlane.f32.xlu0 %v567_v5  ;;  %s2793_s28 = smov 68   ;;  %s2794_s30 = smov 4  }
 0x11d   : > { %v566_v6 = vpop.xlane.xlu0 %565 }
 0x11e   : > { %v681_v7 = vpop.xlane.xlu1 %680  ;;  %v571_v8 = vmul.f32 0.03125, %v566_v6 }
 0x11f   : > { %v682_v9 = vmul.f32 0.03125, %v681_v7 }
 0x120   : > { %v573_v10 = vsub.f32 %v559_v0, %v571_v8 }
 0x121   : > { %v683_v11 = vsub.f32 %v678_v1, %v682_v9  ;;  %v569_v12 = vpop.xlane.xlu0 %568 }
 0x122   : > { %v572_v13 = vmul.f32 0.03125, %v569_v12  ;;  %v575_v14 = vmul.f32 %v573_v10, %v573_v10 }
 0x123   : > { %v684_v15 = vmul.f32 %v683_v11, %v683_v11 }
 0x124   : > { %v574_v16 = vsub.f32 %v560_v2, %v572_v13  ;;  %v577_v17 = vsel %vm563_vm0, %v575_v14, 0.0 }
 0x125   : > { %578 = vadd.xlane.f32.xlu1 %v577_v17  ;;  %v685_v18 = vsel %vm563_vm0, %v684_v15, 0.0 }
 0x126   : > { %v576_v19 = vmul.f32 %v574_v16, %v574_v16 }
 0x128   : > { %v580_v20 = vsel %vm563_vm0, %v576_v19, 0.0 }
 0x129   : > { %686 = vadd.xlane.f32.xlu1 %v685_v18  ;;  %581 = vadd.xlane.f32.xlu0 %v580_v20 }
 0x1b2   : > { %v579_v24 = vpop.xlane.xlu1 %578 }
 0x1b3   : > { %v583_v25 = vmul.f32 0.03125, %v579_v24 }
 0x1b5   : > { %v585_v26 = vadd.f32 1e-05, %v583_v25 }
 0x1b6   : > { %v687_v27 = vpop.xlane.xlu1 %686  ;;  %v582_v28 = vpop.xlane.xlu0 %581 }
 0x1b7   : > { %2511 = vrsqrt.f32 %v585_v26  ;;  %v688_v29 = vmul.f32 0.03125, %v687_v27  ;;  %v584_v30 = vmul.f32 0.03125, %v582_v28 }
 0x1b9   : > { %v689_v31 = vadd.f32 1e-05, %v688_v29  ;;  %v586_v32 = vadd.f32 1e-05, %v584_v30 }
 0x1bb   : > { %2513 = vrsqrt.f32 %v689_v31 }
 0x1bc   : > { %2515 = vrsqrt.f32 %v586_v32 }
 0x1c1   : > { %v2512_v33 = vpop.eup %2511 }
 0x1c2   : > { %v589_v34 = vmul.f32 %v2512_v33, %v573_v10 }
 0x1c4   : > { %v597_v39 = vmul.f32 %v2109_v35, %v589_v34 }
 0x1c5   : > { %v2514_v36 = vpop.eup %2513 }
 0x1c6   : > { %v2516_v37 = vpop.eup %2515  ;;  %v691_v41 = vmul.f32 %v2514_v36, %v683_v11  ;;  %v605_v43 = vadd.f32 %v2110_v40, %v597_v39 }
 0x1c7   : > { %v590_v38 = vmul.f32 %v2516_v37, %v574_v16 }
 0x1c8   : > { %v692_v47 = vmul.f32 %v2109_v35, %v691_v41 }
 0x1c9   : > { %v598_v42 = vmul.f32 %v2109_v35, %v590_v38 }
 0x1ca   : > { %v3108_v49 = vadd.f32 %v2110_v40, %v692_v47 }
 0x1cb   : > { %v606_v44 = vadd.f32 %v2110_v40, %v598_v42 }
 0x1cc   : > { %v694_v50 = vpack.c.bf16 %v3108_v49, %v3108_v49 }
 0x1cd   : > { %v607_v46 = vpack.c.bf16 %v606_v44, %v605_v43 }
 0x1cf   : > { %2219 = vmatmul.mubr.msk.bf16.vlgmr.msra.gmra.mrb[0].mxu1 %vm563_vm0, %v607_v46 }
 0x1d0   : > { %2223 = vmatpush3.bf16.msra.mxu1 %v2497_v45  ;;  %2226 = vmatprep.mubr.msk.bf16.mxu1 %vm2778_vm1, %v2777_v22 }
 0x1d1   : > { %2224 = vmatprep.subr.bf16.mxu1 %v2777_v22 }
 0x1d4   : > { %2225 = vmatpush3.bf16.msra.mxu1 %v2498_v48 }
 0x1d5   : > { %2230 = vmatprep.subr.bf16.mxu1 %v2777_v22 }
 0x1d7   : > { %2227 = vmatmul.mubr.msk.bf16.vlgmr.msra.gmra.mrb[4].mxu1 %vm563_vm0, %v694_v50 }
 0x1d8   : > { %2232 = vmatprep.mubr.msk.bf16.mxu1 %vm2778_vm1, %v2777_v22 }
 0x2a2   : > { %v668_v52 = vpop.f32.mrb[0].mxu1 }
 0x2a3   : > { %v2220_v53 = vpop.f32.mrb[1].mxu1  ;;  %v669_v55 = vadd.f32 %v2111_v51, %v668_v52 }
 0x2a4   : > { %v671_v54 = vpop.f32.mrb[2].mxu1 }
 0x2a5   : > { %v672_v56 = vadd.f32 %v2111_v51, %v671_v54  ;;  %v2221_v57 = vpop.f32.mrb[3].mxu1 }
 0x2a7   : > { %v3116_v58 = vpack.c.bf16 %v672_v56, %v669_v55 }
 0x2a9   : > { %873 = vrot.lane.b32.xlu0 %v3116_v58, %s2779_s14  ;;  %v767_v60 = vsel %vm762_vm2, %v3116_v58, 0 }
 0x2aa   : > { %v755_v61 = vpop.f32.mrb[4].mxu1  ;;  %2231 = vmatpush3.bf16.xpose.msra.mxu1 %v767_v60 }
 0x2ab   : > { %v756_v62 = vadd.f32 %v2116_v59, %v755_v61  ;;  %v2228_v63 = vpop.f32.mrb[5].mxu1  ;;  %2236 = vmatprep.subr.bf16.mxu1 %v2777_v22 }
 0x2ac   : > { %v758_v0 = vpop.f32.mrb[6].mxu1 }
 0x2ad   : > { %v761_v1 = vpack.c.bf16 %v756_v62, %v756_v62  ;;  %1098 = vrot.lane.b32.xlu0 %v3116_v58, %s2780_s29  ;;  %v2229_v2 = vpop.f32.mrb[7].mxu1 }
 0x2af   : > { %871 = vrot.lane.b32.xlu1 %v761_v1, %s2779_s14  ;;  %s2795_s14 = smov 8  }
 0x2b1   : > { %1218 = vrot.lane.b32.xlu0 %v3116_v58, %s2781_s18  ;;  %2233 = vmatmul.mubr.msk.bf16.vlgmr.msra.gmra.mrb[8].mxu1 %vm762_vm2, %v761_v1 }
 0x2b2   : > { %2238 = vmatprep.mubr.msk.bf16.mxu1 %vm2778_vm1, %v2777_v22 }
 0x2b3   : > { %989 = vrot.lane.b32.xlu1 %v3116_v58, %s2782_s24 }
 0x2b5   : > { %1327 = vrot.lane.b32.xlu0 %v3116_v58, %s2783_s23 }
 0x2b7   : > { %987 = vrot.lane.b32.xlu1 %v761_v1, %s2782_s24  ;;  %s2156_s24 = sshll.u32 %s2759_s22, 1 }
 0x2b9   : > { %1447 = vrot.lane.b32.xlu0 %v3116_v58, %s2784_s16 }
 0x2bb   : > { %1096 = vrot.lane.b32.xlu1 %v761_v1, %s2780_s29  ;;  %s2796_s29 = smov 16  }
 0x2bd   : > { %1556 = vrot.lane.b32.xlu0 %v3116_v58, %s2785_s12 }
 0x2bf   : > { %1216 = vrot.lane.b32.xlu1 %v761_v1, %s2781_s18 }
 0x2c1   : > { %823 = vrot.lane.b32.xlu0 %v3116_v58, %s2786_s26  ;;  %s3455_s26 = sld [smem:[#allocation28_spill]] }
 0x2c3   : > { %1325 = vrot.lane.b32.xlu1 %v761_v1, %s2783_s23  ;;  %s1974_s23 = sadd.s32 %s2755_s21, %s2156_s24 }
 0x2c5   : > { %1049 = vrot.lane.b32.xlu0 %v3116_v58, %s2787_s25  ;;  %s3456_s25 = sld [smem:[#allocation23_spill]] }
 0x2c7   : > { %1445 = vrot.lane.b32.xlu1 %v761_v1, %s2784_s16 }
 0x2cb   : > { %1554 = vrot.lane.b32.xlu1 %v761_v1, %s2785_s12  ;;  %s2797_s12 = smov 24   ;;  %p3458_p10 = scmp.ne.s32.totalorder %s3456_s25, 0 }
 0x2cf   : > { %933 = vrot.lane.b32.xlu1 %v3116_v58, %s2788_s20  ;;  %s2157_s20 = sshll.u32 %s1974_s23, 7 }
 0x31b   : > { %v874_v3 = vpop.permute.xlu0 %873 }
 0x31c   : > { %v879_v4 = vsel %vm762_vm2, %v874_v3, 0 }
 0x31d   : > { %2243 = vmatpush3.bf16.xpose.msra.mxu0 %v879_v4 }
 0x31e   : > { %2254 = vmatprep.subr.bf16.mxu0 %v2777_v22 }
 0x31f   : > { %v1099_v5 = vpop.permute.xlu0 %1098 }
 0x320   : > { %v1104_v13 = vsel %vm762_vm2, %v1099_v5, 0 }
 0x321   : > { %v872_v6 = vpop.permute.xlu1 %871 }
 0x323   : > { %v1219_v7 = vpop.permute.xlu0 %1218 }
 0x324   : > { %2245 = vmatmul.mubr.msk.bf16.vlgmr.msra.gmra.mrb[0].mxu0 %vm762_vm2, %v872_v6  ;;  %v1224_v17 = vsel %vm762_vm2, %v1219_v7, 0 }
 0x325   : > { %v990_v8 = vpop.permute.xlu1 %989  ;;  %2256 = vmatprep.mubr.msk.bf16.mxu0 %vm2778_vm1, %v2777_v22 }
 0x326   : > { %v995_v9 = vsel %vm762_vm2, %v990_v8, 0 }
 0x327   : > { %v1328_v10 = vpop.permute.xlu0 %1327  ;;  %2255 = vmatpush3.bf16.xpose.msra.mxu0 %v995_v9 }
 0x328   : > { %2266 = vmatprep.subr.bf16.mxu0 %v2777_v22  ;;  %v1333_v19 = vsel %vm762_vm2, %v1328_v10, 0 }
 0x329   : > { %v988_v12 = vpop.permute.xlu1 %987 }
 0x32b   : > { %v1448_v11 = vpop.permute.xlu0 %1447 }
 0x32c   : > { %v1453_v21 = vsel %vm762_vm2, %v1448_v11, 0 }
 0x32d   : > { %v1097_v16 = vpop.permute.xlu1 %1096 }
 0x32e   : > { %2257 = vmatmul.mubr.msk.bf16.vlgmr.msra.gmra.mrb[4].mxu0 %vm762_vm2, %v988_v12 }
 0x32f   : > { %v1557_v14 = vpop.permute.xlu0 %1556  ;;  %2267 = vmatpush3.bf16.xpose.msra.mxu0 %v1104_v13  ;;  %2268 = vmatprep.mubr.msk.bf16.mxu0 %vm2778_vm1, %v2777_v22 }
 0x330   : > { %2278 = vmatprep.subr.bf16.mxu0 %v2777_v22  ;;  %v1562_v24 = vsel %vm762_vm2, %v1557_v14, 0 }
 0x331   : > { %v1217_v18 = vpop.permute.xlu1 %1216 }
 0x333   : > { %v824_v15 = vpop.permute.xlu0 %823 }
 0x334   : > { %2237 = vmatpush3.bf16.msra.mxu1 %v824_v15 }
 0x335   : > { %2248 = vmatprep.subr.bf16.mxu1 %v2777_v22  ;;  %v1326_v20 = vpop.permute.xlu1 %1325 }
 0x336   : > { %2269 = vmatmul.mubr.msk.bf16.vlgmr.msra.gmra.mrb[8].mxu0 %vm762_vm2, %v1097_v16 }
 0x337   : > { %2279 = vmatpush3.bf16.xpose.msra.mxu0 %v1224_v17  ;;  %2280 = vmatprep.mubr.msk.bf16.mxu0 %vm2778_vm1, %v2777_v22  ;;  %v1050_v46 = vpop.permute.xlu0 %1049 }
 0x338   : > { %2290 = vmatprep.subr.bf16.mxu0 %v2777_v22 }
 0x339   : > { %v1446_v23 = vpop.permute.xlu1 %1445 }
 0x33d   : > { %v1555_v25 = vpop.permute.xlu1 %1554 }
 0x33e   : > { %2281 = vmatmul.mubr.msk.bf16.vlgmr.msra.gmra.mrb[12].mxu0 %vm762_vm2, %v1217_v18 }
 0x33f   : > { %2291 = vmatpush3.bf16.xpose.msra.mxu0 %v1333_v19  ;;  %2292 = vmatprep.mubr.msk.bf16.mxu0 %vm2778_vm1, %v2777_v22 }
 0x340   : > { %2302 = vmatprep.subr.bf16.mxu0 %v2777_v22 }
 0x341   : > { %v934_v2 = vpop.permute.xlu1 %933 }
 0x346   : > { %2293 = vmatmul.mubr.msk.bf16.vlgmr.msra.gmra.mrb[16].mxu0 %vm762_vm2, %v1326_v20 }
 0x347   : > { %2303 = vmatpush3.bf16.xpose.msra.mxu0 %v1453_v21  ;;  %2304 = vmatprep.mubr.msk.bf16.mxu0 %vm2778_vm1, %v2777_v22 }
 0x348   : > { %2314 = vmatprep.subr.bf16.mxu0 %v2777_v22 }
 0x34e   : > { %2305 = vmatmul.mubr.msk.bf16.vlgmr.msra.gmra.mrb[20].mxu0 %vm762_vm2, %v1446_v23 }
 0x34f   : > { %2315 = vmatpush3.bf16.xpose.msra.mxu0 %v1562_v24  ;;  %2316 = vmatprep.mubr.msk.bf16.mxu0 %vm2778_vm1, %v2777_v22 }
 0x350   : > { %2326 = vmatprep.subr.bf16.mxu0 %v2777_v22 }
 0x356   : > { %2317 = vmatmul.mubr.msk.bf16.vlgmr.msra.gmra.mrb[24].mxu0 %vm762_vm2, %v1555_v25 }
 0x357   : > { %2330 = vmatprep.mubr.msk.bf16.mxu0 %vm2778_vm1, %v2777_v22 }
 0x384   : > { %v803_v26 = vpop.f32.mrb[8].mxu1 }
 0x385   : > { %v2234_v27 = vpop.f32.mrb[9].mxu1  ;;  %v810_v28 = vsel %vm809_vm3, %v803_v26, -inf }
 0x386   : > { %811 = vmax.xlane.f32.xlu0 %v810_v28  ;;  %v806_v29 = vpop.f32.mrb[10].mxu1 }
 0x387   : > { %v2235_v30 = vpop.f32.mrb[11].mxu1 }
 0x3f7   : > { %v3171_v31 = vpop.f32.mrb[0].mxu0 }
 0x3f8   : > { %v2246_v32 = vpop.f32.mrb[1].mxu0  ;;  %v921_v33 = vsel %vm809_vm3, %v3171_v31, -inf }
 0x3f9   : > { %922 = vmax.xlane.f32.xlu1 %v921_v33  ;;  %v918_v34 = vpop.f32.mrb[2].mxu0 }
 0x3fa   : > { %v2247_v35 = vpop.f32.mrb[3].mxu0 }
 0x401   : > { %v3175_v36 = vpop.f32.mrb[4].mxu0 }
 0x402   : > { %v2258_v37 = vpop.f32.mrb[5].mxu0  ;;  %v1037_v38 = vsel %vm809_vm3, %v3175_v36, -inf }
 0x403   : > { %v1034_v39 = vpop.f32.mrb[6].mxu0  ;;  %1038 = vmax.xlane.f32.xlu0 %v1037_v38 }
 0x404   : > { %v2259_v40 = vpop.f32.mrb[7].mxu0 }
 0x409   : > { %v3179_v41 = vpop.f32.mrb[8].mxu0 }
 0x40a   : > { %1278 = vrot.lane.b32.xlu1 %v3116_v58, %s2789_s19  ;;  %v2270_v42 = vpop.f32.mrb[9].mxu0  ;;  %v1146_v43 = vsel %vm809_vm3, %v3179_v41, -inf }
 0x40b   : > { %v1143_v44 = vpop.f32.mrb[10].mxu0  ;;  %1147 = vmax.xlane.f32.xlu0 %v1146_v43 }
 0x40c   : > { %v2271_v45 = vpop.f32.mrb[11].mxu0 }
 0x411   : > { %v3184_v47 = vpop.f32.mrb[12].mxu0 }
 0x412   : > { %v2282_v48 = vpop.f32.mrb[13].mxu0  ;;  %v1266_v7 = vsel %vm809_vm3, %v3184_v47, -inf }
 0x413   : > { %v1263_v50 = vpop.f32.mrb[14].mxu0  ;;  %v812_v51 = vpop.xlane.xlu0 %811 }
 0x414   : > { %v813_v52 = vsub.f32 %v803_v26, %v812_v51  ;;  %v2283_v53 = vpop.f32.mrb[15].mxu0 }
 0x416   : > { %v814_v54 = vmul.f32 1.442695, %v813_v52 }
 0x418   : > { %2517 = vpow2.f32 %v814_v54 }
 0x419   : > { %v3186_v55 = vpop.f32.mrb[16].mxu0 }
 0x41a   : > { %v2294_v56 = vpop.f32.mrb[17].mxu0  ;;  %v1375_v8 = vsel %vm809_vm3, %v3186_v55, -inf }
 0x41b   : > { %v1372_v57 = vpop.f32.mrb[18].mxu0 }
 0x41c   : > { %v2295_v59 = vpop.f32.mrb[19].mxu0 }
 0x421   : > { %v3188_v60 = vpop.f32.mrb[20].mxu0  ;;  %1158 = vrot.lane.b32.xlu0 %v3116_v58, %s2790_s17 }
 0x422   : > { %v3191_v61 = vpop.eup %2517  ;;  %v2306_v62 = vpop.f32.mrb[21].mxu0  ;;  %v1495_v9 = vsel %vm809_vm3, %v3188_v60, -inf }
 0x423   : > { %v1492_v63 = vpop.f32.mrb[22].mxu0  ;;  %v821_v0 = vpack.c.bf16 %v3191_v61, %v3191_v61 }
 0x424   : > { %v2307_v1 = vpop.f32.mrb[23].mxu0 }
 0x425   : > { %2239 = vmatmul.mubr.msk.bf16.vlgmr.msra.gmra.mrb[12].mxu1 %vm809_vm3, %v821_v0 }
 0x426   : > { %2249 = vmatpush3.bf16.msra.mxu1 %v934_v2  ;;  %2250 = vmatprep.mubr.msk.bf16.mxu1 %vm2778_vm1, %v2777_v22 }
 0x427   : > { %2260 = vmatprep.subr.bf16.mxu1 %v2777_v22 }
 0x429   : > { %v3199_v3 = vpop.f32.mrb[24].mxu0 }
 0x42a   : > { %v2318_v4 = vpop.f32.mrb[25].mxu0  ;;  %v1604_v10 = vsel %vm809_vm3, %v3199_v3, -inf }
 0x42b   : > { %v1601_v5 = vpop.f32.mrb[26].mxu0 }
 0x42c   : > { %v2319_v6 = vpop.f32.mrb[27].mxu0 }
 0x42e   : > { %1267 = vmax.xlane.f32.xlu1 %v1266_v7 }
 0x432   : > { %1376 = vmax.xlane.f32.xlu1 %v1375_v8 }
 0x440   : > { %1496 = vmax.xlane.f32.xlu0 %v1495_v9 }
 0x443   : > { %1387 = vrot.lane.b32.xlu1 %v3116_v58, %s2791_s27 }
 0x456   : > { %1507 = vrot.lane.b32.xlu0 %v3116_v58, %s2792_s15 }
 0x467   : > { %1605 = vmax.xlane.f32.xlu1 %v1604_v10 }
 0x478   : > { %1616 = vrot.lane.b32.xlu1 %v3116_v58, %s2793_s28  ;;  %s3457_s28 = sld [smem:[#allocation29_spill]] }
 0x486   : > { %v923_v11 = vpop.xlane.xlu1 %922 }
 0x487   : > { %v924_v12 = vsub.f32 %v3171_v31, %v923_v11 }
 0x489   : > { %v925_v13 = vmul.f32 1.442695, %v924_v12 }
 0x48a   : > { %v1279_v28 = vpop.permute.xlu1 %1278 }
 0x48b   : > { %2519 = vpow2.f32 %v925_v13 }
 0x490   : > { %v1039_v14 = vpop.xlane.xlu0 %1038 }
 0x491   : > { %v1040_v15 = vsub.f32 %v3175_v36, %v1039_v14 }
 0x493   : > { %v1041_v16 = vmul.f32 1.442695, %v1040_v15 }
 0x495   : > { %v3214_v17 = vpop.eup %2519  ;;  %2521 = vpow2.f32 %v1041_v16 }
 0x496   : > { %v932_v18 = vpack.c.bf16 %v3214_v17, %v3214_v17  ;;  %v927_v62 = vsel %vm809_vm3, %v3214_v17, 0.0 }
 0x498   : > { %2251 = vmatmul.mubr.msk.bf16.vlgmr.msra.gmra.mrb[16].mxu1 %vm809_vm3, %v932_v18  ;;  %v1148_v19 = vpop.xlane.xlu0 %1147 }
 0x499   : > { %2261 = vmatpush3.bf16.msra.mxu1 %v1050_v46  ;;  %v1149_v58 = vsub.f32 %v3179_v41, %v1148_v19  ;;  %2262 = vmatprep.mubr.msk.bf16.mxu1 %vm2778_vm1, %v2777_v22 }
 0x49a   : > { %2272 = vmatprep.subr.bf16.mxu1 %v2777_v22 }
 0x49b   : > { %v1150_v20 = vmul.f32 1.442695, %v1149_v58 }
 0x49c   : > { %v1159_v24 = vpop.permute.xlu0 %1158 }
 0x49d   : > { %2523 = vpow2.f32 %v1150_v20 }
 0x49f   : > { %v3223_v21 = vpop.eup %2521 }
 0x4a0   : > { %v1048_v23 = vpack.c.bf16 %v3223_v21, %v3223_v21  ;;  %v1043_v63 = vsel %vm809_vm3, %v3223_v21, 0.0 }
 0x4a2   : > { %2263 = vmatmul.mubr.msk.bf16.vlgmr.msra.gmra.mrb[20].mxu1 %vm809_vm3, %v1048_v23 }
 0x4a3   : > { %2273 = vmatpush3.bf16.msra.mxu1 %v1159_v24  ;;  %2274 = vmatprep.mubr.msk.bf16.mxu1 %vm2778_vm1, %v2777_v22 }
 0x4a4   : > { %2284 = vmatprep.subr.bf16.mxu1 %v2777_v22 }
 0x4a7   : > { %v2524_v25 = vpop.eup %2523 }
 0x4a8   : > { %v1152_v26 = vsel %vm809_vm3, %v2524_v25, 0.0  ;;  %v1157_v27 = vpack.c.bf16 %v2524_v25, %v2524_v25 }
 0x4a9   : > { %1153 = vadd.xlane.f32.xlu0 %v1152_v26 }
 0x4aa   : > { %2275 = vmatmul.mubr.msk.bf16.vlgmr.msra.gmra.mrb[24].mxu1 %vm809_vm3, %v1157_v27 }
 0x4ab   : > { %2285 = vmatpush3.bf16.msra.mxu1 %v1279_v28  ;;  %2286 = vmatprep.mubr.msk.bf16.mxu1 %vm2778_vm1, %v2777_v22 }
 0x4ac   : > { %2296 = vmatprep.subr.bf16.mxu1 %v2777_v22 }
 0x4bb   : > { %v1268_v29 = vpop.xlane.xlu1 %1267 }
 0x4bc   : > { %v1269_v30 = vsub.f32 %v3184_v47, %v1268_v29 }
 0x4be   : > { %v1270_v31 = vmul.f32 1.442695, %v1269_v30 }
 0x4bf   : > { %v1377_v32 = vpop.xlane.xlu1 %1376 }
 0x4c0   : > { %2525 = vpow2.f32 %v1270_v31  ;;  %v1378_v33 = vsub.f32 %v3186_v55, %v1377_v32 }
 0x4c2   : > { %v1379_v34 = vmul.f32 1.442695, %v1378_v33 }
 0x4c3   : > { %v1388_v37 = vpop.permute.xlu1 %1387 }
 0x4c4   : > { %2527 = vpow2.f32 %v1379_v34 }
 0x4ca   : > { %v2526_v35 = vpop.eup %2525 }
 0x4cb   : > { %v1277_v36 = vpack.c.bf16 %v2526_v35, %v2526_v35  ;;  %v1272_v43 = vsel %vm809_vm3, %v2526_v35, 0.0 }
 0x4cd   : > { %2287 = vmatmul.mubr.msk.bf16.vlgmr.msra.gmra.mrb[28].mxu1 %vm809_vm3, %v1277_v36  ;;  %v1497_v38 = vpop.xlane.xlu0 %1496 }
 0x4ce   : > { %v2528_v39 = vpop.eup %2527  ;;  %2297 = vmatpush3.bf16.msra.mxu1 %v1388_v37  ;;  %v1498_v40 = vsub.f32 %v3188_v60, %v1497_v38  ;;  %2298 = vmatprep.mubr.msk.bf16.mxu1 %vm2778_vm1, %v2777_v22 }
 0x4cf   : > { %v1381_v41 = vsel %vm809_vm3, %v2528_v39, 0.0  ;;  %2308 = vmatprep.subr.bf16.mxu1 %v2777_v22  ;;  %v1386_v44 = vpack.c.bf16 %v2528_v39, %v2528_v39 }
 0x4d0   : > { %v1499_v42 = vmul.f32 1.442695, %v1498_v40  ;;  %1382 = vadd.xlane.f32.xlu1 %v1381_v41 }
 0x4d1   : > { %v1508_v45 = vpop.permute.xlu0 %1507 }
 0x4d2   : > { %2529 = vpow2.f32 %v1499_v42 }
 0x4d4   : > { %1273 = vadd.xlane.f32.xlu1 %v1272_v43 }
 0x4d5   : > { %2299 = vmatmul.mubr.msk.bf16.vlgmr.msra.gmra.mrb[32].mxu1 %vm809_vm3, %v1386_v44 }
 0x4d6   : > { %2309 = vmatpush3.bf16.msra.mxu1 %v1508_v45  ;;  %2310 = vmatprep.mubr.msk.bf16.mxu1 %vm2778_vm1, %v2777_v22 }
 0x4d7   : > { %2320 = vmatprep.subr.bf16.mxu1 %v2777_v22 }
 0x4dc   : > { %v2530_v46 = vpop.eup %2529 }
 0x4dd   : > { %v1506_v47 = vpack.c.bf16 %v2530_v46, %v2530_v46  ;;  %v1501_v0 = vsel %vm809_vm3, %v2530_v46, 0.0 }
 0x4df   : > { %2311 = vmatmul.mubr.msk.bf16.vlgmr.msra.gmra.mrb[36].mxu1 %vm809_vm3, %v1506_v47 }
 0x4e0   : > { %2322 = vmatprep.mubr.msk.bf16.mxu1 %vm2778_vm1, %v2777_v22 }
 0x4f4   : > { %v1606_v48 = vpop.xlane.xlu1 %1605 }
 0x4f5   : > { %v1607_v50 = vsub.f32 %v3199_v3, %v1606_v48 }
 0x4f7   : > { %v1608_v51 = vmul.f32 1.442695, %v1607_v50 }
 0x4f8   : > { %v1617_v52 = vpop.permute.xlu1 %1616  ;;  %v3253_v53 = vpop.f32.mrb[12].mxu1 }
 0x4f9   : > { %2531 = vpow2.f32 %v1608_v51  ;;  %v2240_v54 = vpop.f32.mrb[13].mxu1  ;;  %2321 = vmatpush3.bf16.msra.mxu1 %v1617_v52 }
 0x4fa   : > { %v866_v55 = vpop.f32.mrb[14].mxu1  ;;  %2334 = vmatprep.subr.bf16.mxu1 %v2777_v22  ;;  %v816_v54 = vsel %vm809_vm3, %v3191_v61, 0.0  ;;  %v2500_v61 = vld [vmem:[%s3405_s7 + $0x8] sm:$0xff]  }
 0x4fb   : > { %v2241_v56 = vpop.f32.mrb[15].mxu1 }
 0x503   : > { %v2532_v57 = vpop.eup %2531 }
 0x504   : > { %v1610_v59 = vsel %vm809_vm3, %v2532_v57, 0.0  ;;  %v1615_v60 = vpack.c.bf16 %v2532_v57, %v2532_v57 }
 0x505   : > { %1611 = vadd.xlane.f32.xlu0 %v1610_v59 }
 0x506   : > { %2323 = vmatmul.mubr.msk.bf16.vlgmr.msra.gmra.mrb[40].mxu1 %vm809_vm3, %v1615_v60 }
 0x507   : > { %2338 = vmatprep.mubr.msk.bf16.mxu1 %vm2778_vm1, %v2777_v22 }
 0x509   : > { %928 = vadd.xlane.f32.xlu0 %v927_v62 }
 0x50d   : > { %1044 = vadd.xlane.f32.xlu0 %v1043_v63  ;;  %v2499_v63 = vld [vmem:[%s3405_s7] sm:$0xff]  }
 0x50e   : > { %2327 = vmatpush3.bf16.msra.mxu0 %v2499_v63 }
 0x50f   : > { %2328 = vmatprep.subr.bf16.mxu0 %v2777_v22 }
 0x511   : > { %1502 = vadd.xlane.f32.xlu0 %v1501_v0 }
 0x512   : > { %2329 = vmatpush3.bf16.msra.mxu0 %v2500_v61 }
 0x513   : > { %2342 = vmatprep.subr.bf16.mxu0 %v2777_v22 }
 0x536   : > { %v1154_v2 = vpop.xlane.xlu0 %1153 }
 0x537   : > { %2533 = vrcp.f32 %v1154_v2 }
 0x541   : > { %v2534_v10 = vpop.eup %2533 }
 0x542   : > { %v1156_v11 = vmul.f32 0.17677669, %v2534_v10 }
 0x55d   : > { %v1383_v18 = vpop.xlane.xlu1 %1382 }
 0x55e   : > { %2535 = vrcp.f32 %v1383_v18 }
 0x561   : > { %v1274_v48 = vpop.xlane.xlu1 %1273 }
 0x568   : > { %v2536_v24 = vpop.eup %2535 }
 0x569   : > { %v1385_v26 = vmul.f32 0.17677669, %v2536_v24 }
 0x56b   : > { %v973_v1 = vpop.f32.mrb[16].mxu1 }
 0x56c   : > { %v2252_v3 = vpop.f32.mrb[17].mxu1 }
 0x56d   : > { %v976_v4 = vpop.f32.mrb[18].mxu1 }
 0x56e   : > { %v2253_v5 = vpop.f32.mrb[19].mxu1 }
 0x575   : > { %v1089_v6 = vpop.f32.mrb[20].mxu1 }
 0x576   : > { %v2264_v7 = vpop.f32.mrb[21].mxu1 }
 0x577   : > { %v1092_v8 = vpop.f32.mrb[22].mxu1 }
 0x578   : > { %v2265_v9 = vpop.f32.mrb[23].mxu1 }
 0x57d   : > { %v1198_v12 = vpop.f32.mrb[24].mxu1 }
 0x57e   : > { %v1204_v13 = vmul.f32 %v1198_v12, %v1156_v11  ;;  %v2276_v14 = vpop.f32.mrb[25].mxu1 }
 0x57f   : > { %v1201_v15 = vpop.f32.mrb[26].mxu1 }
 0x580   : > { %1206 = vrot.lane.b32.xlu1 %v1204_v13, %s2794_s30  ;;  %v2277_v16 = vpop.f32.mrb[27].mxu1 }
 0x592   : > { %v1612_v17 = vpop.xlane.xlu0 %1611 }
 0x596   : > { %v929_v19 = vpop.xlane.xlu0 %928 }
 0x597   : > { %2537 = vrcp.f32 %v929_v19 }
 0x598   : > { %2539 = vrcp.f32 %v1612_v17 }
 0x59a   : > { %v1045_v45 = vpop.xlane.xlu0 %1044 }
 0x59b   : > { %2541 = vrcp.f32 %v1045_v45  ;;  %v2509_v45 = vld [vmem:[%s3411_s13 + $0x30] sm:$0xff]  }
 0x59c   : > { %2543 = vrcp.f32 %v1274_v48 }
 0x59e   : > { %v1503_v56 = vpop.xlane.xlu0 %1502 }
 0x59f   : > { %2545 = vrcp.f32 %v1503_v56 }
 0x5a0   : > { %v1318_v58 = vpop.f32.mrb[28].mxu1 }
 0x5a1   : > { %v2288_v20 = vpop.f32.mrb[29].mxu1  ;;  %v2538_v25 = vpop.eup %2537 }
 0x5a2   : > { %v1321_v21 = vpop.f32.mrb[30].mxu1  ;;  %v931_v28 = vmul.f32 0.17677669, %v2538_v25  ;;  %v2540_v38 = vpop.eup %2539 }
 0x5a3   : > { %v2289_v23 = vpop.f32.mrb[31].mxu1  ;;  %v1614_v39 = vmul.f32 0.17677669, %v2540_v38 }
 0x5a4   : > { %v979_v33 = vmul.f32 %v973_v1, %v931_v28  ;;  %v2502_v28 = vld [vmem:[%s3409_s11 + $0x8] sm:$0xff]  }
 0x5a5   : > { %v2542_v46 = vpop.eup %2541 }
 0x5a6   : > { %v1047_v47 = vmul.f32 0.17677669, %v2542_v46  ;;  %v2544_v55 = vpop.eup %2543  ;;  %v2510_v46 = vld [vmem:[%s3411_s13 + $0x38] sm:$0xff]  }
 0x5a7   : > { %v1276_v57 = vmul.f32 0.17677669, %v2544_v55 }
 0x5a8   : > { %v1427_v27 = vpop.f32.mrb[32].mxu1  ;;  %v1095_v50 = vmul.f32 %v1089_v6, %v1047_v47 }
 0x5a9   : > { %v1433_v29 = vmul.f32 %v1427_v27, %v1385_v26  ;;  %v2300_v30 = vpop.f32.mrb[33].mxu1  ;;  %v1324_v59 = vmul.f32 %v1318_v58, %v1276_v57  ;;  %v2546_v0 = vpop.eup %2545  ;;  %v2501_v27 = vld [vmem:[%s3409_s11] sm:$0xff]  }
 0x5aa   : > { %v1430_v31 = vpop.f32.mrb[34].mxu1  ;;  %v1505_v1 = vmul.f32 0.17677669, %v2546_v0  ;;  %2335 = vmatpush3.bf16.msra.mxu1 %v2501_v27 }
 0x5ab   : > { %1435 = vrot.lane.b32.xlu0 %v1433_v29, %s2794_s30  ;;  %v2301_v32 = vpop.f32.mrb[35].mxu1  ;;  %2336 = vmatprep.subr.bf16.mxu1 %v2777_v22  ;;  %v2503_v29 = vld [vmem:[%s3411_s13] sm:$0xff]  }
 0x5ae   : > { %2337 = vmatpush3.bf16.msra.mxu1 %v2502_v28 }
 0x5af   : > { %981 = vrot.lane.b32.xlu0 %v979_v33, %s2794_s30 }
 0x5b2   : > { %v1547_v34 = vpop.f32.mrb[36].mxu1 }
 0x5b3   : > { %v2312_v35 = vpop.f32.mrb[37].mxu1  ;;  %v1553_v2 = vmul.f32 %v1547_v34, %v1505_v1  ;;  %v2140_v34 = vld [vmem:[#allocation9] ss:$0 sm:$0xff]  ;;  %v2146_v1 = vld [vmem:[%s3455_s26] ss:$0 sm:$0xff] }
 0x5b4   : > { %v1550_v36 = vpop.f32.mrb[38].mxu1 }
 0x5b5   : > { %v2313_v37 = vpop.f32.mrb[39].mxu1  ;;  %v2141_v36 = vld [vmem:[%s3408_s10] ss:$0 sm:$0xff] }
 0x5d9   : > { %v1656_v40 = vpop.f32.mrb[40].mxu1 }
 0x5da   : > { %v1662_v41 = vmul.f32 %v1656_v40, %v1614_v39  ;;  %v2324_v42 = vpop.f32.mrb[41].mxu1  ;;  %v2504_v40 = vld [vmem:[%s3411_s13 + $0x8] sm:$0xff]  }
 0x5db   : > { %v1659_v43 = vpop.f32.mrb[42].mxu1  ;;  %v2506_v42 = vld [vmem:[%s3411_s13 + $0x18] sm:$0xff]  }
 0x5dc   : > { %1664 = vrot.lane.b32.xlu1 %v1662_v41, %s2794_s30  ;;  %v2325_v44 = vpop.f32.mrb[43].mxu1  ;;  %v2505_v41 = vld [vmem:[%s3411_s13 + $0x10] sm:$0xff]   ;;  %v2507_v43 = vld [vmem:[%s3411_s13 + $0x20] sm:$0xff]   ;;  %s3453_s30 = sld [smem:[#allocation27_spill]] }
 0x5dd   : > { %v2508_v44 = vld [vmem:[%s3411_s13 + $0x28] sm:$0xff]  }
 0x5e2   : > { %v2142_v47 = vld [vmem:[%s3453_s30] ss:$0 sm:$0xff]  ;;  %s3344_s30 = scalar_lea.hbm %s3457_s28, %s2157_s20 }
 0x5f2   : > { %v1207_v51 = vpop.permute.xlu1 %1206 }
 0x5f3   : > { %v1209_v52 = vsel %vm762_vm2, %v1095_v50, %v1207_v51 }
 0x5f4   : > { %1211 = vrot.lane.b32.xlu0 %v1209_v52, %s2795_s14  ;;  %s3454_s14 = sld [smem:[#allocation17_spill]] }
 0x600   : > { %817 = vadd.xlane.f32.xlu1 %v816_v54 }
 0x61d   : > { %v1436_v60 = vpop.permute.xlu0 %1435 }
 0x61e   : > { %v1438_v62 = vsel %vm762_vm2, %v1324_v59, %v1436_v60 }
 0x61f   : > { %1440 = vrot.lane.b32.xlu0 %v1438_v62, %s2796_s29  ;;  %s550_s29 = sand.u32 1, %s3454_s14   ;;  %s2798_s14 = smov [#allocation11]  }
 0x620   : > { %s2106_s18 = sshll.u32 %s550_s29, 3  ;;  %s1963_s21 = scalar_lea.sflag [#allocation5], %s550_s29 }
 0x621   : > { %v982_v6 = vpop.permute.xlu0 %981  ;;  %s552_s19 = scalar_lea.vmem [#allocation11], %s2106_s18  ;;  %s2669_s18 = sshll.u32 %s2798_s14, 4  ;;  %s2670_s18 = int_to_ptr.vmem [resolvable:$false] %s2669_s18 }
 0x622   : > { %s1978_s17 = sshll.u32 %s552_s19, 4  ;;  %s2671_s24 = scalar_lea.vmem %s2670_s18, 256  ;;  %s3346_s17 = int_to_ptr.vmem [resolvable:$true] %s1978_s17 }
 0x623   : > { %s2665_s22 = scalar_lea.vmem %s3346_s17, 128  ;;  %p2672_p4 = scmp.lt.s32.totalorder %s3346_s17, %s2670_s18 }
 0x624   : > { %p2666_p2 = scmp.ne.s32.totalorder %s3346_s17, %s2665_s22  ;;  %p2673_p5 = scmp.lt.s32.totalorder %s2671_s24, %s2665_s22 }
 0x626   : > { %p2667_p12 = pnand %p2666_p2, %p3458_p10  ;;  %p2674_p6 = por %p2673_p5, %p2672_p4 }
 0x628   : > { %p2668_p1 = pneg %p2667_p12 }
 0x62a   : > { %p2675_p7 = pnand %p2674_p6, %p2668_p1 }
 0x64e   : > { %v1665_v3 = vpop.permute.xlu1 %1664 }
 0x64f   : > { %v1667_v4 = vsel %vm762_vm2, %v1553_v2, %v1665_v3 }
 0x650   : > { %1669 = vrot.lane.b32.xlu0 %v1667_v4, %s2797_s12 }
 0x666   : > { %v1212_v9 = vpop.permute.xlu0 %1211 }
 0x68d   : > { %v818_v5 = vpop.xlane.xlu1 %817 }
 0x68e   : > { %2547 = vrcp.f32 %v818_v5 }
 0x691   : > { %v1441_v12 = vpop.permute.xlu0 %1440 }
 0x698   : > { %v2548_v7 = vpop.eup %2547 }
 0x699   : > { %v820_v8 = vmul.f32 0.17677669, %v2548_v7 }
 0x69b   : > { %v869_v10 = vmul.f32 %v3253_v53, %v820_v8  ;;  %v2136_v53 = vld [vmem:[#allocation8] ss:$0 sm:$0xff] }
 0x69d   : > { %v984_v11 = vsel %vm762_vm2, %v869_v10, %v982_v6 }
 0x69e   : > { %986 = vst.msk [vmem:[#allocation2] sm:$0xff] %vm985_vm4, %v984_v11 }
 0x69f   : > { %1215 = vst.msk [vmem:[#allocation2] sm:$0xff] %vm1214_vm5, %v1212_v9 }
 0x6a0   : > { %1444 = vst.msk [vmem:[#allocation2] sm:$0xff] %vm1443_vm6, %v1441_v12 }
 0x6c2   : > { %v1670_v13 = vpop.permute.xlu0 %1669 }
 0x6c3   : > { %1673 = vst.msk [vmem:[#allocation2] sm:$0xff] %vm1672_vm7, %v1670_v13 }
 0x6ca   : > { %v1674_v14 = vld [vmem:[#allocation2] sm:$0xff] }
 0x6cb   : > { %v1675_v15 = vadd.f32 %v1674_v14, %v3108_v49 }
 0x6cd   : > { %v1676_v16 = vpack.c.bf16 %v1675_v15, %v1675_v15 }
 0x6cf   : > { %2331 = vmatmul.mubr.msk.bf16.vlgmr.msra.gmra.mrb[28].mxu0 %vm563_vm0, %v1676_v16 }
 0x6d0   : > { %2358 = vmatprep.mubr.msk.bf16.mxu0 %vm2778_vm1, %v2777_v22  ;;  %2343 = vmatpush3.bf16.msra.mxu0 %v2503_v29 }
 0x6d1   : > { %2344 = vmatprep.subr.bf16.mxu0 %v2777_v22 }
 0x6d4   : > { %2345 = vmatpush3.bf16.msra.mxu0 %v2504_v40 }
 0x6d5   : > { %2346 = vmatprep.subr.bf16.mxu0 %v2777_v22 }
 0x6d8   : > { %2347 = vmatpush3.bf16.msra.mxu0 %v2505_v41 }
 0x6d9   : > { %2348 = vmatprep.subr.bf16.mxu0 %v2777_v22 }
 0x6dc   : > { %2349 = vmatpush3.bf16.msra.mxu0 %v2506_v42 }
 0x6dd   : > { %2350 = vmatprep.subr.bf16.mxu0 %v2777_v22 }
 0x6e0   : > { %2351 = vmatpush3.bf16.msra.mxu0 %v2507_v43 }
 0x6e1   : > { %2352 = vmatprep.subr.bf16.mxu0 %v2777_v22 }
 0x6e4   : > { %2353 = vmatpush3.bf16.msra.mxu0 %v2508_v44 }
 0x6e5   : > { %2354 = vmatprep.subr.bf16.mxu0 %v2777_v22 }
 0x6e8   : > { %2355 = vmatpush3.bf16.msra.mxu0 %v2509_v45 }
 0x6e9   : > { %2356 = vmatprep.subr.bf16.mxu0 %v2777_v22 }
 0x6ec   : > { %2357 = vmatpush3.bf16.msra.mxu0 %v2510_v46 }
 0x7a2   : > { %v1737_v17 = vpop.f32.mrb[28].mxu0 }
 0x7a3   : > { %v1738_v18 = vadd.f32 %v2136_v53, %v1737_v17  ;;  %v2332_v19 = vpop.f32.mrb[29].mxu0 }
 0x7a4   : > { %v1740_v58 = vpop.f32.mrb[30].mxu0 }
 0x7a5   : > { %v2333_v20 = vpop.f32.mrb[31].mxu0  ;;  %v1745_v21 = vsel %vm563_vm0, %v1738_v18, 0.0 }
 0x7a6   : > { %1746 = vadd.xlane.f32.xlu0 %v1745_v21 }
 0x833   : > { %v1747_v23 = vpop.xlane.xlu0 %1746 }
 0x834   : > { %v1748_v24 = vmul.f32 0.03125, %v1747_v23 }
 0x836   : > { %v1749_v25 = vsub.f32 %v1738_v18, %v1748_v24 }
 0x838   : > { %v1750_v26 = vmul.f32 %v1749_v25, %v1749_v25 }
 0x83a   : > { %v1751_v49 = vsel %vm563_vm0, %v1750_v26, 0.0 }
 0x83b   : > { %1752 = vadd.xlane.f32.xlu1 %v1751_v49 }
 0x8c8   : > { %v1753_v30 = vpop.xlane.xlu1 %1752 }
 0x8c9   : > { %v1754_v31 = vmul.f32 0.03125, %v1753_v30 }
 0x8cb   : > { %v1755_v32 = vadd.f32 1e-05, %v1754_v31 }
 0x8cd   : > { %2549 = vrsqrt.f32 %v1755_v32 }
 0x8d7   : > { %v2550_v33 = vpop.eup %2549 }
 0x8d8   : > { %v1757_v35 = vmul.f32 %v2550_v33, %v1749_v25 }
 0x8da   : > { %v1764_v37 = vmul.f32 %v2140_v34, %v1757_v35 }
 0x8dc   : > { %v1771_v38 = vadd.f32 %v2141_v36, %v1764_v37 }
 0x8de   : > { %v1772_v39 = vpack.c.bf16 %v1771_v38, %v1771_v38 }
 0x8e0   : > { %2339 = vmatmul.mubr.msk.bf16.vlgmr.msra.gmra.mrb[44].mxu1 %vm563_vm0, %v1772_v39 }
 0x9b3   : > { %v1833_v48 = vpop.f32.mrb[44].mxu1 }
 0x9b4   : > { %v1834_v50 = vadd.f32 %v2142_v47, %v1833_v48  ;;  %v2340_v51 = vpop.f32.mrb[45].mxu1 }
 0x9b5   : > { %v1836_v52 = vpop.f32.mrb[46].mxu1 }
 0x9b6   : > { %v1840_v54 = vmul.f32 0.044715, %v1834_v50  ;;  %v2341_v55 = vpop.f32.mrb[47].mxu1  ;;  %v1839_v62 = vmul.f32 0.5, %v1834_v50 }
 0x9b8   : > { %v1841_v56 = vmul.f32 %v1840_v54, %v1834_v50 }
 0x9ba   : > { %v1842_v57 = vmul.f32 %v1841_v56, %v1834_v50 }
 0x9bc   : > { %v1843_v59 = vadd.f32 %v1842_v57, %v1834_v50 }
 0x9be   : > { %v1844_v60 = vmul.f32 0.7978846, %v1843_v59 }
 0x9c0   : > { %2551 = vtanh.f32 %v1844_v60 }
 0x9ca   : > { %v2552_v22 = vpop.eup %2551 }
 0x9cb   : > { %v1846_v63 = vadd.f32 1.0, %v2552_v22 }
 0x9cd   : > { %v1847_v61 = vmul.f32 %v1846_v63, %v1839_v62 }
 0x9cf   : > { %v1848_v0 = vpack.c.bf16 %v1847_v61, %v1847_v61 }
 0x9d1   : > { %2359 = vmatmul.mubr.bf16.vlgmr.msra.gmra.mrb[32].mxu0 %v1848_v0 }
 0xaa4   : > { %v1954_v2 = vpop.f32.mrb[32].mxu0 }
 0xaa5   : > { %v1955_v3 = vadd.f32 %v2146_v1, %v1954_v2  ;;  %v2360_v4 = vpop.f32.mrb[33].mxu0 }
 0xaa6   : > { %v1957_v5 = vpop.f32.mrb[34].mxu0 }
 0xaa7   : > { %v1960_v6 = vadd.f32 %v1955_v3, %v1771_v38  ;;  %v2361_v7 = vpop.f32.mrb[35].mxu0 }
 0xaa9   : > { %1961 = vst.msk [vmem:[%s552_s19] sm:$0xff] %vm563_vm0, %v1960_v6 }
 0xaaa   : > { %2678 = shalt.err (!%p2675_p7)
}
 0xaab   : > { %s2679_s29 = scalar_lea.hbm %s3344_s30, 128  ;;  %s2683_s12 = scalar_lea.hbm %s3457_s28, 512 }
 0xaac   : > { %p2680_p9 = scmp.ne.s32.totalorder %s3344_s30, %s2679_s29  ;;  %p2684_p3 = scmp.lt.u32.totalorder %s3344_s30, %s3457_s28 }
 0xaad   : > { %p2685_p8 = scmp.lt.u32.totalorder %s2683_s12, %s2679_s29  ;;  %p2687_p2 = scmp.lt.u32.totalorder %s2679_s29, %s3344_s30 }
 0xaae   : > { %p2681_p11 = pnand %p2680_p9, %p3458_p10 }
 0xaaf   : > { %p2686_p0 = por %p2685_p8, %p2684_p3 }
 0xab0   : > { %p2682_p13 = pneg %p2681_p11 }
 0xab1   : > { %p2688_p12 = por %p2687_p2, %p2686_p0 }
 0xab3   : > { %p2689_p1 = pnand %p2688_p12, %p2682_p13 }
 0xab5   : > { %2692 = shalt.err (!%p2689_p1)
}
 0xab6   : > { %2378 = dma.vmem_to_hbm [thread:$0]  (%p3458_p10), %s3346_s17, 128, %s3344_s30, %s1963_s21  }
 0xab7 PF: > { %s3459_s19 = sld [smem:[#allocation21_spill]]  ;;  %s3460_s27 = sld [smem:[#allocation16_spill]] }
 0xab8   : > { %s3461_s15 = sld [smem:[#allocation25_spill]] }
 0xabd   : > { %p2405_p4 = scmp.ge.s32.totalorder %s3459_s19, 2  ;;  %s1990_s22 = sand.u32 1, %s3460_s27  }
 0xabe   : > { %p3462_p5 = scmp.ne.s32.totalorder %s3461_s15, 0  ;;  %s1991_s14 = scalar_lea.sflag [#allocation5], %s1990_s22 }
 0xac0   : > { %p2394_p6 = pnand %p2405_p4, %p3462_p5 }
 0xac2   : > { %2738 = dma.done.wait (!%p2394_p6), %s1991_s14, 128  }
 0xac3   : > { %2740 = vsyncadd (!%p2394_p6), %s1991_s14, 4294967168  ;;  %s31_s25 = sadd.s32 1, %s3459_s19   ;;  %s3463_s18 = sld [smem:[#allocation17_spill]] }
 0xac4   : > { %p28_p7 = scmp.ge.s32.totalorder %s31_s25, 6   ;;  %s3464_s19 = sld [smem:[#allocation18_spill]] }
 0xac5   : > { %s3465_s20 = sld [smem:[#allocation26_spill]]  ;;  %s3466_s21 = sld [smem:[#allocation19_spill]] }
 0xac6   : > { %s3467_s22 = sld [smem:[#allocation20_spill]]  ;;  %s3468_s23 = sld [smem:[#allocation22_spill]] }
 0xac7   : > { %s3469_s24 = sld [smem:[#allocation24_spill]]  ;;  %30 = sbr.rel (!%p28_p7) target bundleno = 12 (0xc), region = 133 }
 0xace   :  { %1996 = vsyncpa [#allocation4], 1 }
 0xacf   :  { %1998 = vsyncpa [#allocation4 + $0x1], 1 }
 0xad0   :  { %1999 = vsyncpa [#allocation7], 1 }
 0xad1   :  { %2000 = vsyncpa [#allocation10], 1 }
 0xad2   :  { %2001 = vsyncpa [#allocation5], 1 }
 0xad3   :  { %2003 = vsyncpa [#allocation5 + $0x1], 1 }

</bundles_post_ra>
